<compile_context>
chip_gen: v6e
topology: v6e:2x2x1
jax: 0.10.0
libtpu: 0.0.40
codegen_flags: <defaults>
</compile_context>

<pallas_src>
import math
from functools import partial

import jax
import jax.numpy as jnp
from jax.experimental import pallas as pl
from jax.experimental.pallas import tpu as pltpu


def _round_up(x, m):
    return (x + m - 1) // m * m


# ----------------------------- fused kernel -----------------------------------

def fused_encoder_kernel(
    # invariant inputs (same block every grid step -> DMA'd once)
    ids_ref, mask_ref, emb_ref,
    # per-layer streamed inputs (leading layer dim squeezed by the BlockSpec)
    wqkv_ref, wo_ref, w1_ref, w2_ref, b1_ref, vecs_ref,
    # head weights (invariant)
    wz_ref, bz_ref, wout_ref, bout_ref,
    # output
    o_ref,
    # scratch: activation carried across the layer grid axis
    x_scr,
    *, d_model,
):
    l = pl.program_id(0)
    n_last = pl.num_programs(0) - 1

    N = ids_ref.shape[0]                 # N = B * L, batch-major row order
    n_token, Dp = emb_ref.shape          # Dp = lane-padded model width (128-multiple)
    inv_d = 1.0 / float(d_model)         # LayerNorm stats over the REAL width
    eps = 1e-5

    # ---- grid step 0: embedding (bf16 one-hot @ bf16 table; padding row 0 is zero) ----
    @pl.when(l == 0)
    def _():
        ids = ids_ref[...]                                               # (N,1) i32
        iota = jax.lax.broadcasted_iota(jnp.int32, (N, n_token), 1)
        onehot = (iota == ids).astype(jnp.bfloat16)                      # exact 0/1
        x_scr[...] = jnp.dot(onehot, emb_ref[...],
                             preferred_element_type=jnp.float32)         # (N,Dp) f32

    # ---- one post-norm encoder layer (layer-l weights are the current blocks) ----
    x = x_scr[...]                                                       # (N,Dp) f32

    vec = vecs_ref[...]        # (16,Dp): [bq,bk,bv,bo,b2,g1,be1,g2,be2,...] (zero pad lanes)
    bq, bk, bv = vec[0:1], vec[1:2], vec[2:3]
    bo, b2 = vec[3:4], vec[4:5]
    g1, be1, g2, be2 = vec[5:6], vec[6:7], vec[7:8], vec[8:9]

    def layernorm(h, g, b):
        # Invariant: padded lanes of h are zero, so plain sums only see real lanes.
        mu = jnp.sum(h, axis=-1, keepdims=True) * inv_d
        var = jnp.sum(h * h, axis=-1, keepdims=True) * inv_d - mu * mu
        # g/b are zero in padded lanes -> output padded lanes stay zero.
        return (h - mu) * jax.lax.rsqrt(var + eps) * g + b

    # fused QKV projection; 1/sqrt(d) pre-folded into Wq/bq; slices are 128-lane aligned
    x_bf = x.astype(jnp.bfloat16)
    qkv = jnp.dot(x_bf, wqkv_ref[...], preferred_element_type=jnp.float32)   # (N,3Dp)
    q = (qkv[:, :Dp] + bq).astype(jnp.bfloat16)
    k = (qkv[:, Dp:2 * Dp] + bk).astype(jnp.bfloat16)
    v = (qkv[:, 2 * Dp:] + bv).astype(jnp.bfloat16)

    # flat (N,N) scores + block-diagonal causal mask (precomputed in the wrapper)
    s = jax.lax.dot_general(q, k, (((1,), (1,)), ((), ())),
                            preferred_element_type=jnp.float32) + mask_ref[...]
    s = s - jnp.max(s, axis=-1, keepdims=True)
    p = jnp.exp(s)
    p = p * pl.reciprocal(jnp.sum(p, axis=-1, keepdims=True), approx=True)

    ctx = jnp.dot(p.astype(jnp.bfloat16), v,
                  preferred_element_type=jnp.float32)                        # (N,Dp)
    attn = jnp.dot(ctx.astype(jnp.bfloat16), wo_ref[...],
                   preferred_element_type=jnp.float32) + bo

    # residual + LayerNorm1 (post-norm); dropout omitted (eval mode)
    h = layernorm(x + attn, g1, be1)

    # feed-forward (relu) + residual + LayerNorm2
    h_bf = h.astype(jnp.bfloat16)
    f = jnp.dot(h_bf, w1_ref[...], preferred_element_type=jnp.float32) + b1_ref[...]
    f = jnp.maximum(f, 0.0)
    f2 = jnp.dot(f.astype(jnp.bfloat16), w2_ref[...],
                 preferred_element_type=jnp.float32) + b2

    x_new = layernorm(h + f2, g2, be2)
    x_scr[...] = x_new

    # ---- last grid step: sigmoid -> Z -> sigmoid -> output_embedding (lane-dense) ----
    @pl.when(l == n_last)
    def _():
        xs = jax.nn.sigmoid(x_new)            # padded lanes -> 0.5, killed by zero rows of wz
        z = jnp.dot(xs.astype(jnp.bfloat16), wz_ref[...],
                    preferred_element_type=jnp.float32) + bz_ref[...]
        z = jax.nn.sigmoid(z)
        logits = jnp.dot(z.astype(jnp.bfloat16), wout_ref[...],
                         preferred_element_type=jnp.float32) + bout_ref[...]
        o_ref[...] = logits                                                  # (N,P) f32


# ----------------------------- wrapper -----------------------------------------

@partial(jax.jit, static_argnames=("d_model",))
def forward(params, src_ids, src_mask, *, d_model):
    """src_ids: (L, B) int token indices; src_mask: (L, L) additive float mask.
    Returns logits of shape (L, B, n_token), matching the PyTorch module."""
    L, B = src_ids.shape
    N = B * L
    n_token, Dp = params["emb"].shape
    n_layers = params["wqkv"].shape[0]
    F = params["w1"].shape[2]
    d_z = params["wz"].shape[1]
    P = params["wout"].shape[1]

    # batch-major flat rows (b, l) for the kernel
    ids_bm = jnp.transpose(src_ids).reshape(N, 1).astype(jnp.int32)

    # block-diagonal (N, N) additive mask: within-batch = src_mask, cross-batch = -inf
    bidx = jnp.arange(N, dtype=jnp.int32) // L
    same = bidx[:, None] == bidx[None, :]
    mask_full = jnp.where(same, jnp.tile(src_mask.astype(jnp.float32), (B, B)), -jnp.inf)

    in_specs = [
        pl.BlockSpec((N, 1), lambda l: (0, 0)),                        # ids
        pl.BlockSpec((N, N), lambda l: (0, 0)),                        # block-diag mask
        pl.BlockSpec((n_token, Dp), lambda l: (0, 0)),                 # embedding table
        pl.BlockSpec((None, Dp, 3 * Dp), lambda l: (l, 0, 0)),         # wqkv   (streamed)
        pl.BlockSpec((None, Dp, Dp), lambda l: (l, 0, 0)),             # wo     (streamed)
        pl.BlockSpec((None, Dp, F), lambda l: (l, 0, 0)),              # w1     (streamed)
        pl.BlockSpec((None, F, Dp), lambda l: (l, 0, 0)),              # w2     (streamed)
        pl.BlockSpec((None, 1, F), lambda l: (l, 0, 0)),               # b1     (streamed)
        pl.BlockSpec((None, 16, Dp), lambda l: (l, 0, 0)),             # packed vecs
        pl.BlockSpec((Dp, d_z), lambda l: (0, 0)),                     # wz
        pl.BlockSpec((1, d_z), lambda l: (0, 0)),                      # bz
        pl.BlockSpec((d_z, P), lambda l: (0, 0)),                      # wout (lane-padded)
        pl.BlockSpec((1, P), lambda l: (0, 0)),                        # bout
    ]

    # explicit scoped-VMEM budget: 2x streamed layer weights (double buffer)
    # + invariants + activations, with headroom.
    def nbytes(a):
        return a.size * a.dtype.itemsize
    per_layer = sum(nbytes(params[k]) // n_layers
                    for k in ("wqkv", "wo", "w1", "w2", "b1", "vecs"))
    invariant = sum(nbytes(params[k]) for k in ("emb", "wz", "bz", "wout", "bout"))
    act_bytes = (N * Dp + N * P + N * N + N * 1) * 4
    vmem_bytes = min(int(2 * per_layer + 2 * invariant + act_bytes + (16 << 20)),
                     64 * 1024 * 1024)

    out = pl.pallas_call(
        partial(fused_encoder_kernel, d_model=d_model),
        out_shape=jax.ShapeDtypeStruct((N, P), jnp.float32),
        grid_spec=pltpu.PrefetchScalarGridSpec(
            num_scalar_prefetch=0,
            grid=(n_layers,),
            in_specs=in_specs,
            out_specs=pl.BlockSpec((N, P), lambda l: (0, 0)),
            scratch_shapes=[pltpu.VMEM((N, Dp), jnp.float32)],
        ),
        compiler_params=pltpu.CompilerParams(
            dimension_semantics=("arbitrary",),   # layer axis carries state (x_scr)
            vmem_limit_bytes=vmem_bytes,
        ),
    )(ids_bm, mask_full, params["emb"],
      params["wqkv"], params["wo"], params["w1"], params["w2"],
      params["b1"], params["vecs"],
      params["wz"], params["bz"], params["wout"], params["bout"])

    # (N, P) -> (L, B, n_token): reshape / transpose / vocab slice outside the kernel
    return jnp.transpose(out.reshape(B, L, P), (1, 0, 2))[..., :n_token]


# ----------------------------- parameter init ----------------------------------

def init_params(key, n_token, d_model, n_layers, dim_ff=2048, d_z=1024):
    Dp = _round_up(max(d_model, 128), 128)          # lane-padded model width
    P = _round_up(n_token, 128)                     # lane-padded vocab
    keys = iter(jax.random.split(key, 8 + 16 * n_layers))

    def nrm(shape, scale=0.02):
        return (scale * jax.random.normal(next(keys), shape)).astype(jnp.float32)

    def pad2(w, r, c):
        return jnp.zeros((r, c), jnp.float32).at[:w.shape[0], :w.shape[1]].set(w)

    def padv(v, n):
        return jnp.zeros((n,), jnp.float32).at[:v.shape[0]].set(v)

    inv_sqrt_d = 1.0 / math.sqrt(d_model)

    emb = nrm((n_token, d_model)).at[0].set(0.0)    # padding_idx = 0
    emb = pad2(emb, n_token, Dp)

    wqkv, wo, w1, w2, b1, vecs = [], [], [], [], [], []
    for _ in range(n_layers):
        wq = nrm((d_model, d_model)) * inv_sqrt_d   # fold 1/sqrt(d) into Wq / bq
        wk = nrm((d_model, d_model))
        wv = nrm((d_model, d_model))
        bq = nrm((d_model,)) * inv_sqrt_d
        bk = nrm((d_model,)); bv = nrm((d_model,))
        wo_l = nrm((d_model, d_model)); bo = nrm((d_model,))
        w1_l = nrm((d_model, dim_ff));  b1_l = nrm((dim_ff,))
        w2_l = nrm((dim_ff, d_model));  b2 = nrm((d_model,))
        g1 = jnp.ones((d_model,), jnp.float32); be1 = jnp.zeros((d_model,), jnp.float32)
        g2 = jnp.ones((d_model,), jnp.float32); be2 = jnp.zeros((d_model,), jnp.float32)

        wqkv.append(jnp.concatenate(
            [pad2(wq, Dp, Dp), pad2(wk, Dp, Dp), pad2(wv, Dp, Dp)], axis=1))  # (Dp, 3Dp)
        wo.append(pad2(wo_l, Dp, Dp))
        w1.append(pad2(w1_l, Dp, dim_ff))
        w2.append(pad2(w2_l, dim_ff, Dp))
        b1.append(b1_l.reshape(1, dim_ff))

        v = jnp.zeros((16, Dp), jnp.float32)        # padded lanes stay zero (LN invariant)
        for r, vv in enumerate((bq, bk, bv, bo, b2, g1, be1, g2, be2)):
            v = v.at[r].set(padv(vv, Dp))
        vecs.append(v)

    wz = pad2(nrm((d_model, d_z)), Dp, d_z)         # zero rows past d_model (kill sigmoid(0)=0.5 pad)
    bz = nrm((d_z,)).reshape(1, d_z)
    wout = pad2(nrm((d_z, n_token)), d_z, P)
    bout = padv(nrm((n_token,)), P).reshape(1, P)

    return dict(
        emb=emb.astype(jnp.bfloat16),
        wqkv=jnp.stack(wqkv).astype(jnp.bfloat16),
        wo=jnp.stack(wo).astype(jnp.bfloat16),
        w1=jnp.stack(w1).astype(jnp.bfloat16),
        w2=jnp.stack(w2).astype(jnp.bfloat16),
        b1=jnp.stack(b1),
        vecs=jnp.stack(vecs),
        wz=wz.astype(jnp.bfloat16), bz=bz,
        wout=wout.astype(jnp.bfloat16), bout=bout,
    )


# ----------------------------- demo ---------------------------------------------

if __name__ == "__main__":
    n_token = 64          # vocabulary size
    d_model = 32          # == `sequence_size` (used as d_model by the module)
    n_layers = 2          # constructor default is 6; depth only
    L, B = 8, 2           # source length, batch

    key = jax.random.PRNGKey(0)
    k_params, k_src = jax.random.split(key)

    params = init_params(k_params, n_token, d_model, n_layers)
    src = jax.random.randint(k_src, (L, B), 0, n_token, dtype=jnp.int32)
    # causal float mask, as built in `fit`: -inf strictly above the diagonal
    src_mask = jnp.triu(jnp.full((L, L), -jnp.inf, dtype=jnp.float32), k=1)

    out = forward(params, src, src_mask, d_model=d_model)
    jax.block_until_ready(out)
    assert out.shape == (L, B, n_token) and out.dtype == jnp.float32
    assert bool(jnp.all(jnp.isfinite(out)))
    print("KERNEL_OK")
</pallas_src>

<mosaic_0001>
module attributes {stable_mosaic.version = 11 : i64} {
  func.func @fused_encoder_kernel(%arg0: i32, %arg1: memref<16x1xi32, #tpu.memory_space<vmem>>, %arg2: memref<16x16xf32, #tpu.memory_space<vmem>>, %arg3: memref<64x128xbf16, #tpu.memory_space<vmem>>, %arg4: memref<1x128x384xbf16, #tpu.memory_space<vmem>>, %arg5: memref<1x128x128xbf16, #tpu.memory_space<vmem>>, %arg6: memref<1x128x2048xbf16, #tpu.memory_space<vmem>>, %arg7: memref<1x2048x128xbf16, #tpu.memory_space<vmem>>, %arg8: memref<1x1x2048xf32, #tpu.memory_space<vmem>>, %arg9: memref<1x16x128xf32, #tpu.memory_space<vmem>>, %arg10: memref<128x1024xbf16, #tpu.memory_space<vmem>>, %arg11: memref<1x1024xf32, #tpu.memory_space<vmem>>, %arg12: memref<1024x128xbf16, #tpu.memory_space<vmem>>, %arg13: memref<1x128xf32, #tpu.memory_space<vmem>>, %arg14: memref<16x128xf32, #tpu.memory_space<vmem>>, %arg15: memref<16x128xf32, #tpu.memory_space<vmem>>) attributes {dimension_semantics = [#tpu.dimension_semantics<arbitrary>], iteration_bounds = array<i64: 2>, scalar_prefetch = 0 : i64, scratch_operands = 1 : i64, tpu.core_type = #tpu.core_type<tc>, window_params = [{pipeline_mode = #tpu.pipeline_mode<synchronous>, transform_indices = @transform_0, window_bounds = array<i64: 16, 1>}, {pipeline_mode = #tpu.pipeline_mode<synchronous>, transform_indices = @transform_1, window_bounds = array<i64: 16, 16>}, {pipeline_mode = #tpu.pipeline_mode<synchronous>, transform_indices = @transform_2, window_bounds = array<i64: 64, 128>}, {transform_indices = @transform_3, window_bounds = array<i64: 1, 128, 384>}, {transform_indices = @transform_4, window_bounds = array<i64: 1, 128, 128>}, {transform_indices = @transform_5, window_bounds = array<i64: 1, 128, 2048>}, {transform_indices = @transform_6, window_bounds = array<i64: 1, 2048, 128>}, {transform_indices = @transform_7, window_bounds = array<i64: 1, 1, 2048>}, {transform_indices = @transform_8, window_bounds = array<i64: 1, 16, 128>}, {pipeline_mode = #tpu.pipeline_mode<synchronous>, transform_indices = @transform_9, window_bounds = array<i64: 128, 1024>}, {pipeline_mode = #tpu.pipeline_mode<synchronous>, transform_indices = @transform_10, window_bounds = array<i64: 1, 1024>}, {pipeline_mode = #tpu.pipeline_mode<synchronous>, transform_indices = @transform_11, window_bounds = array<i64: 1024, 128>}, {pipeline_mode = #tpu.pipeline_mode<synchronous>, transform_indices = @transform_12, window_bounds = array<i64: 1, 128>}, {pipeline_mode = #tpu.pipeline_mode<synchronous>, transform_indices = @transform_13, window_bounds = array<i64: 16, 128>}]} {
    %c0_i32 = arith.constant 0 : i32
    %0 = arith.cmpi eq, %arg0, %c0_i32 : i32
    %1 = arith.extui %0 : i1 to i32
    %c0_i32_0 = arith.constant 0 : i32
    %2 = arith.cmpi ne, %1, %c0_i32_0 : i32
    scf.if %2 {
      %c0_43 = arith.constant 0 : index
      %c0_44 = arith.constant 0 : index
      %118 = vector.load %arg1[%c0_43, %c0_44] : memref<16x1xi32, #tpu.memory_space<vmem>>, vector<16x1xi32>
      %119 = tpu.iota {dimensions = array<i32: 1>} : vector<16x64xi32>
      %120 = vector.broadcast %118 : vector<16x1xi32> to vector<16x64xi32>
      %121 = arith.cmpi eq, %119, %120 : vector<16x64xi32>
      %122 = arith.extui %121 : vector<16x64xi1> to vector<16x64xi32>
      %123 = arith.sitofp %122 : vector<16x64xi32> to vector<16x64xf32>
      %124 = arith.truncf %123 : vector<16x64xf32> to vector<16x64xbf16>
      %c0_45 = arith.constant 0 : index
      %c0_46 = arith.constant 0 : index
      %125 = vector.load %arg3[%c0_45, %c0_46] : memref<64x128xbf16, #tpu.memory_space<vmem>>, vector<64x128xbf16>
      %cst_47 = arith.constant dense<0.000000e+00> : vector<16x128xf32>
      %126 = tpu.matmul %124, %125, %cst_47 {dimension_numbers = #tpu.dot_dimension_numbers<[1], [0], [0], [1], [0, 0, 1, 1], [], []>} : vector<16x64xbf16>, vector<64x128xbf16>, vector<16x128xf32> -> vector<16x128xf32>
      %c0_48 = arith.constant 0 : index
      %c0_49 = arith.constant 0 : index
      %127 = vector.load %arg15[%c0_48, %c0_49] : memref<16x128xf32, #tpu.memory_space<vmem>>, vector<16x128xf32>
      tpu.vector_store %arg15[%c0_48, %c0_49], %126 {strides = array<i32>} : memref<16x128xf32, #tpu.memory_space<vmem>>, vector<16x128xf32>,
    } else {
    }
    %c0 = arith.constant 0 : index
    %c0_1 = arith.constant 0 : index
    %3 = vector.load %arg15[%c0, %c0_1] : memref<16x128xf32, #tpu.memory_space<vmem>>, vector<16x128xf32>
    %c0_2 = arith.constant 0 : index
    %c0_3 = arith.constant 0 : index
    %c0_4 = arith.constant 0 : index
    %4 = vector.load %arg9[%c0_2, %c0_3, %c0_4] : memref<1x16x128xf32, #tpu.memory_space<vmem>>, vector<1x16x128xf32>
    %5 = vector.shape_cast %4 : vector<1x16x128xf32> to vector<16x128xf32>
    %6 = vector.extract_strided_slice %5 {offsets = [0, 0], sizes = [1, 128], strides = [1, 1]} : vector<16x128xf32> to vector<1x128xf32>
    %7 = vector.extract_strided_slice %5 {offsets = [1, 0], sizes = [1, 128], strides = [1, 1]} : vector<16x128xf32> to vector<1x128xf32>
    %8 = vector.extract_strided_slice %5 {offsets = [2, 0], sizes = [1, 128], strides = [1, 1]} : vector<16x128xf32> to vector<1x128xf32>
    %9 = vector.extract_strided_slice %5 {offsets = [3, 0], sizes = [1, 128], strides = [1, 1]} : vector<16x128xf32> to vector<1x128xf32>
    %10 = vector.extract_strided_slice %5 {offsets = [4, 0], sizes = [1, 128], strides = [1, 1]} : vector<16x128xf32> to vector<1x128xf32>
    %11 = vector.extract_strided_slice %5 {offsets = [5, 0], sizes = [1, 128], strides = [1, 1]} : vector<16x128xf32> to vector<1x128xf32>
    %12 = vector.extract_strided_slice %5 {offsets = [6, 0], sizes = [1, 128], strides = [1, 1]} : vector<16x128xf32> to vector<1x128xf32>
    %13 = vector.extract_strided_slice %5 {offsets = [7, 0], sizes = [1, 128], strides = [1, 1]} : vector<16x128xf32> to vector<1x128xf32>
    %14 = vector.extract_strided_slice %5 {offsets = [8, 0], sizes = [1, 128], strides = [1, 1]} : vector<16x128xf32> to vector<1x128xf32>
    %15 = arith.truncf %3 : vector<16x128xf32> to vector<16x128xbf16>
    %c0_5 = arith.constant 0 : index
    %c0_6 = arith.constant 0 : index
    %c0_7 = arith.constant 0 : index
    %16 = vector.load %arg4[%c0_5, %c0_6, %c0_7] : memref<1x128x384xbf16, #tpu.memory_space<vmem>>, vector<1x128x384xbf16>
    %17 = vector.shape_cast %16 : vector<1x128x384xbf16> to vector<128x384xbf16>
    %cst = arith.constant dense<0.000000e+00> : vector<16x384xf32>
    %18 = tpu.matmul %15, %17, %cst {dimension_numbers = #tpu.dot_dimension_numbers<[1], [0], [0], [1], [0, 0, 1, 1], [], []>} : vector<16x128xbf16>, vector<128x384xbf16>, vector<16x384xf32> -> vector<16x384xf32>
    %19 = vector.extract_strided_slice %18 {offsets = [0, 0], sizes = [16, 128], strides = [1, 1]} : vector<16x384xf32> to vector<16x128xf32>
    %20 = vector.broadcast %6 : vector<1x128xf32> to vector<16x128xf32>
    %21 = arith.addf %19, %20 : vector<16x128xf32>
    %22 = arith.truncf %21 : vector<16x128xf32> to vector<16x128xbf16>
    %23 = vector.extract_strided_slice %18 {offsets = [0, 128], sizes = [16, 128], strides = [1, 1]} : vector<16x384xf32> to vector<16x128xf32>
    %24 = vector.broadcast %7 : vector<1x128xf32> to vector<16x128xf32>
    %25 = arith.addf %23, %24 : vector<16x128xf32>
    %26 = arith.truncf %25 : vector<16x128xf32> to vector<16x128xbf16>
    %27 = vector.extract_strided_slice %18 {offsets = [0, 256], sizes = [16, 128], strides = [1, 1]} : vector<16x384xf32> to vector<16x128xf32>
    %28 = vector.broadcast %8 : vector<1x128xf32> to vector<16x128xf32>
    %29 = arith.addf %27, %28 : vector<16x128xf32>
    %30 = arith.truncf %29 : vector<16x128xf32> to vector<16x128xbf16>
    %cst_8 = arith.constant dense<0.000000e+00> : vector<16x16xf32>
    %31 = tpu.matmul %22, %26, %cst_8 {dimension_numbers = #tpu.dot_dimension_numbers<[1], [1], [0], [0], [0, 0, 1, 0], [], []>} : vector<16x128xbf16>, vector<16x128xbf16>, vector<16x16xf32> -> vector<16x16xf32>
    %c0_9 = arith.constant 0 : index
    %c0_10 = arith.constant 0 : index
    %32 = vector.load %arg2[%c0_9, %c0_10] : memref<16x16xf32, #tpu.memory_space<vmem>>, vector<16x16xf32>
    %33 = arith.addf %31, %32 : vector<16x16xf32>
    %cst_11 = arith.constant dense<0xFF800000> : vector<16xf32>
    %34 = vector.multi_reduction <maximumf>, %33, %cst_11 [1] : vector<16x16xf32> to vector<16xf32>
    %35 = vector.shape_cast %34 : vector<16xf32> to vector<16x1xf32>
    %36 = vector.broadcast %35 : vector<16x1xf32> to vector<16x16xf32>
    %37 = arith.subf %33, %36 : vector<16x16xf32>
    %38 = math.exp %37 : vector<16x16xf32>
    %cst_12 = arith.constant dense<0.000000e+00> : vector<16xf32>
    %39 = vector.multi_reduction <add>, %38, %cst_12 [1] : vector<16x16xf32> to vector<16xf32>
    %40 = vector.shape_cast %39 : vector<16xf32> to vector<16x1xf32>
    %41 = tpu.reciprocal %40 {approx = true} : vector<16x1xf32> -> vector<16x1xf32>
    %42 = vector.broadcast %41 : vector<16x1xf32> to vector<16x16xf32>
    %43 = arith.mulf %38, %42 : vector<16x16xf32>
    %44 = arith.truncf %43 : vector<16x16xf32> to vector<16x16xbf16>
    %cst_13 = arith.constant dense<0.000000e+00> : vector<16x128xf32>
    %45 = tpu.matmul %44, %30, %cst_13 {dimension_numbers = #tpu.dot_dimension_numbers<[1], [0], [0], [1], [0, 0, 1, 1], [], []>} : vector<16x16xbf16>, vector<16x128xbf16>, vector<16x128xf32> -> vector<16x128xf32>
    %46 = arith.truncf %45 : vector<16x128xf32> to vector<16x128xbf16>
    %c0_14 = arith.constant 0 : index
    %c0_15 = arith.constant 0 : index
    %c0_16 = arith.constant 0 : index
    %47 = vector.load %arg5[%c0_14, %c0_15, %c0_16] : memref<1x128x128xbf16, #tpu.memory_space<vmem>>, vector<1x128x128xbf16>
    %48 = vector.shape_cast %47 : vector<1x128x128xbf16> to vector<128x128xbf16>
    %cst_17 = arith.constant dense<0.000000e+00> : vector<16x128xf32>
    %49 = tpu.matmul %46, %48, %cst_17 {dimension_numbers = #tpu.dot_dimension_numbers<[1], [0], [0], [1], [0, 0, 1, 1], [], []>} : vector<16x128xbf16>, vector<128x128xbf16>, vector<16x128xf32> -> vector<16x128xf32>
    %50 = vector.broadcast %9 : vector<1x128xf32> to vector<16x128xf32>
    %51 = arith.addf %49, %50 : vector<16x128xf32>
    %52 = arith.addf %3, %51 : vector<16x128xf32>
    %cst_18 = arith.constant dense<0.000000e+00> : vector<16xf32>
    %53 = vector.multi_reduction <add>, %52, %cst_18 [1] : vector<16x128xf32> to vector<16xf32>
    %54 = vector.shape_cast %53 : vector<16xf32> to vector<16x1xf32>
    %cst_19 = arith.constant 3.125000e-02 : f32
    %55 = vector.broadcast %cst_19 : f32 to vector<16x1xf32>
    %56 = arith.mulf %54, %55 : vector<16x1xf32>
    %57 = arith.mulf %52, %52 : vector<16x128xf32>
    %cst_20 = arith.constant dense<0.000000e+00> : vector<16xf32>
    %58 = vector.multi_reduction <add>, %57, %cst_20 [1] : vector<16x128xf32> to vector<16xf32>
    %59 = vector.shape_cast %58 : vector<16xf32> to vector<16x1xf32>
    %cst_21 = arith.constant 3.125000e-02 : f32
    %60 = vector.broadcast %cst_21 : f32 to vector<16x1xf32>
    %61 = arith.mulf %59, %60 : vector<16x1xf32>
    %62 = arith.mulf %56, %56 : vector<16x1xf32>
    %63 = arith.subf %61, %62 : vector<16x1xf32>
    %64 = vector.broadcast %56 : vector<16x1xf32> to vector<16x128xf32>
    %65 = arith.subf %52, %64 : vector<16x128xf32>
    %cst_22 = arith.constant 9.99999974E-6 : f32
    %66 = vector.broadcast %cst_22 : f32 to vector<16x1xf32>
    %67 = arith.addf %63, %66 : vector<16x1xf32>
    %68 = math.rsqrt %67 : vector<16x1xf32>
    %69 = vector.broadcast %68 : vector<16x1xf32> to vector<16x128xf32>
    %70 = arith.mulf %65, %69 : vector<16x128xf32>
    %71 = vector.broadcast %11 : vector<1x128xf32> to vector<16x128xf32>
    %72 = arith.mulf %70, %71 : vector<16x128xf32>
    %73 = vector.broadcast %12 : vector<1x128xf32> to vector<16x128xf32>
    %74 = arith.addf %72, %73 : vector<16x128xf32>
    %75 = arith.truncf %74 : vector<16x128xf32> to vector<16x128xbf16>
    %c0_23 = arith.constant 0 : index
    %c0_24 = arith.constant 0 : index
    %c0_25 = arith.constant 0 : index
    %76 = vector.load %arg6[%c0_23, %c0_24, %c0_25] : memref<1x128x2048xbf16, #tpu.memory_space<vmem>>, vector<1x128x2048xbf16>
    %77 = vector.shape_cast %76 : vector<1x128x2048xbf16> to vector<128x2048xbf16>
    %cst_26 = arith.constant dense<0.000000e+00> : vector<16x2048xf32>
    %78 = tpu.matmul %75, %77, %cst_26 {dimension_numbers = #tpu.dot_dimension_numbers<[1], [0], [0], [1], [0, 0, 1, 1], [], []>} : vector<16x128xbf16>, vector<128x2048xbf16>, vector<16x2048xf32> -> vector<16x2048xf32>
    %c0_27 = arith.constant 0 : index
    %c0_28 = arith.constant 0 : index
    %c0_29 = arith.constant 0 : index
    %79 = vector.load %arg8[%c0_27, %c0_28, %c0_29] : memref<1x1x2048xf32, #tpu.memory_space<vmem>>, vector<1x1x2048xf32>
    %80 = vector.shape_cast %79 : vector<1x1x2048xf32> to vector<1x2048xf32>
    %81 = vector.broadcast %80 : vector<1x2048xf32> to vector<16x2048xf32>
    %82 = arith.addf %78, %81 : vector<16x2048xf32>
    %cst_30 = arith.constant 0.000000e+00 : f32
    %83 = vector.broadcast %cst_30 : f32 to vector<16x2048xf32>
    %84 = arith.maximumf %82, %83 : vector<16x2048xf32>
    %85 = arith.truncf %84 : vector<16x2048xf32> to vector<16x2048xbf16>
    %c0_31 = arith.constant 0 : index
    %c0_32 = arith.constant 0 : index
    %c0_33 = arith.constant 0 : index
    %86 = vector.load %arg7[%c0_31, %c0_32, %c0_33] : memref<1x2048x128xbf16, #tpu.memory_space<vmem>>, vector<1x2048x128xbf16>
    %87 = vector.shape_cast %86 : vector<1x2048x128xbf16> to vector<2048x128xbf16>
    %cst_34 = arith.constant dense<0.000000e+00> : vector<16x128xf32>
    %88 = tpu.matmul %85, %87, %cst_34 {dimension_numbers = #tpu.dot_dimension_numbers<[1], [0], [0], [1], [0, 0, 1, 1], [], []>} : vector<16x2048xbf16>, vector<2048x128xbf16>, vector<16x128xf32> -> vector<16x128xf32>
    %89 = vector.broadcast %10 : vector<1x128xf32> to vector<16x128xf32>
    %90 = arith.addf %88, %89 : vector<16x128xf32>
    %91 = arith.addf %74, %90 : vector<16x128xf32>
    %cst_35 = arith.constant dense<0.000000e+00> : vector<16xf32>
    %92 = vector.multi_reduction <add>, %91, %cst_35 [1] : vector<16x128xf32> to vector<16xf32>
    %93 = vector.shape_cast %92 : vector<16xf32> to vector<16x1xf32>
    %cst_36 = arith.constant 3.125000e-02 : f32
    %94 = vector.broadcast %cst_36 : f32 to vector<16x1xf32>
    %95 = arith.mulf %93, %94 : vector<16x1xf32>
    %96 = arith.mulf %91, %91 : vector<16x128xf32>
    %cst_37 = arith.constant dense<0.000000e+00> : vector<16xf32>
    %97 = vector.multi_reduction <add>, %96, %cst_37 [1] : vector<16x128xf32> to vector<16xf32>
    %98 = vector.shape_cast %97 : vector<16xf32> to vector<16x1xf32>
    %cst_38 = arith.constant 3.125000e-02 : f32
    %99 = vector.broadcast %cst_38 : f32 to vector<16x1xf32>
    %100 = arith.mulf %98, %99 : vector<16x1xf32>
    %101 = arith.mulf %95, %95 : vector<16x1xf32>
    %102 = arith.subf %100, %101 : vector<16x1xf32>
    %103 = vector.broadcast %95 : vector<16x1xf32> to vector<16x128xf32>
    %104 = arith.subf %91, %103 : vector<16x128xf32>
    %cst_39 = arith.constant 9.99999974E-6 : f32
    %105 = vector.broadcast %cst_39 : f32 to vector<16x1xf32>
    %106 = arith.addf %102, %105 : vector<16x1xf32>
    %107 = math.rsqrt %106 : vector<16x1xf32>
    %108 = vector.broadcast %107 : vector<16x1xf32> to vector<16x128xf32>
    %109 = arith.mulf %104, %108 : vector<16x128xf32>
    %110 = vector.broadcast %13 : vector<1x128xf32> to vector<16x128xf32>
    %111 = arith.mulf %109, %110 : vector<16x128xf32>
    %112 = vector.broadcast %14 : vector<1x128xf32> to vector<16x128xf32>
    %113 = arith.addf %111, %112 : vector<16x128xf32>
    %c0_40 = arith.constant 0 : index
    %c0_41 = arith.constant 0 : index
    %114 = vector.load %arg15[%c0_40, %c0_41] : memref<16x128xf32, #tpu.memory_space<vmem>>, vector<16x128xf32>
    tpu.vector_store %arg15[%c0_40, %c0_41], %113 {strides = array<i32>} : memref<16x128xf32, #tpu.memory_space<vmem>>, vector<16x128xf32>,
    %c1_i32 = arith.constant 1 : i32
    %115 = arith.cmpi eq, %arg0, %c1_i32 : i32
    %116 = arith.extui %115 : i1 to i32
    %c0_i32_42 = arith.constant 0 : i32
    %117 = arith.cmpi ne, %116, %c0_i32_42 : i32
    scf.if %117 {
      %118 = arith.negf %113 : vector<16x128xf32>
      %119 = math.exp %118 : vector<16x128xf32>
      %cst_43 = arith.constant 1.000000e+00 : f32
      %120 = vector.broadcast %cst_43 : f32 to vector<16x128xf32>
      %121 = arith.addf %120, %119 : vector<16x128xf32>
      %122 = arith.divf %120, %121 : vector<16x128xf32>
      %123 = arith.truncf %122 : vector<16x128xf32> to vector<16x128xbf16>
      %c0_44 = arith.constant 0 : index
      %c0_45 = arith.constant 0 : index
      %124 = vector.load %arg10[%c0_44, %c0_45] : memref<128x1024xbf16, #tpu.memory_space<vmem>>, vector<128x1024xbf16>
      %cst_46 = arith.constant dense<0.000000e+00> : vector<16x1024xf32>
      %125 = tpu.matmul %123, %124, %cst_46 {dimension_numbers = #tpu.dot_dimension_numbers<[1], [0], [0], [1], [0, 0, 1, 1], [], []>} : vector<16x128xbf16>, vector<128x1024xbf16>, vector<16x1024xf32> -> vector<16x1024xf32>
      %c0_47 = arith.constant 0 : index
      %c0_48 = arith.constant 0 : index
      %126 = vector.load %arg11[%c0_47, %c0_48] : memref<1x1024xf32, #tpu.memory_space<vmem>>, vector<1x1024xf32>
      %127 = vector.broadcast %126 : vector<1x1024xf32> to vector<16x1024xf32>
      %128 = arith.addf %125, %127 : vector<16x1024xf32>
      %129 = arith.negf %128 : vector<16x1024xf32>
      %130 = math.exp %129 : vector<16x1024xf32>
      %cst_49 = arith.constant 1.000000e+00 : f32
      %131 = vector.broadcast %cst_49 : f32 to vector<16x1024xf32>
      %132 = arith.addf %131, %130 : vector<16x1024xf32>
      %133 = arith.divf %131, %132 : vector<16x1024xf32>
      %134 = arith.truncf %133 : vector<16x1024xf32> to vector<16x1024xbf16>
      %c0_50 = arith.constant 0 : index
      %c0_51 = arith.constant 0 : index
      %135 = vector.load %arg12[%c0_50, %c0_51] : memref<1024x128xbf16, #tpu.memory_space<vmem>>, vector<1024x128xbf16>
      %cst_52 = arith.constant dense<0.000000e+00> : vector<16x128xf32>
      %136 = tpu.matmul %134, %135, %cst_52 {dimension_numbers = #tpu.dot_dimension_numbers<[1], [0], [0], [1], [0, 0, 1, 1], [], []>} : vector<16x1024xbf16>, vector<1024x128xbf16>, vector<16x128xf32> -> vector<16x128xf32>
      %c0_53 = arith.constant 0 : index
      %c0_54 = arith.constant 0 : index
      %137 = vector.load %arg13[%c0_53, %c0_54] : memref<1x128xf32, #tpu.memory_space<vmem>>, vector<1x128xf32>
      %138 = vector.broadcast %137 : vector<1x128xf32> to vector<16x128xf32>
      %139 = arith.addf %136, %138 : vector<16x128xf32>
      %c0_55 = arith.constant 0 : index
      %c0_56 = arith.constant 0 : index
      %140 = vector.load %arg14[%c0_55, %c0_56] : memref<16x128xf32, #tpu.memory_space<vmem>>, vector<16x128xf32>
      tpu.vector_store %arg14[%c0_55, %c0_56], %139 {strides = array<i32>} : memref<16x128xf32, #tpu.memory_space<vmem>>, vector<16x128xf32>,
    } else {
    }
    return
  }
  func.func @transform_0(%arg0: i32) -> (i32, i32) {
    %c0_i32 = arith.constant 0 : i32
    %c0_i32_0 = arith.constant 0 : i32
    %c0_i32_1 = arith.constant 0 : i32
    return %c0_i32, %c0_i32_0 : i32, i32
  }
  func.func @transform_1(%arg0: i32) -> (i32, i32) {
    %c0_i32 = arith.constant 0 : i32
    %c0_i32_0 = arith.constant 0 : i32
    %c0_i32_1 = arith.constant 0 : i32
    return %c0_i32, %c0_i32_0 : i32, i32
  }
  func.func @transform_2(%arg0: i32) -> (i32, i32) {
    %c0_i32 = arith.constant 0 : i32
    %c0_i32_0 = arith.constant 0 : i32
    %c0_i32_1 = arith.constant 0 : i32
    return %c0_i32, %c0_i32_0 : i32, i32
  }
  func.func @transform_3(%arg0: i32) -> (i32, i32, i32) {
    %c0_i32 = arith.constant 0 : i32
    %c0_i32_0 = arith.constant 0 : i32
    %c0_i32_1 = arith.constant 0 : i32
    return %arg0, %c0_i32, %c0_i32_0 : i32, i32, i32
  }
  func.func @transform_4(%arg0: i32) -> (i32, i32, i32) {
    %c0_i32 = arith.constant 0 : i32
    %c0_i32_0 = arith.constant 0 : i32
    %c0_i32_1 = arith.constant 0 : i32
    return %arg0, %c0_i32, %c0_i32_0 : i32, i32, i32
  }
  func.func @transform_5(%arg0: i32) -> (i32, i32, i32) {
    %c0_i32 = arith.constant 0 : i32
    %c0_i32_0 = arith.constant 0 : i32
    %c0_i32_1 = arith.constant 0 : i32
    return %arg0, %c0_i32, %c0_i32_0 : i32, i32, i32
  }
  func.func @transform_6(%arg0: i32) -> (i32, i32, i32) {
    %c0_i32 = arith.constant 0 : i32
    %c0_i32_0 = arith.constant 0 : i32
    %c0_i32_1 = arith.constant 0 : i32
    return %arg0, %c0_i32, %c0_i32_0 : i32, i32, i32
  }
  func.func @transform_7(%arg0: i32) -> (i32, i32, i32) {
    %c0_i32 = arith.constant 0 : i32
    %c0_i32_0 = arith.constant 0 : i32
    %c0_i32_1 = arith.constant 0 : i32
    return %arg0, %c0_i32, %c0_i32_0 : i32, i32, i32
  }
  func.func @transform_8(%arg0: i32) -> (i32, i32, i32) {
    %c0_i32 = arith.constant 0 : i32
    %c0_i32_0 = arith.constant 0 : i32
    %c0_i32_1 = arith.constant 0 : i32
    return %arg0, %c0_i32, %c0_i32_0 : i32, i32, i32
  }
  func.func @transform_9(%arg0: i32) -> (i32, i32) {
    %c0_i32 = arith.constant 0 : i32
    %c0_i32_0 = arith.constant 0 : i32
    %c0_i32_1 = arith.constant 0 : i32
    return %c0_i32, %c0_i32_0 : i32, i32
  }
  func.func @transform_10(%arg0: i32) -> (i32, i32) {
    %c0_i32 = arith.constant 0 : i32
    %c0_i32_0 = arith.constant 0 : i32
    %c0_i32_1 = arith.constant 0 : i32
    return %c0_i32, %c0_i32_0 : i32, i32
  }
  func.func @transform_11(%arg0: i32) -> (i32, i32) {
    %c0_i32 = arith.constant 0 : i32
    %c0_i32_0 = arith.constant 0 : i32
    %c0_i32_1 = arith.constant 0 : i32
    return %c0_i32, %c0_i32_0 : i32, i32
  }
  func.func @transform_12(%arg0: i32) -> (i32, i32) {
    %c0_i32 = arith.constant 0 : i32
    %c0_i32_0 = arith.constant 0 : i32
    %c0_i32_1 = arith.constant 0 : i32
    return %c0_i32, %c0_i32_0 : i32, i32
  }
  func.func @transform_13(%arg0: i32) -> (i32, i32) {
    %c0_i32 = arith.constant 0 : i32
    %c0_i32_0 = arith.constant 0 : i32
    %c0_i32_1 = arith.constant 0 : i32
    return %c0_i32, %c0_i32_0 : i32, i32
  }
}

</mosaic_0001>

<bundles_post_ra>
// kernel: tile.9
= control target key start
LH: loop header
LB: loop body
LE: loop exit
PB: predicated region body
PF: predicated region fallthrough
CT: control target
= control target key end

     0   :  { %vm83_vm0 = vcmask 1047556   ;;  %vm85_vm1 = vcmask 64512   ;;  %vm104_vm2 = vcmask 130112   ;;  %s226_s0 = inlined_call_operand.vmem [shape: f32[2,8,2,8], index: 0, kind: input, shape index: {}]   ;;  %s227_s1 = inlined_call_operand.vmem [shape: f32[16,16], index: 1, kind: output, shape index: {}]  }
   0x1   :  { %v139_v0 = vld [vmem:[%s226_s0 + $0xe] sm:$0x3]  ;;  %v140_v1 = vld [vmem:[%s226_s0 + $0xc] sm:$0x3]  ;;  %v141_v2 = vld [vmem:[%s226_s0 + $0xa] sm:$0x3] }
   0x2   :  { %49 = vst [vmem:[#allocation0 + $0x38] sm:$0x3] %v139_v0  ;;  %54 = vst [vmem:[#allocation0 + $0x30] sm:$0x3] %v140_v1  ;;  %v142_v3 = vld [vmem:[%s226_s0 + $0x8] sm:$0x3] }
   0x3   :  { %59 = vst [vmem:[#allocation0 + $0x28] sm:$0x3] %v141_v2  ;;  %v143_v4 = vld [vmem:[%s226_s0 + $0x6] sm:$0x3]  ;;  %v144_v5 = vld [vmem:[%s226_s0 + $0x4] sm:$0x3] }
   0x4   :  { %64 = vst [vmem:[#allocation0 + $0x20] sm:$0x3] %v142_v3  ;;  %69 = vst [vmem:[#allocation0 + $0x18] sm:$0x3] %v143_v4  ;;  %v145_v6 = vld [vmem:[%s226_s0 + $0x2] sm:$0x3] }
   0x5   :  { %74 = vst [vmem:[#allocation0 + $0x10] sm:$0x3] %v144_v5  ;;  %v79_v7 = vld [vmem:[%s226_s0] sm:$0x3]  ;;  %78 = vst [vmem:[#allocation0 + $0x8] sm:$0x3] %v145_v6 }
   0x6   :  { %80 = vst [vmem:[#allocation0] sm:$0x3] %v79_v7  ;;  %v131_v8 = vld [vmem:[%s226_s0 + $0x1e] sm:$0x3]  ;;  %v132_v9 = vld [vmem:[%s226_s0 + $0x1c] sm:$0x3] }
   0x7   :  { %v133_v10 = vld [vmem:[%s226_s0 + $0x1a] sm:$0x3]  ;;  %9 = vst [vmem:[#allocation0 + $0x78] sm:$0x3] %v131_v8  ;;  %14 = vst [vmem:[#allocation0 + $0x70] sm:$0x3] %v132_v9 }
   0x8   :  { %19 = vst [vmem:[#allocation0 + $0x68] sm:$0x3] %v133_v10  ;;  %v134_v11 = vld [vmem:[%s226_s0 + $0x18] sm:$0x3]  ;;  %v135_v12 = vld [vmem:[%s226_s0 + $0x16] sm:$0x3] }
   0x9   :  { %v136_v13 = vld [vmem:[%s226_s0 + $0x14] sm:$0x3]  ;;  %24 = vst [vmem:[#allocation0 + $0x60] sm:$0x3] %v134_v11  ;;  %29 = vst [vmem:[#allocation0 + $0x58] sm:$0x3] %v135_v12 }
   0xa   :  { %34 = vst [vmem:[#allocation0 + $0x50] sm:$0x3] %v136_v13  ;;  %v137_v14 = vld [vmem:[%s226_s0 + $0x12] sm:$0x3]  ;;  %v138_v15 = vld [vmem:[%s226_s0 + $0x10] sm:$0x3] }
   0xb   :  { %39 = vst [vmem:[#allocation0 + $0x48] sm:$0x3] %v137_v14  ;;  %44 = vst [vmem:[#allocation0 + $0x40] sm:$0x3] %v138_v15  ;;  %s149_s0 = smov 8  }
   0xc   :  { %v99_v16 = vld [vmem:[#allocation0 + $0x1] ss:$8 sm:$0xf0]   ;;  %v82_v17 = vld [vmem:[#allocation0] ss:$8 sm:$0xf0]  }
   0xd   :  { %v97_v18 = vld [vmem:[#allocation0 + $0x1] ss:$8 sm:$0xf]   ;;  %v81_v19 = vld [vmem:[#allocation0] ss:$8 sm:$0xf]  }
   0xe   :  { %v101_v20 = vsel %vm83_vm0, %v99_v16, %v97_v18  ;;  %v84_v21 = vsel %vm83_vm0, %v82_v17, %v81_v19 }
   0xf   :  { %102 = vrot.lane.b32.xlu0 %v101_v20, %s149_s0  ;;  %86 = vst.msk [vmem:[%s227_s1] sm:$0xff] %vm85_vm1, %v84_v21  }
  0x10   :  { %v109_v22 = vld [vmem:[#allocation0 + $0x41] ss:$8 sm:$0xf0]   ;;  %v90_v23 = vld [vmem:[#allocation0 + $0x40] ss:$8 sm:$0xf0]  }
  0x12   :  { %v107_v24 = vld [vmem:[#allocation0 + $0x41] ss:$8 sm:$0xf]   ;;  %v88_v25 = vld [vmem:[#allocation0 + $0x40] ss:$8 sm:$0xf]  }
  0x13   :  { %v111_v26 = vsel %vm83_vm0, %v109_v22, %v107_v24  ;;  %v92_v27 = vsel %vm83_vm0, %v90_v23, %v88_v25 }
  0x14   :  { %146 = vst.msk [vmem:[%s227_s1 + $0x8] sm:$0xff] %vm85_vm1, %v92_v27   ;;  %112 = vrot.lane.b32.xlu0 %v111_v26, %s149_s0 }
  0x81   :  { %v103_v28 = vpop.permute.xlu0 %102  }
  0x82   :  { %105 = vst.msk [vmem:[%s227_s1] sm:$0xff] %vm104_vm2, %v103_v28  }
  0x86   :  { %v113_v29 = vpop.permute.xlu0 %112  }
  0x87   :  { %147 = vst.msk [vmem:[%s227_s1 + $0x8] sm:$0xff] %vm104_vm2, %v113_v29  }

// kernel: tile.8
= control target key start
LH: loop header
LB: loop body
LE: loop exit
PB: predicated region body
PF: predicated region fallthrough
CT: control target
= control target key end

     0   :  { %2 = vsyncpa [#allocation1], 0  ;;  %s101_s6 = smov [#allocation0]   ;;  %s163_s0 = inlined_call_operand.hbm [shape: f32[8,8], index: 0, kind: input, shape index: {}]   ;;  %s164_s1 = inlined_call_operand.vmem [shape: f32[2,8,2,8], index: 1, kind: output, shape index: {}]  }
   0x1   :  { %s9_s7 = sshll.u32 %s101_s6, 4  ;;  %s10_s7 = int_to_ptr.vmem [resolvable:$true] %s9_s7 }
   0x2   :  { %s87_s8 = scalar_lea.vmem %s10_s7, 128  ;;  %p92_p1 = scmp.lt.s32.totalorder %s10_s7, %s10_s7 }
   0x3   :  { %p88_p0 = scmp.ne.s32.totalorder %s10_s7, %s87_s8  ;;  %p93_p2 = scmp.lt.s32.totalorder %s87_s8, %s87_s8 }
   0x5   :  { %p94_p3 = por %p93_p2, %p92_p1 }
   0x7   :  { %p95_p4 = pnand %p94_p3, %p88_p0 }
   0x9   :  { %98 = shalt.err (!%p95_p4)
}
   0xa   :  { %12 = dma.hbm_to_vmem [thread:$0]  %s163_s0, 128, %s10_s7, [#allocation1]  }
   0xb   :  { %99 = dma.done.wait [#allocation1], 128  }
   0xc   :  { %100 = vsyncadd [#allocation1], 4294967168  ;;  %v16_v0 = vld [vmem:[#allocation0] ss:$0 sm:$0xff]  ;;  %v21_v1 = vld [vmem:[#allocation0 + $0x1] ss:$0 sm:$0xff] }
   0xd   :  { %v27_v2 = vld [vmem:[#allocation0 + $0x2] ss:$0 sm:$0xff]  ;;  %17 = vst [vmem:[%s164_s1] sm:$0x3] %v16_v0  ;;  %63 = vst [vmem:[%s164_s1 + $0x10] sm:$0x3] %v16_v0 }
   0xe   :  { %64 = vst [vmem:[%s164_s1 + $0x2] sm:$0x3] %v21_v1  ;;  %65 = vst [vmem:[%s164_s1 + $0x12] sm:$0x3] %v21_v1  ;;  %v33_v3 = vld [vmem:[#allocation0 + $0x3] ss:$0 sm:$0xff] }
   0xf   :  { %66 = vst [vmem:[%s164_s1 + $0x4] sm:$0x3] %v27_v2  ;;  %67 = vst [vmem:[%s164_s1 + $0x14] sm:$0x3] %v27_v2  ;;  %v39_v4 = vld [vmem:[#allocation0 + $0x4] ss:$0 sm:$0xff] }
  0x10   :  { %v45_v5 = vld [vmem:[#allocation0 + $0x5] ss:$0 sm:$0xff]  ;;  %68 = vst [vmem:[%s164_s1 + $0x6] sm:$0x3] %v33_v3  ;;  %69 = vst [vmem:[%s164_s1 + $0x16] sm:$0x3] %v33_v3 }
  0x11   :  { %70 = vst [vmem:[%s164_s1 + $0x8] sm:$0x3] %v39_v4  ;;  %71 = vst [vmem:[%s164_s1 + $0x18] sm:$0x3] %v39_v4  ;;  %v51_v6 = vld [vmem:[#allocation0 + $0x6] ss:$0 sm:$0xff] }
  0x12   :  { %72 = vst [vmem:[%s164_s1 + $0xa] sm:$0x3] %v45_v5  ;;  %73 = vst [vmem:[%s164_s1 + $0x1a] sm:$0x3] %v45_v5  ;;  %v57_v7 = vld [vmem:[#allocation0 + $0x7] ss:$0 sm:$0xff] }
  0x13   :  { %74 = vst [vmem:[%s164_s1 + $0xc] sm:$0x3] %v51_v6  ;;  %75 = vst [vmem:[%s164_s1 + $0x1c] sm:$0x3] %v51_v6 }
  0x14   :  { %76 = vst [vmem:[%s164_s1 + $0xe] sm:$0x3] %v57_v7  ;;  %77 = vst [vmem:[%s164_s1 + $0x1e] sm:$0x3] %v57_v7 }
  0x15   :  { %62 = vsyncpa [#allocation1], 1 }

// kernel: forward.1
= control target key start
LH: loop header
LB: loop body
LE: loop exit
PB: predicated region body
PF: predicated region fallthrough
CT: control target
= control target key end

     0   :  { %s8014_s0 = inlined_call_operand.vmem [shape: s32[16,1], index: 0, kind: input, shape index: {}]   ;;  %s8015_s1 = inlined_call_operand.vmem [shape: f32[16,16], index: 1, kind: input, shape index: {}]   ;;  %s8016_s2 = inlined_call_operand.hbm [shape: bf16[64,128], index: 2, kind: input, shape index: {}]   ;;  %s8017_s3 = inlined_call_operand.hbm [shape: bf16[2,128,384], index: 3, kind: input, shape index: {}]   ;;  %s8018_s4 = inlined_call_operand.vmem [shape: bf16[2,128,128], index: 4, kind: input, shape index: {}]   ;;  %s8019_s5 = inlined_call_operand.hbm [shape: bf16[2,128,2048], index: 5, kind: input, shape index: {}]   ;;  %s8020_s6 = inlined_call_operand.hbm [shape: bf16[2,2048,128], index: 6, kind: input, shape index: {}]   ;;  %s8021_s7 = inlined_call_operand.vmem [shape: f32[2,1,2048], index: 7, kind: input, shape index: {}]   ;;  %s8022_s8 = inlined_call_operand.hbm [shape: f32[2,16,128], index: 8, kind: input, shape index: {}]   ;;  %s8023_s9 = inlined_call_operand.hbm [shape: bf16[128,1024], index: 9, kind: input, shape index: {}]   ;;  %s8024_s10 = inlined_call_operand.hbm [shape: f32[1,1024], index: 10, kind: input, shape index: {}]   ;;  %s8025_s11 = inlined_call_operand.hbm [shape: bf16[1024,128], index: 11, kind: input, shape index: {}]   ;;  %s8026_s12 = inlined_call_operand.hbm [shape: f32[1,128], index: 12, kind: input, shape index: {}]   ;;  %s8027_s13 = inlined_call_operand.vmem [shape: f32[16,128], index: 13, kind: output, shape index: {}]  }
   0x1   :  { %8049 = sst [smem:[#allocation26_spill]] %s8014_s0 }
   0x2   :  { %8050 = sst [smem:[#allocation27_spill]] %s8015_s1 }
   0x3   :  { %8051 = sst [smem:[#allocation28_spill]] %s8017_s3 }
   0x4   :  { %8052 = sst [smem:[#allocation29_spill]] %s8018_s4 }
   0x5   :  { %8053 = sst [smem:[#allocation30_spill]] %s8021_s7 }
   0x6   :  { %8054 = sst [smem:[#allocation31_spill]] %s8023_s9 }
   0x7   :  { %8055 = sst [smem:[#allocation32_spill]] %s8025_s11 }
   0x8   :  { %8056 = sst [smem:[#allocation33_spill]] %s8027_s13 }
   0x9   :  { %18 = vsyncpa [#allocation4], 0 }
   0xa   :  { %19 = vsyncpa [#allocation6], 0 }
   0xb   :  { %21 = vsyncpa [#allocation6 + $0x1], 0 }
   0xc   :  { %22 = vsyncpa [#allocation9], 0 }
   0xd   :  { %24 = vsyncpa [#allocation9 + $0x1], 0 }
   0xe   :  { %25 = vsyncpa [#allocation12], 0 }
   0xf   :  { %26 = vsyncpa [#allocation15], 0  ;;  %s7196_s25 = smov 0   ;;  %s7198_s26 = smov 0  }
  0x10   :  { %s7200_s27 = smov 0   ;;  %s7202_s28 = smov 0  }
  0x11 LB: > { %8057 = sst [smem:[#allocation22_spill]] %s7095_s27  ;;  %s7101_s29 = smov [#allocation11]   ;;  %s7099_s28 = sphi %s7202_s28, %s8095_s28   ;;  %s7095_s27 = sphi %s7200_s27, %s8097_s27   ;;  %s7091_s26 = sphi %s7198_s26, %s8099_s26   ;;  %s7087_s25 = sphi %s7196_s25, %s8098_s25  }
  0x12   : > { %s392_s30 = sshll.u32 %s7101_s29, 4  ;;  %s7217_s14 = sadd.s32 4294967295, %s7099_s28   ;;  %s393_s30 = int_to_ptr.vmem [resolvable:$true] %s392_s30 }
  0x13   : > { %p5522_p0 = scmp.ge.s32.totalorder %s7099_s28, 1  ;;  %p8028_p1 = scmp.eq.s32.totalorder %s7217_s14, 0 }
  0x14   : > { %p361_p2 = scmp.lt.s32.totalorder %s7099_s28, 3  ;;  %s7102_s17 = smov [#allocation14]  }
  0x15   : > { %s416_s18 = sshll.u32 %s7102_s17, 4  ;;  %s6818_s20 = scalar_lea.vmem %s393_s30, 8192  ;;  %s417_s18 = int_to_ptr.vmem [resolvable:$true] %s416_s18 }
  0x16   : > { %p7223_p4 = pnand %p5522_p0, %p361_p2  ;;  %p6819_p8 = scmp.ne.s32.totalorder %s393_s30, %s6818_s20 }
  0x17   : > { %p6826_p11 = scmp.lt.s32.totalorder %s393_s30, %s393_s30  ;;  %p6827_p12 = scmp.lt.s32.totalorder %s6818_s20, %s6818_s20 }
  0x18   : > { %s8058_s15 = scalar_select %p7223_p4, 1, 0 }
  0x19   : > { %p6388_p5 = pneg %p7223_p4  ;;  %p6828_p13 = por %p6827_p12, %p6826_p11 }
  0x1b   : > { %p7231_p6 = pnand %p6388_p5, %p8028_p1 }
  0x1d   : > { %s8059_s16 = scalar_select %p7231_p6, 1, 0 }
  0x1e   : > { %p7237_p7 = pneg %p7231_p6 }
  0x20   : > { %s8060_s19 = scalar_select %p7237_p7, 1, 0 }
  0x21   : > { %p6821_p9 = pnand %p6819_p8, %p7237_p7 }
  0x23   : > { %p6822_p10 = pneg %p6821_p9 }
  0x25   : > { %p6829_p0 = pnand %p6828_p13, %p6822_p10 }
  0x27   : > { %6832 = shalt.err (!%p6829_p0)
}
  0x28   : > { %s7103_s21 = smov 512   ;;  %s7104_s22 = smov 32  }
  0x29   : > { %s8061_s9 = sld [smem:[#allocation31_spill]]  ;;  %s6844_s29 = scalar_lea.vmem %s417_s18, 8192 }
  0x2a   : > { %p6845_p2 = scmp.ne.s32.totalorder %s417_s18, %s6844_s29  ;;  %p6852_p9 = scmp.lt.s32.totalorder %s417_s18, %s417_s18 }
  0x2b   : > { %p6853_p3 = scmp.lt.s32.totalorder %s6844_s29, %s6844_s29 }
  0x2c   : > { %p6847_p5 = pnand %p6845_p2, %p7237_p7 }
  0x2d   : > { %p6854_p1 = por %p6853_p3, %p6852_p9 }
  0x2e   : > { %p6848_p8 = pneg %p6847_p5 }
  0x2f   : > { %6394 = dma.hbm_to_vmem [thread:$0]  (!%p7231_p6), %s8061_s9, 8192, %s393_s30, [#allocation12], %s7103_s21, %s7103_s21, %s7104_s22  }
  0x30   : > { %p6855_p11 = pnand %p6854_p1, %p6848_p8 }
  0x32   : > { %6858 = shalt.err (!%p6855_p11)
}
  0x33   : > { %s8029_s17 = smov 64   ;;  %s8031_s30 = smov 4  }
  0x34   : > { %s8062_s11 = sld [smem:[#allocation32_spill]]  ;;  %s7259_s22 = sadd.s32 1, %s7099_s28  }
  0x35   : > { %8063 = sst [smem:[#allocation23_spill]] %s7259_s22  ;;  %s102_s23 = sadd.s32 1, %s7095_s27 }
  0x36   : > { %s99_s24 = ssub.s32 %s7099_s28, %s7259_s22  ;;  %p109_p1 = scmp.ne.s32.totalorder %s7095_s27, %s7091_s26 }
  0x37   : > { %p100_p3 = scmp.eq.s32.totalorder %s99_s24, 0  ;;  %p110_p10 = scmp.eq.s32.totalorder %s7099_s28, 0 }
  0x38   : > { %p115_p12 = scmp.ne.s32.totalorder %s7091_s26, %s7087_s25  ;;  %p6422_p13 = scmp.lt.s32.totalorder %s7099_s28, 2 }
  0x39   : > { %s7271_s29 = scalar_select %p100_p3, %s7095_s27, %s102_s23  }
  0x3a   : > { %6400 = dma.hbm_to_vmem [thread:$0]  (!%p7231_p6), %s8062_s11, 8192, %s417_s18, [#allocation15], %s8029_s17, %s8029_s17, %s8031_s30  }
  0x3b   : > { %8064 = sst [smem:[#allocation24_spill]] %s7271_s29  ;;  %p111_p0 = por %p110_p10, %p109_p1 }
  0x3c   : > { %p8065_p2 = scmp.eq.s32.totalorder %s7217_s14, 0  ;;  %s7281_s20 = sand.u32 1, %s7095_s27  }
  0x3d   : > { %s6357_s21 = smul.u32 192, %s7281_s20  ;;  %p7285_p8 = pnand %p6422_p13, %p111_p0 }
  0x3e   : > { %p7275_p5 = por %p8065_p2, %p115_p12  ;;  %s6358_s17 = smul.u32 3072, %s7099_s28 }
  0x3f   : > { %s8068_s24 = scalar_select %p7285_p8, 1, 0 }
  0x40   : > { %s8066_s9 = scalar_select %p7275_p5, 1, 0 }
  0x41   : > { %s8069_s3 = sld [smem:[#allocation28_spill]]  ;;  %s445_s18 = scalar_lea.vmem [#allocation5], %s6357_s21 }
  0x42   : > { %8067 = sst [smem:[#allocation25_spill]] %s8066_s9  ;;  %s452_s11 = sshll.u32 %s445_s18, 4  ;;  %s7294_s11 = int_to_ptr.vmem [resolvable:$true] %s452_s11 }
  0x43   : > { %s8070_s27 = sand.u32 1, %s7099_s28   ;;  %p7305_p11 = pneg %p7285_p8 }
  0x44   : > { %s7299_s22 = scalar_lea.sflag [#allocation6], %s8070_s27 }
  0x47   : > { %s7292_s30 = scalar_lea.hbm %s8069_s3, %s6358_s17  ;;  %s6864_s18 = scalar_lea.hbm %s8069_s3, 6144 }
  0x48   : > { %s6859_s13 = scalar_lea.hbm %s7292_s30, 3072  ;;  %p6865_p10 = scmp.lt.s32.totalorder %s7292_s30, %s8069_s3 }
  0x49   : > { %p6860_p9 = scmp.ne.s32.totalorder %s7292_s30, %s6859_s13  ;;  %p6866_p12 = scmp.lt.s32.totalorder %s6864_s18, %s6859_s13 }
  0x4b   : > { %p6862_p1 = pnand %p7305_p11, %p6860_p9  ;;  %p6867_p13 = por %p6866_p12, %p6865_p10 }
  0x4d   : > { %p6863_p3 = pneg %p6862_p1 }
  0x4f   : > { %p6868_p0 = pnand %p6867_p13, %p6863_p3 }
  0x51   : > { %6871 = shalt.err (!%p6868_p0)
}
  0x52   : > { %s6872_s27 = scalar_lea.vmem %s7294_s11, 3072  ;;  %s7107_s29 = smov [#allocation5]  }
  0x53   : > { %p6873_p2 = scmp.ne.s32.totalorder %s7294_s11, %s6872_s27  ;;  %s6877_s17 = sshll.u32 %s7107_s29, 4  ;;  %s6878_s17 = int_to_ptr.vmem [resolvable:$false] %s6877_s17 }
  0x54   : > { %s6879_s21 = scalar_lea.vmem %s6878_s17, 6144  ;;  %p6880_p5 = scmp.lt.s32.totalorder %s7294_s11, %s6878_s17 }
  0x55   : > { %p6875_p9 = pnand %p6873_p2, %p7305_p11  ;;  %p6881_p4 = scmp.lt.s32.totalorder %s6879_s21, %s6872_s27 }
  0x57   : > { %p6876_p1 = pneg %p6875_p9  ;;  %p6882_p6 = por %p6881_p4, %p6880_p5 }
  0x59   : > { %p6883_p7 = pnand %p6882_p6, %p6876_p1 }
  0x5b   : > { %6886 = shalt.err (!%p6883_p7)
}
  0x5c   : > { %s7108_s13 = smov 192   ;;  %s7109_s18 = smov 12  }
  0x5d   : > { %6407 = dma.hbm_to_vmem [thread:$0]  (!%p7285_p8), %s7292_s30, 3072, %s7294_s11, %s7299_s22, %s7108_s13, %s7108_s13, %s7109_s18  }
  0x5e   : > { %s5998_s29 = sshll.u32 %s7099_s28, 14  ;;  %s8072_s17 = sshll.u32 %s7281_s20, 10 }
  0x5f   : > { %s7332_s27 = scalar_lea.hbm %s8019_s5, %s5998_s29  ;;  %s474_s21 = scalar_lea.vmem [#allocation7], %s8072_s17 }
  0x60   : > { %s481_s3 = sshll.u32 %s474_s21, 4  ;;  %s7341_s4 = scalar_lea.hbm %s8020_s6, %s5998_s29  ;;  %s7336_s3 = int_to_ptr.vmem [resolvable:$true] %s481_s3 }
  0x61   : > { %s8073_s9 = smov %s8072_s17  ;;  %s7110_s13 = smov [#allocation3]  }
  0x62   : > { %s495_s11 = scalar_lea.vmem [#allocation8], %s8073_s9  ;;  %s7347_s18 = sshll.u32 %s7110_s13, 4  ;;  %s380_s18 = int_to_ptr.vmem [resolvable:$true] %s7347_s18 }
  0x63   : > { %s502_s30 = sshll.u32 %s495_s11, 4  ;;  %s8074_s25 = sand.u32 1, %s7099_s28   ;;  %s7345_s30 = int_to_ptr.vmem [resolvable:$true] %s502_s30 }
  0x64   : > { %s7351_s23 = scalar_lea.sflag [#allocation9], %s8074_s25  ;;  %s6887_s17 = scalar_lea.hbm %s7341_s4, 16384 }
  0x65   : > { %p6888_p4 = scmp.ne.s32.totalorder %s7341_s4, %s6887_s17  ;;  %s6892_s29 = scalar_lea.hbm %s8020_s6, 32768 }
  0x66   : > { %p6893_p5 = scmp.lt.s32.totalorder %s7341_s4, %s8020_s6  ;;  %p6894_p3 = scmp.lt.s32.totalorder %s6892_s29, %s6887_s17 }
  0x67   : > { %p6890_p6 = pnand %p6888_p4, %p7305_p11 }
  0x68   : > { %p6895_p10 = por %p6894_p3, %p6893_p5 }
  0x69   : > { %p6891_p7 = pneg %p6890_p6 }
  0x6b   : > { %p6896_p12 = pnand %p6895_p10, %p6891_p7 }
  0x6d   : > { %6899 = shalt.err (!%p6896_p12)
}
  0x6e   : > { %s6900_s11 = scalar_lea.vmem %s7345_s30, 16384  ;;  %s7111_s13 = smov [#allocation8]  }
  0x6f   : > { %p6901_p13 = scmp.ne.s32.totalorder %s7345_s30, %s6900_s11  ;;  %s6905_s25 = sshll.u32 %s7111_s13, 4  ;;  %s6906_s25 = int_to_ptr.vmem [resolvable:$false] %s6905_s25 }
  0x70   : > { %s6907_s0 = scalar_lea.vmem %s6906_s25, 32768  ;;  %p6908_p9 = scmp.lt.s32.totalorder %s7345_s30, %s6906_s25 }
  0x71   : > { %p6903_p0 = pnand %p6901_p13, %p7305_p11  ;;  %p6909_p1 = scmp.lt.s32.totalorder %s6907_s0, %s6900_s11 }
  0x73   : > { %p6904_p2 = pneg %p6903_p0  ;;  %p6910_p4 = por %p6909_p1, %p6908_p9 }
  0x75   : > { %p6911_p6 = pnand %p6910_p4, %p6904_p2 }
  0x77   : > { %6914 = shalt.err (!%p6911_p6)
}
  0x78   : > { %s8075_s17 = smov 4   ;;  %s8076_s7 = smov 64  }
  0x79   : > { %6413 = dma.hbm_to_vmem [thread:$0]  (!%p7285_p8), %s7341_s4, 16384, %s7345_s30, %s7351_s23, %s8076_s7, %s8076_s7, %s8075_s17  }
  0x7a   : > { %s6926_s29 = scalar_lea.vmem %s380_s18, 512  ;;  %p8077_p5 = scmp.ne.s32.totalorder %s8060_s19, 0 }
  0x7b   : > { %p6927_p7 = scmp.ne.s32.totalorder %s380_s18, %s6926_s29  ;;  %p6934_p12 = scmp.lt.s32.totalorder %s380_s18, %s380_s18 }
  0x7c   : > { %p6935_p13 = scmp.lt.s32.totalorder %s6926_s29, %s6926_s29 }
  0x7d   : > { %p6929_p3 = pnand %p6927_p7, %p8077_p5 }
  0x7e   : > { %p6936_p0 = por %p6935_p13, %p6934_p12 }
  0x7f   : > { %p6930_p10 = pneg %p6929_p3 }
  0x81   : > { %p6937_p2 = pnand %p6936_p0, %p6930_p10 }
  0x83   : > { %6940 = shalt.err (!%p6937_p2)
}
  0x84   : > { %p8078_p9 = scmp.ne.s32.totalorder %s8059_s16, 0  ;;  %s7112_s4 = smov [#allocation13]  }
  0x85   : > { %s406_s30 = sshll.u32 %s7112_s4, 4  ;;  %s7113_s11 = smov [#allocation16]   ;;  %s407_s30 = int_to_ptr.vmem [resolvable:$true] %s406_s30 }
  0x86   : > { %6391 = dma.hbm_to_vmem [thread:$0]  (!%p8078_p9), %s8016_s2, 512, %s380_s18, [#allocation4], %s8076_s7, %s8076_s7, %s8075_s17  }
  0x87   : > { %s430_s13 = sshll.u32 %s7113_s11, 4  ;;  %s6952_s25 = scalar_lea.vmem %s407_s30, 128  ;;  %s431_s13 = int_to_ptr.vmem [resolvable:$true] %s430_s13 }
  0x88   : > { %p6953_p1 = scmp.ne.s32.totalorder %s407_s30, %s6952_s25  ;;  %p6960_p7 = scmp.lt.s32.totalorder %s407_s30, %s407_s30 }
  0x89   : > { %p6961_p3 = scmp.lt.s32.totalorder %s6952_s25, %s6952_s25 }
  0x8a   : > { %p6955_p4 = pnand %p6953_p1, %p8077_p5 }
  0x8b   : > { %p6962_p10 = por %p6961_p3, %p6960_p7 }
  0x8c   : > { %p6956_p6 = pneg %p6955_p4 }
  0x8e   : > { %p6963_p12 = pnand %p6962_p10, %p6956_p6 }
  0x90   : > { %6966 = shalt.err (!%p6963_p12)
}
  0x91   : > { %6397 = dma.hbm_to_vmem [thread:$0]  (!%p8078_p9), %s8024_s10, 128, %s407_s30, [#allocation12]  }
  0x92   : > { %s6978_s18 = scalar_lea.vmem %s431_s13, 16  ;;  %s6985_s17 = scalar_lea.vmem %s431_s13, 32 }
  0x93   : > { %p6979_p13 = scmp.ne.s32.totalorder %s431_s13, %s6978_s18  ;;  %p6986_p1 = scmp.lt.s32.totalorder %s431_s13, %s431_s13 }
  0x94   : > { %p6987_p4 = scmp.lt.s32.totalorder %s6985_s17, %s6978_s18 }
  0x95   : > { %p6981_p0 = pnand %p6979_p13, %p8077_p5 }
  0x96   : > { %p6988_p8 = por %p6987_p4, %p6986_p1 }
  0x97   : > { %p6982_p2 = pneg %p6981_p0 }
  0x99   : > { %p6989_p7 = pnand %p6988_p8, %p6982_p2 }
  0x9b   : > { %6992 = shalt.err (!%p6989_p7)
}
  0x9c   : > { %6403 = dma.hbm_to_vmem [thread:$0]  (!%p8078_p9), %s8026_s12, 16, %s431_s13, [#allocation15]  }
  0x9d   : > { %s6993_s4 = scalar_lea.hbm %s7332_s27, 16384  ;;  %s6998_s11 = scalar_lea.hbm %s8019_s5, 32768 }
  0x9e   : > { %p6994_p6 = scmp.ne.s32.totalorder %s7332_s27, %s6993_s4  ;;  %p6999_p8 = scmp.lt.s32.totalorder %s7332_s27, %s8019_s5 }
  0x9f   : > { %p7000_p10 = scmp.lt.s32.totalorder %s6998_s11, %s6993_s4 }
  0xa0   : > { %p6996_p5 = pnand %p6994_p6, %p7305_p11 }
  0xa1   : > { %p7001_p12 = por %p7000_p10, %p6999_p8 }
  0xa2   : > { %p6997_p3 = pneg %p6996_p5 }
  0xa4   : > { %p7002_p13 = pnand %p7001_p12, %p6997_p3 }
  0xa6   : > { %7005 = shalt.err (!%p7002_p13)
}
  0xa7   : > { %s7006_s16 = scalar_lea.vmem %s7336_s3, 16384  ;;  %s7114_s13 = smov [#allocation7]  }
  0xa8   : > { %p7007_p9 = scmp.ne.s32.totalorder %s7336_s3, %s7006_s16  ;;  %s7011_s29 = sshll.u32 %s7114_s13, 4  ;;  %s7012_s29 = int_to_ptr.vmem [resolvable:$false] %s7011_s29 }
  0xa9   : > { %s7013_s18 = scalar_lea.vmem %s7012_s29, 32768  ;;  %p7014_p1 = scmp.lt.s32.totalorder %s7336_s3, %s7012_s29 }
  0xaa   : > { %p7009_p0 = pnand %p7007_p9, %p7305_p11  ;;  %p7015_p4 = scmp.lt.s32.totalorder %s7013_s18, %s7006_s16 }
  0xac   : > { %p7010_p2 = pneg %p7009_p0  ;;  %p7016_p7 = por %p7015_p4, %p7014_p1 }
  0xae   : > { %p7017_p6 = pnand %p7016_p7, %p7010_p2 }
  0xb0   : > { %7020 = shalt.err (!%p7017_p6)
}
  0xb1   : > { %s7115_s17 = smov 1024   ;;  %p8079_p5 = scmp.ne.s32.totalorder %s8068_s24, 0 }
  0xb2   : > { %s5536_s21 = sshll.u32 %s7281_s20, 4  ;;  %s6000_s9 = sshll.u32 %s7099_s28, 8 }
  0xb3   : > { %6410 = dma.hbm_to_vmem [thread:$0]  (!%p8079_p5), %s7332_s27, 16384, %s7336_s3, %s7299_s22, %s7115_s17, %s7115_s17, %s8076_s7  }
  0xb4   : > { %s7429_s30 = scalar_lea.hbm %s8022_s8, %s6000_s9  ;;  %s523_s11 = scalar_lea.vmem [#allocation10], %s5536_s21 }
  0xb5   : > { %s530_s25 = sshll.u32 %s523_s11, 4  ;;  %s7021_s0 = scalar_lea.hbm %s7429_s30, 256  ;;  %s7431_s25 = int_to_ptr.vmem [resolvable:$true] %s530_s25 }
  0xb6   : > { %p7022_p3 = scmp.ne.s32.totalorder %s7429_s30, %s7021_s0  ;;  %s7026_s28 = scalar_lea.hbm %s8022_s8, 512 }
  0xb7   : > { %p7027_p12 = scmp.lt.s32.totalorder %s7429_s30, %s8022_s8  ;;  %p7028_p13 = scmp.lt.s32.totalorder %s7026_s28, %s7021_s0 }
  0xb8   : > { %p7024_p8 = pnand %p7022_p3, %p7305_p11 }
  0xb9   : > { %p7029_p9 = por %p7028_p13, %p7027_p12 }
  0xba   : > { %p7025_p10 = pneg %p7024_p8 }
  0xbc   : > { %p7030_p0 = pnand %p7029_p9, %p7025_p10 }
  0xbe   : > { %7033 = shalt.err (!%p7030_p0)
}
  0xbf   : > { %s7034_s7 = scalar_lea.vmem %s7431_s25, 256  ;;  %s7116_s16 = smov [#allocation10]  }
  0xc0   : > { %p7035_p2 = scmp.ne.s32.totalorder %s7431_s25, %s7034_s7  ;;  %s7039_s13 = sshll.u32 %s7116_s16, 4  ;;  %s7040_s13 = int_to_ptr.vmem [resolvable:$false] %s7039_s13 }
  0xc1   : > { %s7041_s29 = scalar_lea.vmem %s7040_s13, 512  ;;  %p7042_p7 = scmp.lt.s32.totalorder %s7431_s25, %s7040_s13 }
  0xc2   : > { %p7037_p1 = pnand %p7035_p2, %p7305_p11  ;;  %p7043_p6 = scmp.lt.s32.totalorder %s7041_s29, %s7034_s7 }
  0xc4   : > { %p7038_p4 = pneg %p7037_p1  ;;  %p7044_p3 = por %p7043_p6, %p7042_p7 }
  0xc6   : > { %p7045_p8 = pnand %p7044_p3, %p7038_p4 }
  0xc8   : > { %7048 = shalt.err (!%p7045_p8)
}
  0xc9   : > { %s7117_s18 = smov 128   ;;  %s7118_s17 = smov 8  }
  0xca   : > { %6416 = dma.hbm_to_vmem [thread:$0]  (!%p8079_p5), %s7429_s30, 256, %s7431_s25, %s7351_s23, %s7117_s18, %s7117_s18, %s7118_s17  }
  0xcb   : > { %p8080_p11 = scmp.ne.s32.totalorder %s8058_s15, 0 }
  0xcc   : > { %p8081_p10 = scmp.eq.s32.totalorder (!%p8080_p11), %s7217_s14, 0 }
  0xcd   : > { %542 = sbr.rel (%p8080_p11) target bundleno = 3085 (0xc0d), region = 72 }
  0xd2   : > { %7066 = dma.done.wait (%p8081_p10), [#allocation4], 512   ;;  %p8082_p12 = pmov %p8081_p10 }
  0xd3   : > { %s8083_s1 = sld [smem:[#allocation25_spill]]  ;;  %s548_s21 = sand.u32 1, %s7217_s14  }
  0xd4   : > { %7068 = vsyncadd (%p8082_p12), [#allocation4], 4294966784  ;;  %s550_s9 = sand.u32 1, %s7091_s26   ;;  %s549_s19 = scalar_lea.sflag [#allocation6], %s548_s21 }
  0xd5   : > { %s6359_s4 = smul.u32 192, %s550_s9 }
  0xd7   : > { %s7462_s11 = scalar_lea.vmem [#allocation5], %s6359_s4 }
  0xd9   : > { %p8084_p13 = scmp.ne.s32.totalorder %s8083_s1, 0 }
  0xdb   : > { %7070 = dma.done.wait (%p8084_p13), %s549_s19, 19456  }
  0xdc   : > { %7072 = vsyncadd (%p8084_p13), %s549_s19, 4294947840  ;;  %s5541_s15 = sshll.u32 %s550_s9, 10  ;;  %s567_s23 = scalar_lea.sflag [#allocation9], %s548_s21 }
  0xdd   : > { %s7468_s24 = scalar_lea.vmem [#allocation7], %s5541_s15  ;;  %s7470_s30 = scalar_lea.vmem [#allocation8], %s5541_s15 }
  0xde   : > { %7074 = dma.done.wait (%p8084_p13), %s567_s23, 16640  }
  0xdf   : > { %7076 = vsyncadd (%p8084_p13), %s567_s23, 4294950656  ;;  %s5543_s25 = sshll.u32 %s550_s9, 4  ;;  %p8085_p5 = pmov %p8081_p10 }
  0xe0   : > { %s7476_s0 = scalar_lea.vmem [#allocation10], %s5543_s25 }
  0xe1   : > { %7078 = dma.done.wait (%p8085_p5), [#allocation12], 8320   ;;  %p8086_p9 = pmov %p8085_p5 }
  0xe2   : > { %p8087_p0 = pmov %p8085_p5 }
  0xe3   : > { %7080 = vsyncadd (%p8086_p9), [#allocation12], 4294958976 }
  0xe4   : > { %7082 = dma.done.wait (%p8087_p0), [#allocation15], 8208   ;;  %p8088_p2 = pmov %p8087_p0 }
  0xe5   : > { %p657_p1 = scmp.lt.s32.totalorder %s7217_s14, 1  ;;  %s8089_s7 = sld [smem:[#allocation29_spill]] }
  0xe6   : > { %7084 = vsyncadd (%p8088_p2), [#allocation15], 4294959088  ;;  %s8090_s18 = sld [smem:[#allocation30_spill]]  ;;  %p8091_p4 = scmp.ne.s32.totalorder %s7217_s14, 0 }
  0xe7   : > { %s658_s3 = scalar_select %p657_p1, %s7217_s14, 1 }
  0xe8   : > { %670 = sbr.rel (%p8091_p4) target bundleno = 570 (0x23a), region = 112  ;;  %s8092_s9 = sld [smem:[#allocation26_spill]] (!%p8091_p4) }
  0xe9   : > { %s6001_s22 = sshll.u32 %s658_s3, 6  ;;  %s5550_s28 = sshll.u32 %s658_s3, 4 }
  0xeb   : > { %s7491_s16 = scalar_lea.vmem %s8089_s7, %s6001_s22 }
  0xec   : > { %s7496_s17 = scalar_lea.vmem %s8090_s18, %s5550_s28 }
  0xed   : > { %v7119_v1 = vmov 0   ;;  %v7120_v2 = vmov 0.0   ;;  %v6482_v3 = vld [vmem:[#allocation3 + $0x18] sm:$0xff]   ;;  %v6483_v5 = vld [vmem:[#allocation3 + $0x10] sm:$0xff]   ;;  %vm7121_vm0 = vmmov 0   ;;  %v6484_v6 = vld [vmem:[#allocation3 + $0x8] sm:$0xff]   ;;  %v673_v8 = vlaneseq }
  0xee   : > { %v671_v0 = vld [vmem:[%s8092_s9] sm:$0xff]  ;;  %6481 = vset.pattern.permute.xlu0 %v7119_v1  ;;  %6293 = vmatprep.subr.bf16.mxu0 %v7120_v2  ;;  %v672_v4 = vld [vmem:[%s8092_s9 + $0x8] sm:$0xff]  ;;  %v6485_v7 = vld [vmem:[#allocation3] sm:$0xff]   ;;  %vm720_vm3 = vcmask 523264  }
  0xef   : > { %676 = vperm.xlu0 %6481, %v671_v0   ;;  %6294 = vmatpush3.bf16.msra.mxu0 %v6482_v3  ;;  %v674_v9 = vand.u32 127, %v673_v8 }
  0xf0   : > { %6295 = vmatprep.subr.bf16.mxu0 %v7120_v2  ;;  %6301 = vmatprep.mubr.msk.bf16.mxu0 %vm7121_vm0, %v7120_v2 }
  0xf3   : > { %679 = vperm.xlu0 %6481, %v672_v4   ;;  %6296 = vmatpush3.bf16.msra.mxu0 %v6483_v5 }
  0xf4   : > { %6297 = vmatprep.subr.bf16.mxu0 %v7120_v2 }
  0xf7   : > { %6298 = vmatpush3.bf16.msra.mxu0 %v6484_v6 }
  0xf8   : > { %6299 = vmatprep.subr.bf16.mxu0 %v7120_v2 }
  0xfb   : > { %6300 = vmatpush3.bf16.msra.mxu0 %v6485_v7 }
 0x16a   : > { %v677_v10 = vpop.permute.xlu0 %676 }
 0x16b   : > { %vm681_vm1 = vcmp.eq.s32.totalorder %v674_v9, %v677_v10 }
 0x16c   : > { %v5552_v12 = vsel %vm681_vm1, 1.0, %v7120_v2 }
 0x16e   : > { %v680_v11 = vpop.permute.xlu0 %679 }
 0x16f   : > { %vm682_vm2 = vcmp.eq.s32.totalorder %v674_v9, %v680_v11 }
 0x170   : > { %v5553_v13 = vsel %vm682_vm2, 1.0, %v7120_v2 }
 0x171   : > { %v687_v14 = vpack.c.bf16 %v5553_v13, %v5552_v12 }
 0x173   : > { %6302 = vmatmul.mubr.msk.bf16.vlgmr.msra.gmra.mxu0 %vm720_vm3, %v687_v14 }
 0x233   : > { %v758_v15 = vpop.f32.mrf.mxu0 }
 0x234   : > { %765 = vst [vmem:[#allocation2] sm:$0xff] %v758_v15 }
 0x235   : > { %v6303_v16 = vpop.f32.mrf.mxu0 }
 0x237   : > { %v761_v17 = vpop.f32.mrf.mxu0 }
 0x238   : > { %766 = vst [vmem:[#allocation2 + $0x8] sm:$0xff] %v761_v17 }
 0x239   : > { %v6304_v18 = vpop.f32.mrf.mxu0 }
 0x23a PF: > { %v6486_v19 = vld [vmem:[%s7462_s11 + $0xac] ss:$12 sps:$4 sm:$0xff]   ;;  %v6488_v20 = vld [vmem:[%s7462_s11 + $0xa8] ss:$12 sps:$4 sm:$0xff]   ;;  %v7122_v21 = vmov 0   ;;  %v7123_v22 = vmov 0.0   ;;  %v1016_v48 = vlaneseq }
 0x23b   : > { %964 = vmatprep.mubr.bf16.mxu0 %v7122_v21  ;;  %6305 = vmatprep.subr.bf16.mxu1 %v7123_v22  ;;  %v6489_v23 = vld [vmem:[%s7462_s11 + $0x94] ss:$12 sps:$4 sm:$0xff]   ;;  %v6491_v24 = vld [vmem:[%s7462_s11 + $0x90] ss:$12 sps:$4 sm:$0xff]   ;;  %v6494_v26 = vld [vmem:[%s7462_s11 + $0x78] ss:$12 sps:$4 sm:$0xff]  }
 0x23c   : > { %932 = vmatprep.subr.bf16.mxu0 %v6486_v19  ;;  %v6492_v25 = vld [vmem:[%s7462_s11 + $0x7c] ss:$12 sps:$4 sm:$0xff]   ;;  %v6495_v27 = vld [vmem:[%s7462_s11 + $0x64] ss:$12 sps:$4 sm:$0xff]   ;;  %v6497_v28 = vld [vmem:[%s7462_s11 + $0x60] ss:$12 sps:$4 sm:$0xff]  }
 0x23d   : > { %933 = vmatpush1.bf16.msra.mxu0 %v6488_v20  ;;  %v6498_v29 = vld [vmem:[%s7462_s11 + $0x4c] ss:$12 sps:$4 sm:$0xff]   ;;  %v6510_v30 = vld [vmem:[%s7462_s11 + $0xb0] ss:$12 sps:$4 sm:$0xff]   ;;  %v6500_v32 = vld [vmem:[%s7462_s11 + $0x48] ss:$12 sps:$4 sm:$0xff]  }
 0x23e   : > { %934 = vmatprep.subr.bf16.mxu0 %v6489_v23  ;;  %6306 = vmatpush3.bf16.msra.mxu1 %v6510_v30  ;;  %v6511_v31 = vld [vmem:[%s7462_s11 + $0x98] ss:$12 sps:$4 sm:$0xff]   ;;  %v6501_v33 = vld [vmem:[%s7462_s11 + $0x34] ss:$12 sps:$4 sm:$0xff]   ;;  %v6503_v34 = vld [vmem:[%s7462_s11 + $0x30] ss:$12 sps:$4 sm:$0xff]  }
 0x23f   : > { %6307 = vmatprep.subr.bf16.mxu1 %v7123_v22  ;;  %v6504_v35 = vld [vmem:[%s7462_s11 + $0x1c] ss:$12 sps:$4 sm:$0xff]   ;;  %v6512_v36 = vld [vmem:[%s7462_s11 + $0x80] ss:$12 sps:$4 sm:$0xff]   ;;  %v6506_v38 = vld [vmem:[%s7462_s11 + $0x18] ss:$12 sps:$4 sm:$0xff]  }
 0x240   : > { %v6513_v37 = vld [vmem:[%s7462_s11 + $0x68] ss:$12 sps:$4 sm:$0xff]   ;;  %v6507_v39 = vld [vmem:[%s7462_s11 + $0x4] ss:$12 sps:$4 sm:$0xff]   ;;  %v6509_v41 = vld [vmem:[%s7462_s11] ss:$12 sps:$4 sm:$0xff]  }
 0x241   : > { %935 = vmatpush1.bf16.msra.mxu0 %v6491_v24  ;;  %v6514_v40 = vld [vmem:[%s7462_s11 + $0x50] ss:$12 sps:$4 sm:$0xff]   ;;  %v6515_v44 = vld [vmem:[%s7462_s11 + $0x38] ss:$12 sps:$4 sm:$0xff]   ;;  %v6516_v46 = vld [vmem:[%s7462_s11 + $0x20] ss:$12 sps:$4 sm:$0xff]  }
 0x242   : > { %936 = vmatprep.subr.bf16.mxu0 %v6492_v25  ;;  %6308 = vmatpush3.bf16.msra.mxu1 %v6511_v31  ;;  %v7532_v42 = vld [vmem:[#allocation2] sm:$0xff]  ;;  %v7534_v43 = vld [vmem:[#allocation2 + $0x8] sm:$0xff]  ;;  %vm7124_vm4 = vmmov 0   ;;  %v7553_v49 = vshrl.u32 %v1016_v48, 7  ;;  %s8093_s23 = sld [smem:[#allocation27_spill]]  ;;  %vm1080_vm5 = vcmask 130048  }
 0x243   : > { %6309 = vmatprep.subr.bf16.mxu1 %v7123_v22  ;;  %v771_v45 = vpack.c.bf16 %v7534_v43, %v7532_v42  ;;  %v6517_v47 = vld [vmem:[%s7462_s11 + $0x8] ss:$12 sps:$4 sm:$0xff]   ;;  %6321 = vmatprep.mubr.msk.bf16.mxu1 %vm7124_vm4, %v7123_v22  ;;  %p5848_p7 = scmp.ne.s32.totalorder %s7217_s14, 1 }
 0x244   : > { %v7556_v50 = vsub.s32 1, %v7553_v49  ;;  %v7559_v52 = vld [vmem:[%s7476_s0] sm:$0xff]  ;;  %v7564_v56 = vsub.s32 0, %v7553_v49  ;;  %v7572_v1 = vsub.s32 2, %v7553_v49 }
 0x245   : > { %937 = vmatpush1.bf16.msra.mxu0 %v6494_v26  ;;  %v6525_v48 = vld [vmem:[%s7491_s16] sm:$0xff]  }
 0x246   : > { %938 = vmatprep.subr.bf16.mxu0 %v6495_v27  ;;  %6310 = vmatpush3.bf16.msra.mxu1 %v6512_v36  ;;  %v1026_v54 = vrot.slane %v7559_v52, %v7556_v50  ;;  %v1019_v61 = vrot.slane %v7559_v52, %v7564_v56  ;;  %v1033_v2 = vrot.slane %v7559_v52, %v7572_v1  ;;  %v6522_v36 = vld [vmem:[%s7491_s16 + $0x18] sm:$0xff]  }
 0x247   : > { %6311 = vmatprep.subr.bf16.mxu1 %v7123_v22 }
 0x248   : > { %v1037_v10 = vld [vmem:[%s8093_s23] sm:$0xff]  ;;  %v1038_v14 = vld [vmem:[%s8093_s23 + $0x8] sm:$0xff] }
 0x249   : > { %939 = vmatpush1.bf16.msra.mxu0 %v6497_v28 }
 0x24a   : > { %940 = vmatprep.subr.bf16.mxu0 %v6498_v29  ;;  %6312 = vmatpush3.bf16.msra.mxu1 %v6513_v37  ;;  %v6523_v37 = vld [vmem:[%s7491_s16 + $0x10] sm:$0xff]  }
 0x24b   : > { %6313 = vmatprep.subr.bf16.mxu1 %v7123_v22 }
 0x24d   : > { %941 = vmatpush1.bf16.msra.mxu0 %v6500_v32  ;;  %v6518_v32 = vld [vmem:[%s7491_s16 + $0x38] sm:$0xff]  }
 0x24e   : > { %942 = vmatprep.subr.bf16.mxu0 %v6501_v33  ;;  %6314 = vmatpush3.bf16.msra.mxu1 %v6514_v40  ;;  %v6519_v33 = vld [vmem:[%s7491_s16 + $0x30] sm:$0xff]  }
 0x24f   : > { %6315 = vmatprep.subr.bf16.mxu1 %v7123_v22 }
 0x251   : > { %943 = vmatpush1.bf16.msra.mxu0 %v6503_v34  ;;  %v6520_v34 = vld [vmem:[%s7491_s16 + $0x28] sm:$0xff]  }
 0x252   : > { %944 = vmatprep.subr.bf16.mxu0 %v6504_v35  ;;  %6316 = vmatpush3.bf16.msra.mxu1 %v6515_v44  ;;  %v6521_v35 = vld [vmem:[%s7491_s16 + $0x20] sm:$0xff]  }
 0x253   : > { %6317 = vmatprep.subr.bf16.mxu1 %v7123_v22 }
 0x255   : > { %945 = vmatpush1.bf16.msra.mxu0 %v6506_v38 }
 0x256   : > { %946 = vmatprep.subr.bf16.mxu0 %v6507_v39  ;;  %6318 = vmatpush3.bf16.msra.mxu1 %v6516_v46 }
 0x257   : > { %6319 = vmatprep.subr.bf16.mxu1 %v7123_v22 }
 0x259   : > { %947 = vmatpush1.bf16.msra.mxu0 %v6509_v41 }
 0x25a   : > { %6337 = vmatprep.subr.bf16.mxu0 %v7123_v22  ;;  %6320 = vmatpush3.bf16.msra.mxu1 %v6517_v47  ;;  %v6524_v47 = vld [vmem:[%s7491_s16 + $0x8] sm:$0xff]  }
 0x25b   : > { %6325 = vmatprep.subr.bf16.mxu1 %v7123_v22 }
 0x25c   : > { %965 = vmatmul.mubr.bf16.vlgmr.msra.gmra.mxu0 %v771_v45 }
 0x25d   : > { %6353 = vmatprep.mubr.msk.bf16.mxu0 %vm7124_vm4, %v7123_v22  ;;  %6322 = vmatmul.mubr.bf16.vlgmr.msra.gmra.mxu1 %v771_v45 }
 0x25e   : > { %6327 = vmatprep.mubr.msk.bf16.mxu1 %vm7124_vm4, %v7123_v22  ;;  %6338 = vmatpush3.bf16.msra.mxu0 %v6518_v32  ;;  %v1364_v32 = vld [vmem:[%s7468_s24 + $0x208] sm:$0xff] }
 0x25f   : > { %6339 = vmatprep.subr.bf16.mxu0 %v7123_v22 }
 0x262   : > { %6340 = vmatpush3.bf16.msra.mxu0 %v6519_v33 }
 0x263   : > { %6341 = vmatprep.subr.bf16.mxu0 %v7123_v22 }
 0x266   : > { %6342 = vmatpush3.bf16.msra.mxu0 %v6520_v34  ;;  %v1372_v34 = vld [vmem:[%s7468_s24 + $0x248] sm:$0xff] }
 0x267   : > { %6343 = vmatprep.subr.bf16.mxu0 %v7123_v22 }
 0x26a   : > { %6344 = vmatpush3.bf16.msra.mxu0 %v6521_v35 }
 0x26b   : > { %6345 = vmatprep.subr.bf16.mxu0 %v7123_v22 }
 0x26e   : > { %6346 = vmatpush3.bf16.msra.mxu0 %v6522_v36  ;;  %v5658_v36 = vcombine.low %v1364_v32, %v1372_v34 }
 0x26f   : > { %6347 = vmatprep.subr.bf16.mxu0 %v7123_v22 }
 0x272   : > { %6348 = vmatpush3.bf16.msra.mxu0 %v6523_v37  ;;  %v5659_v37 = vcombine.high %v1364_v32, %v1372_v34 }
 0x273   : > { %6349 = vmatprep.subr.bf16.mxu0 %v7123_v22 }
 0x276   : > { %6350 = vmatpush3.bf16.msra.mxu0 %v6524_v47 }
 0x277   : > { %6351 = vmatprep.subr.bf16.mxu0 %v7123_v22 }
 0x27a   : > { %6352 = vmatpush3.bf16.msra.mxu0 %v6525_v48  ;;  %v1331_v48 = vld [vmem:[%s7468_s24 + $0x100] sm:$0xff] }
 0x31c   : > { %v966_v51 = vpop.f32.mrf.mxu0 }
 0x31d   : > { %v1020_v63 = vadd.f32 %v1019_v61, %v966_v51  ;;  %v1009_v3 = vpop.f32.mrf.mxu1 }
 0x31e   : > { %v968_v53 = vpop.f32.mrf.mxu0  ;;  %v1034_v5 = vadd.f32 %v1033_v2, %v1009_v3 }
 0x31f   : > { %v1027_v58 = vadd.f32 %v1026_v54, %v968_v53  ;;  %v6323_v4 = vpop.f32.mrf.mxu1 }
 0x320   : > { %v970_v55 = vpop.f32.mrf.mxu0 }
 0x321   : > { %v1021_v62 = vadd.f32 %v1019_v61, %v970_v55  ;;  %v1012_v6 = vpop.f32.mrf.mxu1 }
 0x322   : > { %v972_v57 = vpop.f32.mrf.mxu0  ;;  %v1035_v7 = vadd.f32 %v1033_v2, %v1012_v6  ;;  %v1419_v6 = vld [vmem:[%s7468_s24 + $0x3c0] sm:$0xff] }
 0x323   : > { %v1028_v59 = vadd.f32 %v1026_v54, %v972_v57  ;;  %v1022_v0 = vpack.c.bf16 %v1021_v62, %v1020_v63  ;;  %v6324_v8 = vpop.f32.mrf.mxu1 }
 0x324   : > { %v1036_v9 = vpack.c.bf16 %v1035_v7, %v1034_v5  ;;  %v1411_v5 = vld [vmem:[%s7468_s24 + $0x380] sm:$0xff]  ;;  %v1412_v7 = vld [vmem:[%s7468_s24 + $0x388] sm:$0xff] }
 0x325   : > { %v1029_v60 = vpack.c.bf16 %v1028_v59, %v1027_v58  ;;  %v7605_v58 = vsub.s32 3, %v7553_v49  ;;  %v5705_v8 = vcombine.high %v1411_v5, %v1419_v6 }
 0x327   : > { %6326 = vmatpush3.bf16.xpose.msra.mxu1 %v1029_v60  ;;  %v1168_v59 = vrot.slane %v7559_v52, %v7605_v58 }
 0x328   : > { %6331 = vmatprep.subr.bf16.mxu1 %v7123_v22 }
 0x32e   : > { %6328 = vmatmul.mubr.bf16.vlgmr.msra.gmra.mxu1 %v1022_v0 }
 0x32f   : > { %6333 = vmatprep.mubr.msk.bf16.mxu1 %vm7124_vm4, %v7123_v22  ;;  %6332 = vmatpush3.bf16.msra.mxu1 %v1036_v9  ;;  %v5704_v9 = vcombine.low %v1411_v5, %v1419_v6  ;;  %v1299_v6 = vld [vmem:[%s7468_s24] sm:$0xff] }
 0x330   : > { %2151 = vmatprep.subr.bf16.mxu1 %v5705_v8  ;;  %v1300_v8 = vld [vmem:[%s7468_s24 + $0x8] sm:$0xff] }
 0x3ee   : > { %v1073_v11 = vpop.f32.mrf.mxu1 }
 0x3ef   : > { %v1074_v12 = vadd.f32 %v1073_v11, %v1037_v10 }
 0x3f0   : > { %v6329_v13 = vpop.f32.mrf.mxu1 }
 0x3f1   : > { %v1081_v15 = vsel %vm1080_vm5, %v1074_v12, -inf  ;;  %v1403_v13 = vld [vmem:[%s7468_s24 + $0x340] sm:$0xff] }
 0x3f2   : > { %1082 = vmax.xlane.f32.xlu0 %v1081_v15  ;;  %v1076_v16 = vpop.f32.mrf.mxu1 }
 0x3f3   : > { %v1077_v17 = vadd.f32 %v1076_v16, %v1038_v14  ;;  %v1396_v14 = vld [vmem:[%s7468_s24 + $0x308] sm:$0xff] }
 0x3f4   : > { %v6330_v18 = vpop.f32.mrf.mxu1  ;;  %v1404_v16 = vld [vmem:[%s7468_s24 + $0x348] sm:$0xff] }
 0x3f5   : > { %v1084_v19 = vsel %vm1080_vm5, %v1077_v17, -inf  ;;  %v5690_v18 = vcombine.low %v1396_v14, %v1404_v16 }
 0x3f6   : > { %1085 = vmax.xlane.f32.xlu0 %v1084_v19  ;;  %v5691_v19 = vcombine.high %v1396_v14, %v1404_v16  ;;  %v1421_v14 = vld [vmem:[%s7468_s24 + $0x3d0] sm:$0xff] }
 0x47b   : > { %v1083_v20 = vpop.xlane.xlu0 %1082 }
 0x47c   : > { %v1087_v23 = vsub.f32 %v1074_v12, %v1083_v20  ;;  %v1395_v12 = vld [vmem:[%s7468_s24 + $0x300] sm:$0xff] }
 0x47d   : > { %v5689_v15 = vcombine.high %v1395_v12, %v1403_v13  ;;  %v1379_v20 = vld [vmem:[%s7468_s24 + $0x280] sm:$0xff] }
 0x47e   : > { %v1089_v24 = vmul.f32 1.442695, %v1087_v23  ;;  %v1387_v23 = vld [vmem:[%s7468_s24 + $0x2c0] sm:$0xff] }
 0x47f   : > { %v1086_v25 = vpop.xlane.xlu0 %1085 }
 0x480   : > { %6654 = vpow2.f32 %v1089_v24  ;;  %v1088_v26 = vsub.f32 %v1077_v17, %v1086_v25  ;;  %v5688_v17 = vcombine.low %v1395_v12, %v1403_v13  ;;  %v1380_v24 = vld [vmem:[%s7468_s24 + $0x288] sm:$0xff]  ;;  %v5673_v25 = vcombine.high %v1379_v20, %v1387_v23  ;;  %v1413_v13 = vld [vmem:[%s7468_s24 + $0x390] sm:$0xff] }
 0x481   : > { %v5709_v16 = vcombine.high %v1413_v13, %v1421_v14 }
 0x482   : > { %v1091_v27 = vmul.f32 1.442695, %v1088_v26  ;;  %v1388_v26 = vld [vmem:[%s7468_s24 + $0x2c8] sm:$0xff] }
 0x484   : > { %6656 = vpow2.f32 %v1091_v27  ;;  %v5672_v27 = vcombine.low %v1379_v20, %v1387_v23 }
 0x48d   : > { %v6655_v28 = vpop.eup %6654 }
 0x48e   : > { %v1093_v29 = vsel %vm1080_vm5, %v6655_v28, 0.0 }
 0x48f   : > { %1094 = vadd.xlane.f32.xlu1 %v1093_v29  ;;  %v5675_v29 = vcombine.high %v1380_v24, %v1388_v26 }
 0x491   : > { %v6657_v30 = vpop.eup %6656 }
 0x492   : > { %v1096_v31 = vsel %vm1080_vm5, %v6657_v30, 0.0 }
 0x493   : > { %1097 = vadd.xlane.f32.xlu1 %v1096_v31  ;;  %v1371_v31 = vld [vmem:[%s7468_s24 + $0x240] sm:$0xff] }
 0x518   : > { %v1095_v38 = vpop.xlane.xlu1 %1094 }
 0x519   : > { %6658 = vrcp.f32 %v1095_v38  ;;  %v1347_v38 = vld [vmem:[%s7468_s24 + $0x180] sm:$0xff] }
 0x51c   : > { %v1098_v39 = vpop.xlane.xlu1 %1097 }
 0x51d   : > { %6660 = vrcp.f32 %v1098_v39  ;;  %v1355_v39 = vld [vmem:[%s7468_s24 + $0x1c0] sm:$0xff] }
 0x526   : > { %v6659_v40 = vpop.eup %6658 }
 0x527   : > { %v1101_v44 = vmul.f32 %v6659_v40, %v6655_v28  ;;  %v5674_v28 = vcombine.low %v1380_v24, %v1388_v26  ;;  %v1348_v40 = vld [vmem:[%s7468_s24 + $0x188] sm:$0xff] }
 0x52a   : > { %v6661_v41 = vpop.eup %6660 }
 0x52b   : > { %v1102_v45 = vmul.f32 %v6661_v41, %v6657_v30  ;;  %v1363_v30 = vld [vmem:[%s7468_s24 + $0x200] sm:$0xff]  ;;  %v5641_v41 = vcombine.high %v1347_v38, %v1355_v39 }
 0x52c   : > { %v5657_v33 = vcombine.high %v1363_v30, %v1371_v31  ;;  %v5656_v35 = vcombine.low %v1363_v30, %v1371_v31 }
 0x52d   : > { %v1103_v46 = vpack.c.bf16 %v1102_v45, %v1101_v44  ;;  %v1356_v44 = vld [vmem:[%s7468_s24 + $0x1c8] sm:$0xff]  ;;  %v5640_v45 = vcombine.low %v1347_v38, %v1355_v39 }
 0x52e   : > { %v5643_v47 = vcombine.high %v1348_v40, %v1356_v44 }
 0x52f   : > { %6334 = vmatmul.mubr.msk.bf16.vlgmr.msra.gmra.mxu1 %vm1080_vm5, %v1103_v46  ;;  %v5642_v46 = vcombine.low %v1348_v40, %v1356_v44 }
 0x530   : > { %2183 = vmatprep.mubr.bf16.mxu1 %v7122_v21  ;;  %2152 = vmatpush1.bf16.msra.mxu1 %v5704_v9  ;;  %v1308_v9 = vld [vmem:[%s7468_s24 + $0x48] sm:$0xff] }
 0x531   : > { %2153 = vmatprep.subr.bf16.mxu1 %v5689_v15  ;;  %v5595_v12 = vcombine.high %v1300_v8, %v1308_v9  ;;  %v1414_v15 = vld [vmem:[%s7468_s24 + $0x398] sm:$0xff] }
 0x534   : > { %2154 = vmatpush1.bf16.msra.mxu1 %v5688_v17  ;;  %v1422_v17 = vld [vmem:[%s7468_s24 + $0x3d8] sm:$0xff] }
 0x535   : > { %2155 = vmatprep.subr.bf16.mxu1 %v5673_v25  ;;  %v5711_v20 = vcombine.high %v1414_v15, %v1422_v17 }
 0x538   : > { %2156 = vmatpush1.bf16.msra.mxu1 %v5672_v27 }
 0x539   : > { %2157 = vmatprep.subr.bf16.mxu1 %v5657_v33 }
 0x53c   : > { %2158 = vmatpush1.bf16.msra.mxu1 %v5656_v35 }
 0x53d   : > { %2159 = vmatprep.subr.bf16.mxu1 %v5641_v41  ;;  %v7664_v41 = vsub.s32 6, %v7553_v49 }
 0x540   : > { %2160 = vmatpush1.bf16.msra.mxu1 %v5640_v45 }
 0x5ef   : > { %v1141_v51 = vpop.f32.mrf.mxu1 }
 0x5f1   : > { %v6335_v53 = vpop.f32.mrf.mxu1 }
 0x5f2   : > { %v1332_v53 = vld [vmem:[%s7468_s24 + $0x108] sm:$0xff] }
 0x5f3   : > { %v1144_v54 = vpop.f32.mrf.mxu1 }
 0x5f4   : > { %v1148_v55 = vpack.c.bf16 %v1144_v54, %v1141_v51  ;;  %v1339_v51 = vld [vmem:[%s7468_s24 + $0x140] sm:$0xff] }
 0x5f5   : > { %v6336_v57 = vpop.f32.mrf.mxu1  ;;  %v5625_v54 = vcombine.high %v1331_v48, %v1339_v51 }
 0x5f6   : > { %6354 = vmatmul.mubr.bf16.vlgmr.msra.gmra.mxu0 %v1148_v55  ;;  %v1340_v55 = vld [vmem:[%s7468_s24 + $0x148] sm:$0xff]  ;;  %v5624_v57 = vcombine.low %v1331_v48, %v1339_v51 }
 0x5f7   : > { %2226 = vmatprep.mubr.bf16.mxu0 %v7122_v21  ;;  %2161 = vmatprep.subr.bf16.mxu1 %v5625_v54  ;;  %v1405_v54 = vld [vmem:[%s7468_s24 + $0x350] sm:$0xff] }
 0x5f8   : > { %2162 = vmatpush1.bf16.msra.mxu1 %v5624_v57  ;;  %v1406_v57 = vld [vmem:[%s7468_s24 + $0x358] sm:$0xff] }
 0x6b6   : > { %v1251_v60 = vpop.f32.mrf.mxu0 }
 0x6b7   : > { %v1252_v22 = vadd.f32 %v1251_v60, %v1168_v59  ;;  %v5627_v60 = vcombine.high %v1332_v53, %v1340_v55 }
 0x6b8   : > { %v6355_v61 = vpop.f32.mrf.mxu0 }
 0x6b9   : > { %v7610_v62 = vadd.f32 %v1252_v22, %v7532_v42  ;;  %v1315_v22 = vld [vmem:[%s7468_s24 + $0x80] sm:$0xff] }
 0x6ba   : > { %v1254_v63 = vpop.f32.mrf.mxu0  ;;  %v1323_v61 = vld [vmem:[%s7468_s24 + $0xc0] sm:$0xff] }
 0x6bb   : > { %v1255_v0 = vadd.f32 %v1254_v63, %v1168_v59  ;;  %1260 = vadd.xlane.f32.xlu0 %v7610_v62  ;;  %v1266_v4 = vmul.f32 %v7610_v62, %v7610_v62  ;;  %v5626_v59 = vcombine.low %v1332_v53, %v1340_v55  ;;  %v1316_v63 = vld [vmem:[%s7468_s24 + $0x88] sm:$0xff]  ;;  %v1397_v53 = vld [vmem:[%s7468_s24 + $0x310] sm:$0xff]  ;;  %v1398_v55 = vld [vmem:[%s7468_s24 + $0x318] sm:$0xff] }
 0x6bc   : > { %v6356_v2 = vpop.f32.mrf.mxu0 }
 0x6bd   : > { %v7614_v3 = vadd.f32 %v1255_v0, %v7534_v43  ;;  %v1420_v43 = vld [vmem:[%s7468_s24 + $0x3c8] sm:$0xff]  ;;  %v5609_v0 = vcombine.high %v1315_v22, %v1323_v61 }
 0x6be   : > { %v5706_v10 = vcombine.low %v1412_v7, %v1420_v43  ;;  %v5707_v11 = vcombine.high %v1412_v7, %v1420_v43  ;;  %v1324_v2 = vld [vmem:[%s7468_s24 + $0xc8] sm:$0xff]  ;;  %v1307_v7 = vld [vmem:[%s7468_s24 + $0x40] sm:$0xff] }
 0x6bf   : > { %1268 = vadd.xlane.f32.xlu0 %v1266_v4  ;;  %1262 = vadd.xlane.f32.xlu1 %v7614_v3  ;;  %v1267_v42 = vmul.f32 %v7614_v3, %v7614_v3  ;;  %v5608_v4 = vcombine.low %v1315_v22, %v1323_v61  ;;  %v5611_v5 = vcombine.high %v1316_v63, %v1324_v2 }
 0x6c0   : > { %2194 = vmatprep.subr.bf16.mxu0 %v5707_v11  ;;  %2163 = vmatprep.subr.bf16.mxu1 %v5609_v0  ;;  %v5593_v43 = vcombine.high %v1299_v6, %v1307_v7  ;;  %v5594_v11 = vcombine.low %v1300_v8, %v1308_v9  ;;  %v5693_v22 = vcombine.high %v1397_v53, %v1405_v54  ;;  %v1382_v0 = vld [vmem:[%s7468_s24 + $0x298] sm:$0xff]  ;;  %v1373_v8 = vld [vmem:[%s7468_s24 + $0x250] sm:$0xff] }
 0x6c1   : > { %2195 = vmatpush1.bf16.msra.mxu0 %v5706_v10  ;;  %2164 = vmatpush1.bf16.msra.mxu1 %v5608_v4  ;;  %v5592_v10 = vcombine.low %v1299_v6, %v1307_v7  ;;  %v5695_v61 = vcombine.high %v1398_v55, %v1406_v57  ;;  %v5692_v4 = vcombine.low %v1397_v53, %v1405_v54  ;;  %v1365_v7 = vld [vmem:[%s7468_s24 + $0x210] sm:$0xff]  ;;  %v1374_v9 = vld [vmem:[%s7468_s24 + $0x258] sm:$0xff]  ;;  %v1415_v54 = vld [vmem:[%s7468_s24 + $0x3a0] sm:$0xff] }
 0x6c2   : > { %2196 = vmatprep.subr.bf16.mxu0 %v5691_v19  ;;  %2165 = vmatprep.subr.bf16.mxu1 %v5593_v43  ;;  %v5710_v19 = vcombine.low %v1414_v15, %v1422_v17  ;;  %v1366_v43 = vld [vmem:[%s7468_s24 + $0x218] sm:$0xff]  ;;  %v1357_v15 = vld [vmem:[%s7468_s24 + $0x1d0] sm:$0xff] }
 0x6c3   : > { %1270 = vadd.xlane.f32.xlu1 %v1267_v42  ;;  %v5610_v42 = vcombine.low %v1316_v63, %v1324_v2  ;;  %v1389_v63 = vld [vmem:[%s7468_s24 + $0x2d0] sm:$0xff]  ;;  %v1390_v2 = vld [vmem:[%s7468_s24 + $0x2d8] sm:$0xff] }
 0x6c4   : > { %v5679_v6 = vcombine.high %v1382_v0, %v1390_v2  ;;  %v1358_v17 = vld [vmem:[%s7468_s24 + $0x1d8] sm:$0xff] }
 0x6c5   : > { %2197 = vmatpush1.bf16.msra.mxu0 %v5690_v18  ;;  %2166 = vmatpush1.bf16.msra.mxu1 %v5592_v10  ;;  %v5708_v18 = vcombine.low %v1413_v13, %v1421_v14  ;;  %v5663_v13 = vcombine.high %v1366_v43, %v1374_v9  ;;  %v1349_v14 = vld [vmem:[%s7468_s24 + $0x190] sm:$0xff] }
 0x6c6   : > { %2198 = vmatprep.subr.bf16.mxu0 %v5675_v29  ;;  %2237 = vmatprep.subr.bf16.mxu1 %v5709_v16  ;;  %v1350_v16 = vld [vmem:[%s7468_s24 + $0x198] sm:$0xff] }
 0x6c9   : > { %2199 = vmatpush1.bf16.msra.mxu0 %v5674_v28 }
 0x6ca   : > { %2200 = vmatprep.subr.bf16.mxu0 %v5659_v37  ;;  %v7658_v37 = vsub.s32 5, %v7553_v49 }
 0x6cc   : > { %v1289_v40 = vrot.slane %v7559_v52, %v7658_v37 }
 0x6cd   : > { %2201 = vmatpush1.bf16.msra.mxu0 %v5658_v36 }
 0x6ce   : > { %2202 = vmatprep.subr.bf16.mxu0 %v5643_v47  ;;  %v1295_v47 = vrot.slane %v7559_v52, %v7664_v41  ;;  %v1381_v52 = vld [vmem:[%s7468_s24 + $0x290] sm:$0xff] }
 0x6cf   : > { %v5676_v10 = vcombine.low %v1381_v52, %v1389_v63 }
 0x6d1   : > { %2203 = vmatpush1.bf16.msra.mxu0 %v5642_v46 }
 0x6d2   : > { %2204 = vmatprep.subr.bf16.mxu0 %v5627_v60 }
 0x6d5   : > { %2205 = vmatpush1.bf16.msra.mxu0 %v5626_v59 }
 0x6d6   : > { %2206 = vmatprep.subr.bf16.mxu0 %v5611_v5  ;;  %v5677_v5 = vcombine.high %v1381_v52, %v1389_v63 }
 0x6d9   : > { %2207 = vmatpush1.bf16.msra.mxu0 %v5610_v42  ;;  %v5694_v42 = vcombine.low %v1398_v55, %v1406_v57  ;;  %v1423_v55 = vld [vmem:[%s7468_s24 + $0x3e0] sm:$0xff]  ;;  %v1416_v57 = vld [vmem:[%s7468_s24 + $0x3a8] sm:$0xff] }
 0x6da   : > { %2208 = vmatprep.subr.bf16.mxu0 %v5595_v12  ;;  %v5661_v12 = vcombine.high %v1365_v7, %v1373_v8  ;;  %v5713_v63 = vcombine.high %v1415_v54, %v1423_v55 }
 0x6dd   : > { %2209 = vmatpush1.bf16.msra.mxu0 %v5594_v11  ;;  %v5678_v11 = vcombine.low %v1382_v0, %v1390_v2  ;;  %v1399_v2 = vld [vmem:[%s7468_s24 + $0x320] sm:$0xff] }
 0x6de   : > { %2280 = vmatprep.subr.bf16.mxu0 %v5711_v20  ;;  %v5645_v20 = vcombine.high %v1349_v14, %v1357_v15 }
 0x744   : > { %v1261_v23 = vpop.xlane.xlu0 %1260 }
 0x745   : > { %v1264_v24 = vmul.f32 0.03125, %v1261_v23  ;;  %v5647_v23 = vcombine.high %v1350_v16, %v1358_v17 }
 0x747   : > { %v1274_v27 = vmul.f32 %v1264_v24, %v1264_v24  ;;  %v1278_v38 = vsub.f32 %v7610_v62, %v1264_v24  ;;  %v1333_v24 = vld [vmem:[%s7468_s24 + $0x110] sm:$0xff] }
 0x748   : > { %v1269_v25 = vpop.xlane.xlu0 %1268  ;;  %v1263_v26 = vpop.xlane.xlu1 %1262 }
 0x749   : > { %v1272_v28 = vmul.f32 0.03125, %v1269_v25  ;;  %v1265_v29 = vmul.f32 0.03125, %v1263_v26  ;;  %v1341_v25 = vld [vmem:[%s7468_s24 + $0x150] sm:$0xff]  ;;  %v1334_v26 = vld [vmem:[%s7468_s24 + $0x118] sm:$0xff] }
 0x74b   : > { %v1276_v30 = vsub.f32 %v1272_v28, %v1274_v27  ;;  %v1275_v33 = vmul.f32 %v1265_v29, %v1265_v29  ;;  %v1279_v45 = vsub.f32 %v7614_v3, %v1265_v29  ;;  %v1342_v27 = vld [vmem:[%s7468_s24 + $0x158] sm:$0xff]  ;;  %v5644_v28 = vcombine.low %v1349_v14, %v1357_v15 }
 0x74c   : > { %v1271_v31 = vpop.xlane.xlu1 %1270  ;;  %v5646_v29 = vcombine.low %v1350_v16, %v1358_v17  ;;  %v1367_v17 = vld [vmem:[%s7468_s24 + $0x220] sm:$0xff] }
 0x74d   : > { %v1280_v32 = vadd.f32 1e-05, %v1276_v30  ;;  %v1273_v34 = vmul.f32 0.03125, %v1271_v31  ;;  %v5629_v30 = vcombine.high %v1333_v24, %v1341_v25  ;;  %v5631_v31 = vcombine.high %v1334_v26, %v1342_v27 }
 0x74f   : > { %6662 = vrsqrt.f32 %v1280_v32  ;;  %v1277_v35 = vsub.f32 %v1273_v34, %v1275_v33  ;;  %v1317_v32 = vld [vmem:[%s7468_s24 + $0x90] sm:$0xff]  ;;  %v1318_v34 = vld [vmem:[%s7468_s24 + $0x98] sm:$0xff] }
 0x750   : > { %v1325_v33 = vld [vmem:[%s7468_s24 + $0xd0] sm:$0xff] }
 0x751   : > { %v1281_v36 = vadd.f32 1e-05, %v1277_v35  ;;  %v1326_v35 = vld [vmem:[%s7468_s24 + $0xd8] sm:$0xff] }
 0x753   : > { %6664 = vrsqrt.f32 %v1281_v36  ;;  %v5628_v36 = vcombine.low %v1333_v24, %v1341_v25 }
 0x75c   : > { %v6663_v39 = vpop.eup %6662 }
 0x75d   : > { %v1284_v44 = vmul.f32 %v6663_v39, %v1278_v38  ;;  %v5630_v38 = vcombine.low %v1334_v26, %v1342_v27  ;;  %v5613_v39 = vcombine.high %v1317_v32, %v1325_v33  ;;  %v1351_v27 = vld [vmem:[%s7468_s24 + $0x1a0] sm:$0xff] }
 0x75f   : > { %v1290_v48 = vmul.f32 %v1289_v40, %v1284_v44  ;;  %v1301_v44 = vld [vmem:[%s7468_s24 + $0x10] sm:$0xff] }
 0x760   : > { %v6665_v46 = vpop.eup %6664 }
 0x761   : > { %v1285_v62 = vmul.f32 %v6665_v46, %v1279_v45  ;;  %v7673_v59 = vadd.f32 %v1295_v47, %v1290_v48  ;;  %v1309_v45 = vld [vmem:[%s7468_s24 + $0x50] sm:$0xff]  ;;  %v1302_v46 = vld [vmem:[%s7468_s24 + $0x18] sm:$0xff]  ;;  %v5612_v48 = vcombine.low %v1317_v32, %v1325_v33 }
 0x763   : > { %v1291_v51 = vmul.f32 %v1289_v40, %v1285_v62  ;;  %v5615_v40 = vcombine.high %v1318_v34, %v1326_v35  ;;  %v5614_v62 = vcombine.low %v1318_v34, %v1326_v35  ;;  %v1335_v35 = vld [vmem:[%s7468_s24 + $0x120] sm:$0xff] }
 0x765   : > { %v7675_v60 = vadd.f32 %v1295_v47, %v1291_v51  ;;  %v1310_v47 = vld [vmem:[%s7468_s24 + $0x58] sm:$0xff]  ;;  %v5597_v51 = vcombine.high %v1301_v44, %v1309_v45 }
 0x766   : > { %v5599_v53 = vcombine.high %v1302_v46, %v1310_v47  ;;  %v5598_v52 = vcombine.low %v1302_v46, %v1310_v47  ;;  %v1319_v47 = vld [vmem:[%s7468_s24 + $0xa0] sm:$0xff] }
 0x767   : > { %v7679_v3 = vpack.c.bf16 %v7675_v60, %v7673_v59 }
 0x769   : > { %2184 = vmatmul.mubr.bf16.vlgmr.msra.gmra.mxu1 %v7679_v3  ;;  %2227 = vmatmul.mubr.bf16.vlgmr.msra.gmra.mxu0 %v7679_v3 }
 0x76a   : > { %2238 = vmatpush1.bf16.msra.mxu1 %v5708_v18  ;;  %2281 = vmatpush1.bf16.msra.mxu0 %v5710_v19  ;;  %v5660_v18 = vcombine.low %v1365_v7, %v1373_v8  ;;  %v5662_v19 = vcombine.low %v1366_v43, %v1374_v9  ;;  %v1383_v9 = vld [vmem:[%s7468_s24 + $0x2a0] sm:$0xff] }
 0x76b   : > { %2239 = vmatprep.subr.bf16.mxu1 %v5693_v22  ;;  %2282 = vmatprep.subr.bf16.mxu0 %v5695_v61  ;;  %v1424_v22 = vld [vmem:[%s7468_s24 + $0x3e8] sm:$0xff]  ;;  %v5596_v61 = vcombine.low %v1301_v44, %v1309_v45 }
 0x76c   : > { %2269 = vmatprep.mubr.bf16.mxu1 %v7122_v21  ;;  %2312 = vmatprep.mubr.bf16.mxu0 %v7122_v21  ;;  %v5715_v0 = vcombine.high %v1416_v57, %v1424_v22  ;;  %v5714_v7 = vcombine.low %v1416_v57, %v1424_v22  ;;  %v1303_v22 = vld [vmem:[%s7468_s24 + $0x20] sm:$0xff] }
 0x76e   : > { %2240 = vmatpush1.bf16.msra.mxu1 %v5692_v4  ;;  %2283 = vmatpush1.bf16.msra.mxu0 %v5694_v42  ;;  %v1407_v4 = vld [vmem:[%s7468_s24 + $0x360] sm:$0xff]  ;;  %v1400_v42 = vld [vmem:[%s7468_s24 + $0x328] sm:$0xff] }
 0x76f   : > { %2241 = vmatprep.subr.bf16.mxu1 %v5677_v5  ;;  %2284 = vmatprep.subr.bf16.mxu0 %v5679_v6  ;;  %v1408_v5 = vld [vmem:[%s7468_s24 + $0x368] sm:$0xff]  ;;  %v5712_v6 = vcombine.low %v1415_v54, %v1423_v55  ;;  %v5697_v8 = vcombine.high %v1399_v2, %v1407_v4 }
 0x770   : > { %v5699_v43 = vcombine.high %v1400_v42, %v1408_v5  ;;  %v5698_v14 = vcombine.low %v1400_v42, %v1408_v5  ;;  %v1417_v5 = vld [vmem:[%s7468_s24 + $0x3b0] sm:$0xff] }
 0x772   : > { %2242 = vmatpush1.bf16.msra.mxu1 %v5676_v10  ;;  %2285 = vmatpush1.bf16.msra.mxu0 %v5678_v11  ;;  %v1391_v10 = vld [vmem:[%s7468_s24 + $0x2e0] sm:$0xff]  ;;  %v1384_v11 = vld [vmem:[%s7468_s24 + $0x2a8] sm:$0xff] }
 0x773   : > { %2243 = vmatprep.subr.bf16.mxu1 %v5661_v12  ;;  %2286 = vmatprep.subr.bf16.mxu0 %v5663_v13  ;;  %v1392_v12 = vld [vmem:[%s7468_s24 + $0x2e8] sm:$0xff]  ;;  %v5696_v13 = vcombine.low %v1399_v2, %v1407_v4  ;;  %v5681_v15 = vcombine.high %v1383_v9, %v1391_v10 }
 0x774   : > { %v5683_v16 = vcombine.high %v1384_v11, %v1392_v12  ;;  %v5682_v24 = vcombine.low %v1384_v11, %v1392_v12  ;;  %v1401_v12 = vld [vmem:[%s7468_s24 + $0x330] sm:$0xff] }
 0x776   : > { %2244 = vmatpush1.bf16.msra.mxu1 %v5660_v18  ;;  %2287 = vmatpush1.bf16.msra.mxu0 %v5662_v19  ;;  %v1375_v18 = vld [vmem:[%s7468_s24 + $0x260] sm:$0xff]  ;;  %v1368_v19 = vld [vmem:[%s7468_s24 + $0x228] sm:$0xff] }
 0x777   : > { %2245 = vmatprep.subr.bf16.mxu1 %v5645_v20  ;;  %2288 = vmatprep.subr.bf16.mxu0 %v5647_v23  ;;  %v1376_v20 = vld [vmem:[%s7468_s24 + $0x268] sm:$0xff]  ;;  %v5680_v23 = vcombine.low %v1383_v9, %v1391_v10  ;;  %v5665_v25 = vcombine.high %v1367_v17, %v1375_v18 }
 0x778   : > { %v5667_v26 = vcombine.high %v1368_v19, %v1376_v20  ;;  %v5666_v32 = vcombine.low %v1368_v19, %v1376_v20  ;;  %v1385_v20 = vld [vmem:[%s7468_s24 + $0x2b0] sm:$0xff] }
 0x77a   : > { %2246 = vmatpush1.bf16.msra.mxu1 %v5644_v28  ;;  %2289 = vmatpush1.bf16.msra.mxu0 %v5646_v29  ;;  %v1359_v28 = vld [vmem:[%s7468_s24 + $0x1e0] sm:$0xff]  ;;  %v1352_v29 = vld [vmem:[%s7468_s24 + $0x1a8] sm:$0xff] }
 0x77b   : > { %2247 = vmatprep.subr.bf16.mxu1 %v5629_v30  ;;  %2290 = vmatprep.subr.bf16.mxu0 %v5631_v31  ;;  %v1360_v30 = vld [vmem:[%s7468_s24 + $0x1e8] sm:$0xff]  ;;  %v5664_v31 = vcombine.low %v1367_v17, %v1375_v18  ;;  %v5649_v33 = vcombine.high %v1351_v27, %v1359_v28 }
 0x77c   : > { %v5651_v34 = vcombine.high %v1352_v29, %v1360_v30  ;;  %v5650_v44 = vcombine.low %v1352_v29, %v1360_v30  ;;  %v1369_v30 = vld [vmem:[%s7468_s24 + $0x230] sm:$0xff] }
 0x77e   : > { %2248 = vmatpush1.bf16.msra.mxu1 %v5628_v36  ;;  %2291 = vmatpush1.bf16.msra.mxu0 %v5630_v38  ;;  %v1343_v36 = vld [vmem:[%s7468_s24 + $0x160] sm:$0xff]  ;;  %v1336_v38 = vld [vmem:[%s7468_s24 + $0x128] sm:$0xff] }
 0x77f   : > { %2249 = vmatprep.subr.bf16.mxu1 %v5613_v39  ;;  %2292 = vmatprep.subr.bf16.mxu0 %v5615_v40  ;;  %v1344_v39 = vld [vmem:[%s7468_s24 + $0x168] sm:$0xff]  ;;  %v5648_v40 = vcombine.low %v1351_v27, %v1359_v28  ;;  %v5633_v45 = vcombine.high %v1335_v35, %v1343_v36 }
 0x780   : > { %v5635_v46 = vcombine.high %v1336_v38, %v1344_v39  ;;  %v5634_v54 = vcombine.low %v1336_v38, %v1344_v39  ;;  %v1353_v39 = vld [vmem:[%s7468_s24 + $0x1b0] sm:$0xff] }
 0x782   : > { %2250 = vmatpush1.bf16.msra.mxu1 %v5612_v48  ;;  %2293 = vmatpush1.bf16.msra.mxu0 %v5614_v62  ;;  %v1327_v48 = vld [vmem:[%s7468_s24 + $0xe0] sm:$0xff]  ;;  %v1320_v62 = vld [vmem:[%s7468_s24 + $0xa8] sm:$0xff] }
 0x783   : > { %2251 = vmatprep.subr.bf16.mxu1 %v5597_v51  ;;  %2294 = vmatprep.subr.bf16.mxu0 %v5599_v53  ;;  %v1328_v51 = vld [vmem:[%s7468_s24 + $0xe8] sm:$0xff]  ;;  %v5632_v53 = vcombine.low %v1335_v35, %v1343_v36  ;;  %v5617_v55 = vcombine.high %v1319_v47, %v1327_v48 }
 0x784   : > { %v5619_v57 = vcombine.high %v1320_v62, %v1328_v51  ;;  %v5618_v2 = vcombine.low %v1320_v62, %v1328_v51  ;;  %v1337_v62 = vld [vmem:[%s7468_s24 + $0x130] sm:$0xff] }
 0x785   : > { %v1345_v51 = vld [vmem:[%s7468_s24 + $0x170] sm:$0xff] }
 0x786   : > { %2252 = vmatpush1.bf16.msra.mxu1 %v5596_v61  ;;  %2295 = vmatpush1.bf16.msra.mxu0 %v5598_v52  ;;  %v1311_v61 = vld [vmem:[%s7468_s24 + $0x60] sm:$0xff]  ;;  %v1304_v52 = vld [vmem:[%s7468_s24 + $0x28] sm:$0xff] }
 0x787   : > { %2323 = vmatprep.subr.bf16.mxu1 %v5713_v63  ;;  %2366 = vmatprep.subr.bf16.mxu0 %v5715_v0  ;;  %v1312_v63 = vld [vmem:[%s7468_s24 + $0x68] sm:$0xff]  ;;  %v5616_v0 = vcombine.low %v1319_v47, %v1327_v48  ;;  %v5601_v4 = vcombine.high %v1303_v22, %v1311_v61 }
 0x788   : > { %v5603_v42 = vcombine.high %v1304_v52, %v1312_v63  ;;  %v5602_v9 = vcombine.low %v1304_v52, %v1312_v63  ;;  %v1321_v52 = vld [vmem:[%s7468_s24 + $0xb0] sm:$0xff] }
 0x789   : > { %2270 = vmatmul.mubr.bf16.vlgmr.msra.gmra.mxu1 %v7679_v3  ;;  %2313 = vmatmul.mubr.bf16.vlgmr.msra.gmra.mxu0 %v7679_v3  ;;  %v1329_v63 = vld [vmem:[%s7468_s24 + $0xf0] sm:$0xff] }
 0x78a   : > { %2324 = vmatpush1.bf16.msra.mxu1 %v5712_v6  ;;  %2367 = vmatpush1.bf16.msra.mxu0 %v5714_v7  ;;  %v1425_v6 = vld [vmem:[%s7468_s24 + $0x3f0] sm:$0xff]  ;;  %v1418_v7 = vld [vmem:[%s7468_s24 + $0x3b8] sm:$0xff] }
 0x78b   : > { %2325 = vmatprep.subr.bf16.mxu1 %v5697_v8  ;;  %2368 = vmatprep.subr.bf16.mxu0 %v5699_v43  ;;  %v1426_v8 = vld [vmem:[%s7468_s24 + $0x3f8] sm:$0xff]  ;;  %v5600_v43 = vcombine.low %v1303_v22, %v1311_v61  ;;  %v5717_v10 = vcombine.high %v1417_v5, %v1425_v6  ;;  %v5637_v22 = vcombine.high %v1337_v62, %v1345_v51 }
 0x78c   : > { %2355 = vmatprep.mubr.bf16.mxu1 %v7122_v21  ;;  %2398 = vmatprep.mubr.bf16.mxu0 %v7122_v21  ;;  %v5719_v11 = vcombine.high %v1418_v7, %v1426_v8  ;;  %v5718_v17 = vcombine.low %v1418_v7, %v1426_v8  ;;  %v1305_v7 = vld [vmem:[%s7468_s24 + $0x30] sm:$0xff] }
 0x78d   : > { %v1313_v8 = vld [vmem:[%s7468_s24 + $0x70] sm:$0xff] }
 0x78e   : > { %2326 = vmatpush1.bf16.msra.mxu1 %v5696_v13  ;;  %2369 = vmatpush1.bf16.msra.mxu0 %v5698_v14  ;;  %v1409_v13 = vld [vmem:[%s7468_s24 + $0x370] sm:$0xff]  ;;  %v1402_v14 = vld [vmem:[%s7468_s24 + $0x338] sm:$0xff] }
 0x78f   : > { %2327 = vmatprep.subr.bf16.mxu1 %v5681_v15  ;;  %2370 = vmatprep.subr.bf16.mxu0 %v5683_v16  ;;  %v1410_v15 = vld [vmem:[%s7468_s24 + $0x378] sm:$0xff]  ;;  %v5716_v16 = vcombine.low %v1417_v5, %v1425_v6  ;;  %v5701_v18 = vcombine.high %v1401_v12, %v1409_v13  ;;  %v5621_v5 = vcombine.high %v1321_v52, %v1329_v63 }
 0x790   : > { %v5703_v19 = vcombine.high %v1402_v14, %v1410_v15  ;;  %v5702_v27 = vcombine.low %v1402_v14, %v1410_v15  ;;  %v5604_v14 = vcombine.low %v1305_v7, %v1313_v8 }
 0x792   : > { %2328 = vmatpush1.bf16.msra.mxu1 %v5680_v23  ;;  %2371 = vmatpush1.bf16.msra.mxu0 %v5682_v24  ;;  %v1393_v23 = vld [vmem:[%s7468_s24 + $0x2f0] sm:$0xff]  ;;  %v1386_v24 = vld [vmem:[%s7468_s24 + $0x2b8] sm:$0xff] }
 0x793   : > { %2329 = vmatprep.subr.bf16.mxu1 %v5665_v25  ;;  %2372 = vmatprep.subr.bf16.mxu0 %v5667_v26  ;;  %v1394_v25 = vld [vmem:[%s7468_s24 + $0x2f8] sm:$0xff]  ;;  %v5700_v26 = vcombine.low %v1401_v12, %v1409_v13  ;;  %v5685_v28 = vcombine.high %v1385_v20, %v1393_v23  ;;  %v5605_v12 = vcombine.high %v1305_v7, %v1313_v8 }
 0x794   : > { %v5687_v29 = vcombine.high %v1386_v24, %v1394_v25  ;;  %v5686_v35 = vcombine.low %v1386_v24, %v1394_v25  ;;  %v6532_v24 = vld [vmem:[%s7470_s30 + $0x30] sm:$0xff]  }
 0x795   : > { %v6533_v25 = vld [vmem:[%s7470_s30 + $0xb0] sm:$0xff]  }
 0x796   : > { %2330 = vmatpush1.bf16.msra.mxu1 %v5664_v31  ;;  %2373 = vmatpush1.bf16.msra.mxu0 %v5666_v32  ;;  %v1377_v31 = vld [vmem:[%s7468_s24 + $0x270] sm:$0xff]  ;;  %v1370_v32 = vld [vmem:[%s7468_s24 + $0x238] sm:$0xff] }
 0x797   : > { %2331 = vmatprep.subr.bf16.mxu1 %v5649_v33  ;;  %2374 = vmatprep.subr.bf16.mxu0 %v5651_v34  ;;  %v1378_v33 = vld [vmem:[%s7468_s24 + $0x278] sm:$0xff]  ;;  %v5684_v34 = vcombine.low %v1385_v20, %v1393_v23  ;;  %v5669_v36 = vcombine.high %v1369_v30, %v1377_v31  ;;  %v6530_v20 = vld [vmem:[%s7470_s30 + $0x70] sm:$0xff]  }
 0x798   : > { %v5671_v38 = vcombine.high %v1370_v32, %v1378_v33  ;;  %v6531_v23 = vld [vmem:[%s7470_s30 + $0xf0] sm:$0xff]  }
 0x79a   : > { %2332 = vmatpush1.bf16.msra.mxu1 %v5648_v40  ;;  %2375 = vmatpush1.bf16.msra.mxu0 %v5650_v44  ;;  %v1361_v40 = vld [vmem:[%s7468_s24 + $0x1f0] sm:$0xff]  ;;  %v1354_v44 = vld [vmem:[%s7468_s24 + $0x1b8] sm:$0xff] }
 0x79b   : > { %2333 = vmatprep.subr.bf16.mxu1 %v5633_v45  ;;  %2376 = vmatprep.subr.bf16.mxu0 %v5635_v46  ;;  %v1362_v45 = vld [vmem:[%s7468_s24 + $0x1f8] sm:$0xff]  ;;  %v5668_v46 = vcombine.low %v1369_v30, %v1377_v31  ;;  %v5653_v47 = vcombine.high %v1353_v39, %v1361_v40  ;;  %v6539_v30 = vld [vmem:[%s7470_s30 + $0xe0] sm:$0xff]  }
 0x79c   : > { %v5655_v48 = vcombine.high %v1354_v44, %v1362_v45  ;;  %v6540_v31 = vld [vmem:[%s7470_s30 + $0x20] sm:$0xff]  }
 0x79e   : > { %2334 = vmatpush1.bf16.msra.mxu1 %v5632_v53  ;;  %2377 = vmatpush1.bf16.msra.mxu0 %v5634_v54  ;;  %v1338_v53 = vld [vmem:[%s7468_s24 + $0x138] sm:$0xff] }
 0x79f   : > { %2335 = vmatprep.subr.bf16.mxu1 %v5617_v55  ;;  %2378 = vmatprep.subr.bf16.mxu0 %v5619_v57  ;;  %v1346_v54 = vld [vmem:[%s7468_s24 + $0x178] sm:$0xff]  ;;  %v5652_v55 = vcombine.low %v1353_v39, %v1361_v40  ;;  %v5654_v57 = vcombine.low %v1354_v44, %v1362_v45  ;;  %v6547_v39 = vld [vmem:[%s7470_s30 + $0xd0] sm:$0xff]   ;;  %v6550_v45 = vld [vmem:[%s7470_s30 + $0x48] sm:$0xff]  }
 0x7a0   : > { %v5639_v61 = vcombine.high %v1338_v53, %v1346_v54  ;;  %v6548_v40 = vld [vmem:[%s7470_s30 + $0x10] sm:$0xff]  }
 0x7a1   : > { %v6549_v44 = vld [vmem:[%s7470_s30 + $0x90] sm:$0xff]  }
 0x7a2   : > { %2336 = vmatpush1.bf16.msra.mxu1 %v5616_v0  ;;  %2379 = vmatpush1.bf16.msra.mxu0 %v5618_v2  ;;  %v1322_v0 = vld [vmem:[%s7468_s24 + $0xb8] sm:$0xff] }
 0x7a3   : > { %2337 = vmatprep.subr.bf16.mxu1 %v5601_v4  ;;  %2380 = vmatprep.subr.bf16.mxu0 %v5603_v42  ;;  %v1330_v2 = vld [vmem:[%s7468_s24 + $0xf8] sm:$0xff]  ;;  %v5636_v4 = vcombine.low %v1337_v62, %v1345_v51  ;;  %v5638_v42 = vcombine.low %v1338_v53, %v1346_v54  ;;  %v6555_v62 = vld [vmem:[%s7470_s30 + $0xc0] sm:$0xff]  }
 0x7a4   : > { %v5623_v6 = vcombine.high %v1322_v0, %v1330_v2  ;;  %v6556_v51 = vld [vmem:[%s7470_s30] sm:$0xff]   ;;  %v6558_v54 = vld [vmem:[%s7470_s30 + $0x178] sm:$0xff]  }
 0x7a5   : > { %v6557_v53 = vld [vmem:[%s7470_s30 + $0x80] sm:$0xff]  }
 0x7a6   : > { %2338 = vmatpush1.bf16.msra.mxu1 %v5600_v43  ;;  %2381 = vmatpush1.bf16.msra.mxu0 %v5602_v9  ;;  %v1306_v43 = vld [vmem:[%s7468_s24 + $0x38] sm:$0xff] }
 0x7a7   : > { %2409 = vmatprep.subr.bf16.mxu1 %v5717_v10  ;;  %2452 = vmatprep.subr.bf16.mxu0 %v5719_v11  ;;  %v1314_v9 = vld [vmem:[%s7468_s24 + $0x78] sm:$0xff]  ;;  %v5620_v10 = vcombine.low %v1321_v52, %v1329_v63  ;;  %v5622_v11 = vcombine.low %v1322_v0, %v1330_v2 }
 0x7a8   : > { %v5607_v13 = vcombine.high %v1306_v43, %v1314_v9  ;;  %v5606_v15 = vcombine.low %v1306_v43, %v1314_v9 }
 0x7a9   : > { %2356 = vmatmul.mubr.bf16.vlgmr.msra.gmra.mxu1 %v7679_v3  ;;  %2399 = vmatmul.mubr.bf16.vlgmr.msra.gmra.mxu0 %v7679_v3 }
 0x7aa   : > { %2410 = vmatpush1.bf16.msra.mxu1 %v5716_v16  ;;  %2453 = vmatpush1.bf16.msra.mxu0 %v5718_v17  ;;  %v6526_v16 = vld [vmem:[%s7470_s30 + $0x78] sm:$0xff]  }
 0x7ab   : > { %2411 = vmatprep.subr.bf16.mxu1 %v5701_v18  ;;  %2454 = vmatprep.subr.bf16.mxu0 %v5703_v19  ;;  %v6527_v17 = vld [vmem:[%s7470_s30 + $0xf8] sm:$0xff]  }
 0x7ac   : > { %2441 = vmatprep.mubr.bf16.mxu1 %v7122_v21  ;;  %2484 = vmatprep.mubr.bf16.mxu0 %v7122_v21  ;;  %v5670_v21 = vcombine.low %v1370_v32, %v1378_v33  ;;  %v6528_v18 = vld [vmem:[%s7470_s30 + $0x38] sm:$0xff]   ;;  %v6541_v32 = vld [vmem:[%s7470_s30 + $0xa0] sm:$0xff]  }
 0x7ad   : > { %v6529_v19 = vld [vmem:[%s7470_s30 + $0xb8] sm:$0xff]  }
 0x7ae   : > { %2412 = vmatpush1.bf16.msra.mxu1 %v5700_v26  ;;  %2455 = vmatpush1.bf16.msra.mxu0 %v5702_v27  ;;  %v6534_v26 = vld [vmem:[%s7470_s30 + $0x68] sm:$0xff]   ;;  %v6542_v33 = vld [vmem:[%s7470_s30 + $0x58] sm:$0xff]  }
 0x7af   : > { %2413 = vmatprep.subr.bf16.mxu1 %v5685_v28  ;;  %2456 = vmatprep.subr.bf16.mxu0 %v5687_v29  ;;  %v6535_v27 = vld [vmem:[%s7470_s30 + $0xe8] sm:$0xff]  }
 0x7b0   : > { %v6536_v28 = vld [vmem:[%s7470_s30 + $0x28] sm:$0xff]  }
 0x7b1   : > { %v6537_v29 = vld [vmem:[%s7470_s30 + $0xa8] sm:$0xff]  }
 0x7b2   : > { %2414 = vmatpush1.bf16.msra.mxu1 %v5684_v34  ;;  %2457 = vmatpush1.bf16.msra.mxu0 %v5686_v35  ;;  %v6543_v34 = vld [vmem:[%s7470_s30 + $0xd8] sm:$0xff]  }
 0x7b3   : > { %2415 = vmatprep.subr.bf16.mxu1 %v5669_v36  ;;  %2458 = vmatprep.subr.bf16.mxu0 %v5671_v38  ;;  %v6544_v35 = vld [vmem:[%s7470_s30 + $0x18] sm:$0xff]   ;;  %v6546_v38 = vld [vmem:[%s7470_s30 + $0x50] sm:$0xff]  }
 0x7b4   : > { %v6545_v36 = vld [vmem:[%s7470_s30 + $0x98] sm:$0xff]  }
 0x7b6   : > { %2416 = vmatpush1.bf16.msra.mxu1 %v5668_v46  ;;  %2459 = vmatpush1.bf16.msra.mxu0 %v5670_v21  ;;  %v6551_v46 = vld [vmem:[%s7470_s30 + $0xc8] sm:$0xff]  }
 0x7b7   : > { %2417 = vmatprep.subr.bf16.mxu1 %v5653_v47  ;;  %2460 = vmatprep.subr.bf16.mxu0 %v5655_v48  ;;  %v6552_v21 = vld [vmem:[%s7470_s30 + $0x8] sm:$0xff]   ;;  %v6554_v48 = vld [vmem:[%s7470_s30 + $0x40] sm:$0xff]  }
 0x7b8   : > { %v6553_v47 = vld [vmem:[%s7470_s30 + $0x88] sm:$0xff]  }
 0x7ba   : > { %2418 = vmatpush1.bf16.msra.mxu1 %v5652_v55  ;;  %2461 = vmatpush1.bf16.msra.mxu0 %v5654_v57  ;;  %v6559_v55 = vld [vmem:[%s7470_s30 + $0x1f8] sm:$0xff]   ;;  %v7818_v57 = vld [vmem:[%s7496_s17] sm:$0xff] }
 0x7bb   : > { %2419 = vmatprep.subr.bf16.mxu1 %v5637_v22  ;;  %2462 = vmatprep.subr.bf16.mxu0 %v5639_v61  ;;  %v1438_v52 = vrot.slane %v7818_v57, %v7556_v50  ;;  %v1446_v63 = vrot.slane %v7818_v57, %v7605_v58  ;;  %v1434_v0 = vrot.slane %v7818_v57, %v7564_v56 }
 0x7bc   : > { %v1442_v2 = vrot.slane %v7818_v57, %v7572_v1 }
 0x7be   : > { %2420 = vmatpush1.bf16.msra.mxu1 %v5636_v4  ;;  %2463 = vmatpush1.bf16.msra.mxu0 %v5638_v42 }
 0x7bf   : > { %2421 = vmatprep.subr.bf16.mxu1 %v5621_v5  ;;  %2464 = vmatprep.subr.bf16.mxu0 %v5623_v6 }
 0x7c2   : > { %2422 = vmatpush1.bf16.msra.mxu1 %v5620_v10  ;;  %2465 = vmatpush1.bf16.msra.mxu0 %v5622_v11 }
 0x7c3   : > { %2423 = vmatprep.subr.bf16.mxu1 %v5605_v12  ;;  %2466 = vmatprep.subr.bf16.mxu0 %v5607_v13 }
 0x7c6   : > { %2424 = vmatpush1.bf16.msra.mxu1 %v5604_v14  ;;  %2467 = vmatpush1.bf16.msra.mxu0 %v5606_v15 }
 0x7c7   : > { %6029 = vmatprep.subr.bf16.mxu1 %v6526_v16  ;;  %6051 = vmatprep.subr.bf16.mxu0 %v6527_v17 }
 0x7c9   : > { %2442 = vmatmul.mubr.bf16.vlgmr.msra.gmra.mxu1 %v7679_v3  ;;  %2485 = vmatmul.mubr.bf16.vlgmr.msra.gmra.mxu0 %v7679_v3  ;;  %v6538_v3 = vld [vmem:[%s7470_s30 + $0x60] sm:$0xff]  }
 0x7ca   : > { %6030 = vmatpush3.bf16.msra.mxu1 %v6528_v18  ;;  %6052 = vmatpush3.bf16.msra.mxu0 %v6529_v19 }
 0x7cb   : > { %6031 = vmatprep.subr.bf16.mxu1 %v6530_v20  ;;  %6053 = vmatprep.subr.bf16.mxu0 %v6531_v23 }
 0x7ce   : > { %6032 = vmatpush3.bf16.msra.mxu1 %v6532_v24  ;;  %6054 = vmatpush3.bf16.msra.mxu0 %v6533_v25 }
 0x7cf   : > { %6033 = vmatprep.subr.bf16.mxu1 %v6534_v26  ;;  %6055 = vmatprep.subr.bf16.mxu0 %v6535_v27 }
 0x7d2   : > { %6034 = vmatpush3.bf16.msra.mxu1 %v6536_v28  ;;  %6056 = vmatpush3.bf16.msra.mxu0 %v6537_v29  ;;  %v6560_v28 = vld [vmem:[%s7470_s30 + $0x138] sm:$0xff]  }
 0x7d3   : > { %6035 = vmatprep.subr.bf16.mxu1 %v6538_v3  ;;  %6057 = vmatprep.subr.bf16.mxu0 %v6539_v30  ;;  %v6561_v29 = vld [vmem:[%s7470_s30 + $0x1b8] sm:$0xff]  }
 0x7d6   : > { %6036 = vmatpush3.bf16.msra.mxu1 %v6540_v31  ;;  %6058 = vmatpush3.bf16.msra.mxu0 %v6541_v32  ;;  %v6562_v31 = vld [vmem:[%s7470_s30 + $0x170] sm:$0xff]  }
 0x7d7   : > { %6037 = vmatprep.subr.bf16.mxu1 %v6542_v33  ;;  %6059 = vmatprep.subr.bf16.mxu0 %v6543_v34  ;;  %v6563_v32 = vld [vmem:[%s7470_s30 + $0x1f0] sm:$0xff]  }
 0x7d8   : > { %v6564_v33 = vld [vmem:[%s7470_s30 + $0x130] sm:$0xff]  }
 0x7d9   : > { %v6565_v34 = vld [vmem:[%s7470_s30 + $0x1b0] sm:$0xff]  }
 0x7da   : > { %6038 = vmatpush3.bf16.msra.mxu1 %v6544_v35  ;;  %6060 = vmatpush3.bf16.msra.mxu0 %v6545_v36  ;;  %v6566_v35 = vld [vmem:[%s7470_s30 + $0x168] sm:$0xff]  }
 0x7db   : > { %6039 = vmatprep.subr.bf16.mxu1 %v6546_v38  ;;  %6061 = vmatprep.subr.bf16.mxu0 %v6547_v39  ;;  %v6567_v36 = vld [vmem:[%s7470_s30 + $0x1e8] sm:$0xff]  }
 0x7dc   : > { %v6568_v38 = vld [vmem:[%s7470_s30 + $0x128] sm:$0xff]  }
 0x7dd   : > { %v6569_v39 = vld [vmem:[%s7470_s30 + $0x1a8] sm:$0xff]  }
 0x7de   : > { %6040 = vmatpush3.bf16.msra.mxu1 %v6548_v40  ;;  %6062 = vmatpush3.bf16.msra.mxu0 %v6549_v44  ;;  %v6570_v40 = vld [vmem:[%s7470_s30 + $0x160] sm:$0xff]  }
 0x7df   : > { %6041 = vmatprep.subr.bf16.mxu1 %v6550_v45  ;;  %6063 = vmatprep.subr.bf16.mxu0 %v6551_v46  ;;  %v6571_v44 = vld [vmem:[%s7470_s30 + $0x1e0] sm:$0xff]  }
 0x7e0   : > { %v6572_v45 = vld [vmem:[%s7470_s30 + $0x120] sm:$0xff]  }
 0x7e1   : > { %v6573_v46 = vld [vmem:[%s7470_s30 + $0x1a0] sm:$0xff]  }
 0x7e2   : > { %6042 = vmatpush3.bf16.msra.mxu1 %v6552_v21  ;;  %6064 = vmatpush3.bf16.msra.mxu0 %v6553_v47  ;;  %v6574_v21 = vld [vmem:[%s7470_s30 + $0x158] sm:$0xff]  }
 0x7e3   : > { %6043 = vmatprep.subr.bf16.mxu1 %v6554_v48  ;;  %6065 = vmatprep.subr.bf16.mxu0 %v6555_v62  ;;  %v6575_v47 = vld [vmem:[%s7470_s30 + $0x1d8] sm:$0xff]  }
 0x7e4   : > { %v6576_v48 = vld [vmem:[%s7470_s30 + $0x118] sm:$0xff]  }
 0x7e5   : > { %v6577_v62 = vld [vmem:[%s7470_s30 + $0x198] sm:$0xff]  }
 0x7e6   : > { %6044 = vmatpush3.bf16.msra.mxu1 %v6556_v51  ;;  %6066 = vmatpush3.bf16.msra.mxu0 %v6557_v53  ;;  %v6578_v51 = vld [vmem:[%s7470_s30 + $0x150] sm:$0xff]  }
 0x7e7   : > { %6073 = vmatprep.subr.bf16.mxu1 %v6558_v54  ;;  %6095 = vmatprep.subr.bf16.mxu0 %v6559_v55  ;;  %v6579_v53 = vld [vmem:[%s7470_s30 + $0x1d0] sm:$0xff]   ;;  %v7849_v54 = vsub.s32 7, %v7553_v49  ;;  %v7852_v55 = vsub.s32 4, %v7553_v49 }
 0x7e9   : > { %v1462_v49 = vrot.slane %v7818_v57, %v7849_v54 }
 0x829   : > { %v2185_v22 = vpop.f32.mrf.mxu1  ;;  %v2228_v61 = vpop.f32.mrf.mxu0 }
 0x82a   : > { %v2186_v10 = vadd.f32 %v2185_v22, %v1434_v0  ;;  %v2229_v11 = vadd.f32 %v2228_v61, %v1442_v2  ;;  %v6580_v22 = vld [vmem:[%s7470_s30 + $0x110] sm:$0xff]  }
 0x82b   : > { %v2187_v4 = vpop.f32.mrf.mxu1  ;;  %v2230_v42 = vpop.f32.mrf.mxu0  ;;  %v6581_v61 = vld [vmem:[%s7470_s30 + $0x190] sm:$0xff]  }
 0x82c   : > { %v2188_v7 = vadd.f32 %v2187_v4, %v1438_v52  ;;  %v2231_v8 = vadd.f32 %v2230_v42, %v1446_v63  ;;  %v2495_v24 = vmax.f32 %v2186_v10, 0.0  ;;  %v2497_v25 = vmax.f32 %v2229_v11, 0.0  ;;  %v6586_v11 = vld [vmem:[%s7470_s30 + $0x140] sm:$0xff]  }
 0x82d   : > { %v2189_v5 = vpop.f32.mrf.mxu1  ;;  %v2232_v6 = vpop.f32.mrf.mxu0  ;;  %v1454_v4 = vrot.slane %v7818_v57, %v7658_v37  ;;  %v1450_v42 = vrot.slane %v7818_v57, %v7852_v55 }
 0x82e   : > { %v2190_v43 = vadd.f32 %v2189_v5, %v1434_v0  ;;  %v2233_v9 = vadd.f32 %v2232_v6, %v1442_v2  ;;  %v2496_v18 = vmax.f32 %v2188_v7, 0.0  ;;  %v2498_v19 = vmax.f32 %v2231_v8, 0.0  ;;  %v6582_v0 = vld [vmem:[%s7470_s30 + $0x148] sm:$0xff]  }
 0x82f   : > { %v2191_v12 = vpop.f32.mrf.mxu1  ;;  %v2234_v13 = vpop.f32.mrf.mxu0  ;;  %v6583_v2 = vld [vmem:[%s7470_s30 + $0x1c8] sm:$0xff]   ;;  %v1458_v5 = vrot.slane %v7818_v57, %v7664_v41 }
 0x830   : > { %v2192_v14 = vadd.f32 %v2191_v12, %v1438_v52  ;;  %v2235_v15 = vadd.f32 %v2234_v13, %v1446_v63  ;;  %v2511_v16 = vmax.f32 %v2190_v43, 0.0  ;;  %v2513_v17 = vmax.f32 %v2233_v9, 0.0  ;;  %v6584_v8 = vld [vmem:[%s7470_s30 + $0x108] sm:$0xff]   ;;  %v6587_v12 = vld [vmem:[%s7470_s30 + $0x1c0] sm:$0xff]  }
 0x831   : > { %v6585_v43 = vld [vmem:[%s7470_s30 + $0x188] sm:$0xff]  }
 0x832   : > { %v2512_v20 = vmax.f32 %v2192_v14, 0.0  ;;  %v2514_v23 = vmax.f32 %v2235_v15, 0.0  ;;  %v2527_v3 = vpack.c.bf16 %v2511_v16, %v2495_v24  ;;  %v2529_v30 = vpack.c.bf16 %v2513_v17, %v2497_v25  ;;  %v6588_v24 = vld [vmem:[%s7470_s30 + $0x100] sm:$0xff]  }
 0x833   : > { %v6589_v25 = vld [vmem:[%s7470_s30 + $0x180] sm:$0xff]  }
 0x834   : > { %v2528_v26 = vpack.c.bf16 %v2512_v20, %v2496_v18  ;;  %v2530_v27 = vpack.c.bf16 %v2514_v23, %v2498_v19 }
 0x836   : > { %3603 = vmatprep.mubr.bf16.mxu1 %v2528_v26  ;;  %3644 = vmatprep.mubr.bf16.mxu0 %v2530_v27 }
 0x837   : > { %3604 = vmatmul.mubr.bf16.vlgmr.msra.gmra.mxu1 %v2527_v3  ;;  %3645 = vmatmul.mubr.bf16.vlgmr.msra.gmra.mxu0 %v2529_v30 }
 0x838   : > { %6074 = vmatpush3.bf16.msra.mxu1 %v6560_v28  ;;  %6096 = vmatpush3.bf16.msra.mxu0 %v6561_v29  ;;  %v6590_v28 = vld [vmem:[%s7470_s30 + $0x278] sm:$0xff]  }
 0x839   : > { %6075 = vmatprep.subr.bf16.mxu1 %v6562_v31  ;;  %6097 = vmatprep.subr.bf16.mxu0 %v6563_v32  ;;  %v6591_v29 = vld [vmem:[%s7470_s30 + $0x2f8] sm:$0xff]  }
 0x83c   : > { %6076 = vmatpush3.bf16.msra.mxu1 %v6564_v33  ;;  %6098 = vmatpush3.bf16.msra.mxu0 %v6565_v34 }
 0x83d   : > { %6077 = vmatprep.subr.bf16.mxu1 %v6566_v35  ;;  %6099 = vmatprep.subr.bf16.mxu0 %v6567_v36 }
 0x840   : > { %6078 = vmatpush3.bf16.msra.mxu1 %v6568_v38  ;;  %6100 = vmatpush3.bf16.msra.mxu0 %v6569_v39  ;;  %v6592_v38 = vld [vmem:[%s7470_s30 + $0x238] sm:$0xff]  }
 0x841   : > { %6079 = vmatprep.subr.bf16.mxu1 %v6570_v40  ;;  %6101 = vmatprep.subr.bf16.mxu0 %v6571_v44  ;;  %v6593_v39 = vld [vmem:[%s7470_s30 + $0x2b8] sm:$0xff]  }
 0x844   : > { %6080 = vmatpush3.bf16.msra.mxu1 %v6572_v45  ;;  %6102 = vmatpush3.bf16.msra.mxu0 %v6573_v46  ;;  %v6594_v45 = vld [vmem:[%s7470_s30 + $0x270] sm:$0xff]  }
 0x845   : > { %6081 = vmatprep.subr.bf16.mxu1 %v6574_v21  ;;  %6103 = vmatprep.subr.bf16.mxu0 %v6575_v47  ;;  %v6595_v46 = vld [vmem:[%s7470_s30 + $0x2f0] sm:$0xff]  }
 0x846   : > { %v6596_v21 = vld [vmem:[%s7470_s30 + $0x230] sm:$0xff]  }
 0x847   : > { %v6597_v47 = vld [vmem:[%s7470_s30 + $0x2b0] sm:$0xff]  }
 0x848   : > { %6082 = vmatpush3.bf16.msra.mxu1 %v6576_v48  ;;  %6104 = vmatpush3.bf16.msra.mxu0 %v6577_v62  ;;  %v6598_v48 = vld [vmem:[%s7470_s30 + $0x268] sm:$0xff]  }
 0x849   : > { %v2271_v52 = vpop.f32.mrf.mxu1  ;;  %v2314_v63 = vpop.f32.mrf.mxu0  ;;  %6083 = vmatprep.subr.bf16.mxu1 %v6578_v51  ;;  %6105 = vmatprep.subr.bf16.mxu0 %v6579_v53  ;;  %v6599_v62 = vld [vmem:[%s7470_s30 + $0x2e8] sm:$0xff]  }
 0x84a   : > { %v2272_v57 = vadd.f32 %v2271_v52, %v1450_v42  ;;  %v2315_v17 = vadd.f32 %v2314_v63, %v1458_v5  ;;  %v6600_v51 = vld [vmem:[%s7470_s30 + $0x228] sm:$0xff]   ;;  %v6604_v52 = vld [vmem:[%s7470_s30 + $0x220] sm:$0xff]  }
 0x84b   : > { %v2273_v6 = vpop.f32.mrf.mxu1  ;;  %v2316_v7 = vpop.f32.mrf.mxu0  ;;  %v6601_v53 = vld [vmem:[%s7470_s30 + $0x2a8] sm:$0xff]   ;;  %v6605_v63 = vld [vmem:[%s7470_s30 + $0x2a0] sm:$0xff]  }
 0x84c   : > { %6084 = vmatpush3.bf16.msra.mxu1 %v6580_v22  ;;  %6106 = vmatpush3.bf16.msra.mxu0 %v6581_v61  ;;  %v2274_v13 = vadd.f32 %v2273_v6, %v1454_v4  ;;  %v2317_v14 = vadd.f32 %v2316_v7, %v1462_v49  ;;  %v2499_v33 = vmax.f32 %v2272_v57, 0.0  ;;  %v2501_v34 = vmax.f32 %v2315_v17, 0.0  ;;  %v6602_v22 = vld [vmem:[%s7470_s30 + $0x260] sm:$0xff]   ;;  %v7895_v6 = vld [vmem:[%s7496_s17 + $0x8] sm:$0xff]  ;;  %v6612_v7 = vld [vmem:[%s7470_s30 + $0x210] sm:$0xff]  }
 0x84d   : > { %v2275_v9 = vpop.f32.mrf.mxu1  ;;  %v2318_v10 = vpop.f32.mrf.mxu0  ;;  %6085 = vmatprep.subr.bf16.mxu1 %v6582_v0  ;;  %6107 = vmatprep.subr.bf16.mxu0 %v6583_v2  ;;  %v6603_v61 = vld [vmem:[%s7470_s30 + $0x2e0] sm:$0xff]   ;;  %v6606_v0 = vld [vmem:[%s7470_s30 + $0x258] sm:$0xff]   ;;  %v6616_v17 = vld [vmem:[%s7470_s30 + $0x208] sm:$0xff]  }
 0x84e   : > { %v2276_v15 = vadd.f32 %v2275_v9, %v1450_v42  ;;  %v2319_v16 = vadd.f32 %v2318_v10, %v1458_v5  ;;  %v2500_v3 = vmax.f32 %v2274_v13, 0.0  ;;  %v2502_v30 = vmax.f32 %v2317_v14, 0.0  ;;  %v6607_v2 = vld [vmem:[%s7470_s30 + $0x2d8] sm:$0xff]   ;;  %v6610_v42 = vld [vmem:[%s7470_s30 + $0x250] sm:$0xff]   ;;  %v6614_v10 = vld [vmem:[%s7470_s30 + $0x248] sm:$0xff]  }
 0x84f   : > { %v2277_v18 = vpop.f32.mrf.mxu1  ;;  %v2320_v19 = vpop.f32.mrf.mxu0  ;;  %v6611_v5 = vld [vmem:[%s7470_s30 + $0x2d0] sm:$0xff]   ;;  %v1478_v13 = vrot.slane %v7895_v6, %v7605_v58  ;;  %v1466_v14 = vrot.slane %v7895_v6, %v7564_v56 }
 0x850   : > { %v2278_v20 = vadd.f32 %v2277_v18, %v1454_v4  ;;  %v2321_v23 = vadd.f32 %v2320_v19, %v1462_v49  ;;  %6086 = vmatpush3.bf16.msra.mxu1 %v6584_v8  ;;  %6108 = vmatpush3.bf16.msra.mxu0 %v6585_v43  ;;  %v2515_v26 = vmax.f32 %v2276_v15, 0.0  ;;  %v2517_v27 = vmax.f32 %v2319_v16, 0.0  ;;  %v6608_v4 = vld [vmem:[%s7470_s30 + $0x218] sm:$0xff]   ;;  %v6613_v8 = vld [vmem:[%s7470_s30 + $0x290] sm:$0xff]   ;;  %v6617_v18 = vld [vmem:[%s7470_s30 + $0x288] sm:$0xff]  }
 0x851   : > { %6087 = vmatprep.subr.bf16.mxu1 %v6586_v11  ;;  %6109 = vmatprep.subr.bf16.mxu0 %v6587_v12  ;;  %v6609_v49 = vld [vmem:[%s7470_s30 + $0x298] sm:$0xff]   ;;  %v6615_v11 = vld [vmem:[%s7470_s30 + $0x2c8] sm:$0xff]   ;;  %v1470_v12 = vrot.slane %v7895_v6, %v7556_v50  ;;  %v1474_v15 = vrot.slane %v7895_v6, %v7572_v1 }
 0x852   : > { %v2516_v31 = vmax.f32 %v2278_v20, 0.0  ;;  %v2518_v32 = vmax.f32 %v2321_v23, 0.0  ;;  %v2531_v40 = vpack.c.bf16 %v2515_v26, %v2499_v33  ;;  %v2533_v44 = vpack.c.bf16 %v2517_v27, %v2501_v34  ;;  %v6618_v23 = vld [vmem:[%s7470_s30 + $0x240] sm:$0xff]  }
 0x853   : > { %v6620_v34 = vld [vmem:[%s7470_s30 + $0x200] sm:$0xff]  }
 0x854   : > { %v2532_v35 = vpack.c.bf16 %v2516_v31, %v2500_v3  ;;  %v2534_v36 = vpack.c.bf16 %v2518_v32, %v2502_v30  ;;  %6088 = vmatpush3.bf16.msra.mxu1 %v6588_v24  ;;  %6110 = vmatpush3.bf16.msra.mxu0 %v6589_v25  ;;  %v6619_v24 = vld [vmem:[%s7470_s30 + $0x2c0] sm:$0xff]  }
 0x855   : > { %6117 = vmatprep.subr.bf16.mxu1 %v6590_v28  ;;  %6139 = vmatprep.subr.bf16.mxu0 %v6591_v29 }
 0x856   : > { %3685 = vmatprep.mubr.bf16.mxu1 %v2532_v35  ;;  %3726 = vmatprep.mubr.bf16.mxu0 %v2534_v36  ;;  %v6621_v35 = vld [vmem:[%s7470_s30 + $0x280] sm:$0xff]  }
 0x857   : > { %3686 = vmatmul.mubr.bf16.vlgmr.msra.gmra.mxu1 %v2531_v40  ;;  %3727 = vmatmul.mubr.bf16.vlgmr.msra.gmra.mxu0 %v2533_v44  ;;  %v6623_v40 = vld [vmem:[%s7470_s30 + $0x3f8] sm:$0xff]  }
 0x858   : > { %6118 = vmatpush3.bf16.msra.mxu1 %v6592_v38  ;;  %6140 = vmatpush3.bf16.msra.mxu0 %v6593_v39  ;;  %v6622_v39 = vld [vmem:[%s7470_s30 + $0x378] sm:$0xff]  }
 0x859   : > { %6119 = vmatprep.subr.bf16.mxu1 %v6594_v45  ;;  %6141 = vmatprep.subr.bf16.mxu0 %v6595_v46 }
 0x85c   : > { %6120 = vmatpush3.bf16.msra.mxu1 %v6596_v21  ;;  %6142 = vmatpush3.bf16.msra.mxu0 %v6597_v47 }
 0x85d   : > { %6121 = vmatprep.subr.bf16.mxu1 %v6598_v48  ;;  %6143 = vmatprep.subr.bf16.mxu0 %v6599_v62 }
 0x860   : > { %6122 = vmatpush3.bf16.msra.mxu1 %v6600_v51  ;;  %6144 = vmatpush3.bf16.msra.mxu0 %v6601_v53  ;;  %v6624_v53 = vld [vmem:[%s7470_s30 + $0x338] sm:$0xff]  }
 0x861   : > { %6123 = vmatprep.subr.bf16.mxu1 %v6602_v22  ;;  %6145 = vmatprep.subr.bf16.mxu0 %v6603_v61  ;;  %v6625_v22 = vld [vmem:[%s7470_s30 + $0x3b8] sm:$0xff]  }
 0x864   : > { %6124 = vmatpush3.bf16.msra.mxu1 %v6604_v52  ;;  %6146 = vmatpush3.bf16.msra.mxu0 %v6605_v63  ;;  %v6626_v63 = vld [vmem:[%s7470_s30 + $0x370] sm:$0xff]  }
 0x865   : > { %6125 = vmatprep.subr.bf16.mxu1 %v6606_v0  ;;  %6147 = vmatprep.subr.bf16.mxu0 %v6607_v2  ;;  %v6627_v0 = vld [vmem:[%s7470_s30 + $0x3f0] sm:$0xff]  }
 0x866   : > { %v6628_v2 = vld [vmem:[%s7470_s30 + $0x330] sm:$0xff]  }
 0x868   : > { %6126 = vmatpush3.bf16.msra.mxu1 %v6608_v4  ;;  %6148 = vmatpush3.bf16.msra.mxu0 %v6609_v49  ;;  %v6629_v4 = vld [vmem:[%s7470_s30 + $0x3b0] sm:$0xff]   ;;  %v6630_v49 = vld [vmem:[%s7470_s30 + $0x368] sm:$0xff]  }
 0x869   : > { %v2357_v43 = vpop.f32.mrf.mxu1  ;;  %v2400_v9 = vpop.f32.mrf.mxu0  ;;  %6127 = vmatprep.subr.bf16.mxu1 %v6610_v42  ;;  %6149 = vmatprep.subr.bf16.mxu0 %v6611_v5  ;;  %v6631_v42 = vld [vmem:[%s7470_s30 + $0x3e8] sm:$0xff]  }
 0x86a   : > { %v2358_v29 = vadd.f32 %v2357_v43, %v1466_v14  ;;  %v2401_v3 = vadd.f32 %v2400_v9, %v1474_v15  ;;  %v6632_v5 = vld [vmem:[%s7470_s30 + $0x328] sm:$0xff]   ;;  %v6635_v43 = vld [vmem:[%s7470_s30 + $0x3e0] sm:$0xff]  }
 0x86b   : > { %v2359_v16 = vpop.f32.mrf.mxu1  ;;  %v2402_v57 = vpop.f32.mrf.mxu0  ;;  %v6636_v9 = vld [vmem:[%s7470_s30 + $0x320] sm:$0xff]  }
 0x86c   : > { %6128 = vmatpush3.bf16.msra.mxu1 %v6612_v7  ;;  %6150 = vmatpush3.bf16.msra.mxu0 %v6613_v8  ;;  %v2360_v25 = vadd.f32 %v2359_v16, %v1470_v12  ;;  %v2403_v26 = vadd.f32 %v2402_v57, %v1478_v13  ;;  %v2503_v47 = vmax.f32 %v2358_v29, 0.0  ;;  %v2505_v48 = vmax.f32 %v2401_v3, 0.0  ;;  %v6633_v7 = vld [vmem:[%s7470_s30 + $0x3a8] sm:$0xff]   ;;  %v6634_v8 = vld [vmem:[%s7470_s30 + $0x360] sm:$0xff]   ;;  %v6643_v16 = vld [vmem:[%s7470_s30 + $0x3d0] sm:$0xff]  }
 0x86d   : > { %v2361_v19 = vpop.f32.mrf.mxu1  ;;  %v2404_v20 = vpop.f32.mrf.mxu0  ;;  %6129 = vmatprep.subr.bf16.mxu1 %v6614_v10  ;;  %6151 = vmatprep.subr.bf16.mxu0 %v6615_v11  ;;  %v6637_v10 = vld [vmem:[%s7470_s30 + $0x3a0] sm:$0xff]   ;;  %v6638_v11 = vld [vmem:[%s7470_s30 + $0x358] sm:$0xff]   ;;  %v6644_v57 = vld [vmem:[%s7470_s30 + $0x310] sm:$0xff]  }
 0x86e   : > { %v2362_v27 = vadd.f32 %v2361_v19, %v1466_v14  ;;  %v2405_v28 = vadd.f32 %v2404_v20, %v1474_v15  ;;  %v2504_v44 = vmax.f32 %v2360_v25, 0.0  ;;  %v2506_v45 = vmax.f32 %v2403_v26, 0.0  ;;  %v6641_v14 = vld [vmem:[%s7470_s30 + $0x398] sm:$0xff]   ;;  %v6642_v15 = vld [vmem:[%s7470_s30 + $0x350] sm:$0xff]   ;;  %v6646_v20 = vld [vmem:[%s7470_s30 + $0x348] sm:$0xff]  }
 0x86f   : > { %v2363_v30 = vpop.f32.mrf.mxu1  ;;  %v2406_v31 = vpop.f32.mrf.mxu0  ;;  %v1494_v25 = vrot.slane %v7895_v6, %v7849_v54  ;;  %v1482_v26 = vrot.slane %v7895_v6, %v7852_v55  ;;  %v6648_v3 = vld [vmem:[%s7470_s30 + $0x308] sm:$0xff]  }
 0x870   : > { %v2364_v32 = vadd.f32 %v2363_v30, %v1470_v12  ;;  %v2407_v33 = vadd.f32 %v2406_v31, %v1478_v13  ;;  %6130 = vmatpush3.bf16.msra.mxu1 %v6616_v17  ;;  %6152 = vmatpush3.bf16.msra.mxu0 %v6617_v18  ;;  %v2519_v36 = vmax.f32 %v2362_v27, 0.0  ;;  %v2521_v38 = vmax.f32 %v2405_v28, 0.0  ;;  %v6639_v12 = vld [vmem:[%s7470_s30 + $0x3d8] sm:$0xff]   ;;  %v6645_v17 = vld [vmem:[%s7470_s30 + $0x390] sm:$0xff]   ;;  %v6649_v30 = vld [vmem:[%s7470_s30 + $0x388] sm:$0xff]  }
 0x871   : > { %6131 = vmatprep.subr.bf16.mxu1 %v6618_v23  ;;  %6153 = vmatprep.subr.bf16.mxu0 %v6619_v24  ;;  %v6640_v13 = vld [vmem:[%s7470_s30 + $0x318] sm:$0xff]   ;;  %v6647_v23 = vld [vmem:[%s7470_s30 + $0x3c8] sm:$0xff]   ;;  %v1486_v24 = vrot.slane %v7895_v6, %v7658_v37  ;;  %v1490_v27 = vrot.slane %v7895_v6, %v7664_v41 }
 0x872   : > { %v2520_v46 = vmax.f32 %v2364_v32, 0.0  ;;  %v2522_v21 = vmax.f32 %v2407_v33, 0.0  ;;  %v2535_v61 = vpack.c.bf16 %v2519_v36, %v2503_v47  ;;  %v2537_v52 = vpack.c.bf16 %v2521_v38, %v2505_v48  ;;  %v6650_v33 = vld [vmem:[%s7470_s30 + $0x340] sm:$0xff]  }
 0x873   : > { %v6652_v47 = vld [vmem:[%s7470_s30 + $0x300] sm:$0xff]  }
 0x874   : > { %v2536_v62 = vpack.c.bf16 %v2520_v46, %v2504_v44  ;;  %v2538_v51 = vpack.c.bf16 %v2522_v21, %v2506_v45  ;;  %6132 = vmatpush3.bf16.msra.mxu1 %v6620_v34  ;;  %6154 = vmatpush3.bf16.msra.mxu0 %v6621_v35  ;;  %v6651_v34 = vld [vmem:[%s7470_s30 + $0x3c0] sm:$0xff]  }
 0x875   : > { %6161 = vmatprep.subr.bf16.mxu1 %v6622_v39  ;;  %6183 = vmatprep.subr.bf16.mxu0 %v6623_v40  ;;  %v6653_v48 = vld [vmem:[%s7470_s30 + $0x380] sm:$0xff]   ;;  %s8094_s30 = sld [smem:[#allocation33_spill]] (!%p5848_p7) }
 0x876   : > { %3767 = vmatprep.mubr.bf16.mxu1 %v2536_v62  ;;  %3808 = vmatprep.mubr.bf16.mxu0 %v2538_v51 }
 0x877   : > { %3768 = vmatmul.mubr.bf16.vlgmr.msra.gmra.mxu1 %v2535_v61  ;;  %3809 = vmatmul.mubr.bf16.vlgmr.msra.gmra.mxu0 %v2537_v52 }
 0x878   : > { %6162 = vmatpush3.bf16.msra.mxu1 %v6624_v53  ;;  %6184 = vmatpush3.bf16.msra.mxu0 %v6625_v22 }
 0x879   : > { %6163 = vmatprep.subr.bf16.mxu1 %v6626_v63  ;;  %6185 = vmatprep.subr.bf16.mxu0 %v6627_v0 }
 0x87c   : > { %6164 = vmatpush3.bf16.msra.mxu1 %v6628_v2  ;;  %6186 = vmatpush3.bf16.msra.mxu0 %v6629_v4 }
 0x87d   : > { %6165 = vmatprep.subr.bf16.mxu1 %v6630_v49  ;;  %6187 = vmatprep.subr.bf16.mxu0 %v6631_v42 }
 0x880   : > { %6166 = vmatpush3.bf16.msra.mxu1 %v6632_v5  ;;  %6188 = vmatpush3.bf16.msra.mxu0 %v6633_v7 }
 0x881   : > { %6167 = vmatprep.subr.bf16.mxu1 %v6634_v8  ;;  %6189 = vmatprep.subr.bf16.mxu0 %v6635_v43 }
 0x884   : > { %6168 = vmatpush3.bf16.msra.mxu1 %v6636_v9  ;;  %6190 = vmatpush3.bf16.msra.mxu0 %v6637_v10 }
 0x885   : > { %6169 = vmatprep.subr.bf16.mxu1 %v6638_v11  ;;  %6191 = vmatprep.subr.bf16.mxu0 %v6639_v12 }
 0x888   : > { %6170 = vmatpush3.bf16.msra.mxu1 %v6640_v13  ;;  %6192 = vmatpush3.bf16.msra.mxu0 %v6641_v14 }
 0x889   : > { %v2443_v18 = vpop.f32.mrf.mxu1  ;;  %v2486_v19 = vpop.f32.mrf.mxu0  ;;  %6171 = vmatprep.subr.bf16.mxu1 %v6642_v15  ;;  %6193 = vmatprep.subr.bf16.mxu0 %v6643_v16 }
 0x88a   : > { %v2444_v40 = vadd.f32 %v2443_v18, %v1482_v26  ;;  %v2487_v6 = vadd.f32 %v2486_v19, %v1490_v27  ;;  %v7956_v19 = vld [vmem:[%s7476_s0] sm:$0xff] }
 0x88b   : > { %v2445_v28 = vpop.f32.mrf.mxu1  ;;  %v2488_v29 = vpop.f32.mrf.mxu0 }
 0x88c   : > { %6172 = vmatpush3.bf16.msra.mxu1 %v6644_v57  ;;  %6194 = vmatpush3.bf16.msra.mxu0 %v6645_v17  ;;  %v2446_v35 = vadd.f32 %v2445_v28, %v1486_v24  ;;  %v2489_v36 = vadd.f32 %v2488_v29, %v1494_v25  ;;  %v2507_v63 = vmax.f32 %v2444_v40, 0.0  ;;  %v2509_v0 = vmax.f32 %v2487_v6, 0.0 }
 0x88d   : > { %v2447_v31 = vpop.f32.mrf.mxu1  ;;  %v2490_v32 = vpop.f32.mrf.mxu0  ;;  %6173 = vmatprep.subr.bf16.mxu1 %v6646_v20  ;;  %6195 = vmatprep.subr.bf16.mxu0 %v6647_v23  ;;  %v2802_v20 = vrot.slane %v7956_v19, %v7852_v55 }
 0x88e   : > { %v2448_v38 = vadd.f32 %v2447_v31, %v1482_v26  ;;  %v2491_v39 = vadd.f32 %v2490_v32, %v1490_v27  ;;  %v2508_v53 = vmax.f32 %v2446_v35, 0.0  ;;  %v2510_v22 = vmax.f32 %v2489_v36, 0.0 }
 0x88f   : > { %v2449_v44 = vpop.f32.mrf.mxu1  ;;  %v2492_v45 = vpop.f32.mrf.mxu0 }
 0x890   : > { %v2450_v46 = vadd.f32 %v2449_v44, %v1486_v24  ;;  %v2493_v21 = vadd.f32 %v2492_v45, %v1494_v25  ;;  %6174 = vmatpush3.bf16.msra.mxu1 %v6648_v3  ;;  %6196 = vmatpush3.bf16.msra.mxu0 %v6649_v30  ;;  %v2523_v62 = vmax.f32 %v2448_v38, 0.0  ;;  %v2525_v51 = vmax.f32 %v2491_v39, 0.0 }
 0x891   : > { %6175 = vmatprep.subr.bf16.mxu1 %v6650_v33  ;;  %6197 = vmatprep.subr.bf16.mxu0 %v6651_v34 }
 0x892   : > { %v2524_v61 = vmax.f32 %v2450_v46, 0.0  ;;  %v2526_v52 = vmax.f32 %v2493_v21, 0.0  ;;  %v2539_v49 = vpack.c.bf16 %v2523_v62, %v2507_v63  ;;  %v2541_v42 = vpack.c.bf16 %v2525_v51, %v2509_v0 }
 0x894   : > { %v2540_v2 = vpack.c.bf16 %v2524_v61, %v2508_v53  ;;  %v2542_v4 = vpack.c.bf16 %v2526_v52, %v2510_v22  ;;  %6176 = vmatpush3.bf16.msra.mxu1 %v6652_v47  ;;  %6198 = vmatpush3.bf16.msra.mxu0 %v6653_v48 }
 0x896   : > { %3849 = vmatprep.mubr.bf16.mxu1 %v2540_v2  ;;  %3890 = vmatprep.mubr.bf16.mxu0 %v2542_v4 }
 0x897   : > { %3850 = vmatmul.mubr.bf16.vlgmr.msra.gmra.mxu1 %v2539_v49  ;;  %3891 = vmatmul.mubr.bf16.vlgmr.msra.gmra.mxu0 %v2541_v42 }
 0x8f7   : > { %v6045_v5 = vpop.f32.mrf.mxu1  ;;  %v6067_v7 = vpop.f32.mrf.mxu0 }
 0x8f9   : > { %v6046_v8 = vpop.f32.mrf.mxu1  ;;  %v6068_v43 = vpop.f32.mrf.mxu0 }
 0x8fa   : > { %v6047_v23 = vadd.f32 %v6046_v8, %v6045_v5  ;;  %v6069_v3 = vadd.f32 %v6068_v43, %v6067_v7 }
 0x8fb   : > { %v6048_v9 = vpop.f32.mrf.mxu1  ;;  %v6070_v10 = vpop.f32.mrf.mxu0 }
 0x8fc   : > { %v3606_v27 = vadd.f32 %v6047_v23, %v2802_v20 }
 0x8fd   : > { %v6049_v11 = vpop.f32.mrf.mxu1  ;;  %v6071_v12 = vpop.f32.mrf.mxu0 }
 0x8fe   : > { %v6050_v28 = vadd.f32 %v6049_v11, %v6048_v9  ;;  %v3647_v32 = vadd.f32 %v6069_v3, %v3606_v27  ;;  %v6072_v35 = vadd.f32 %v6071_v12, %v6070_v10 }
 0x900   : > { %v3609_v33 = vadd.f32 %v6050_v28, %v2802_v20 }
 0x902   : > { %v3650_v40 = vadd.f32 %v6072_v35, %v3609_v33  ;;  %v3930_v35 = vrot.slane %v7956_v19, %v7849_v54 }
 0x917   : > { %v6089_v13 = vpop.f32.mrf.mxu1  ;;  %v6111_v14 = vpop.f32.mrf.mxu0 }
 0x919   : > { %v6090_v15 = vpop.f32.mrf.mxu1  ;;  %v6112_v16 = vpop.f32.mrf.mxu0 }
 0x91a   : > { %v6091_v30 = vadd.f32 %v6090_v15, %v6089_v13  ;;  %v6113_v6 = vadd.f32 %v6112_v16, %v6111_v14 }
 0x91b   : > { %v6092_v57 = vpop.f32.mrf.mxu1  ;;  %v6114_v17 = vpop.f32.mrf.mxu0 }
 0x91c   : > { %v3688_v36 = vadd.f32 %v6091_v30, %v3647_v32 }
 0x91d   : > { %v6093_v18 = vpop.f32.mrf.mxu1  ;;  %v6115_v24 = vpop.f32.mrf.mxu0 }
 0x91e   : > { %v6094_v38 = vadd.f32 %v6093_v18, %v6092_v57  ;;  %v3729_v46 = vadd.f32 %v6113_v6, %v3688_v36  ;;  %v6116_v48 = vadd.f32 %v6115_v24, %v6114_v17 }
 0x920   : > { %v3691_v21 = vadd.f32 %v6094_v38, %v3650_v40 }
 0x922   : > { %v3732_v61 = vadd.f32 %v6116_v48, %v3691_v21 }
 0x937   : > { %v6133_v25 = vpop.f32.mrf.mxu1  ;;  %v6155_v26 = vpop.f32.mrf.mxu0 }
 0x939   : > { %v6134_v29 = vpop.f32.mrf.mxu1  ;;  %v6156_v31 = vpop.f32.mrf.mxu0 }
 0x93a   : > { %v6135_v44 = vadd.f32 %v6134_v29, %v6133_v25  ;;  %v6157_v52 = vadd.f32 %v6156_v31, %v6155_v26 }
 0x93b   : > { %v6136_v34 = vpop.f32.mrf.mxu1  ;;  %v6158_v39 = vpop.f32.mrf.mxu0 }
 0x93c   : > { %v3770_v62 = vadd.f32 %v6135_v44, %v3729_v46 }
 0x93d   : > { %v6137_v45 = vpop.f32.mrf.mxu1  ;;  %v6159_v47 = vpop.f32.mrf.mxu0 }
 0x93e   : > { %v6138_v51 = vadd.f32 %v6137_v45, %v6136_v34  ;;  %v3811_v2 = vadd.f32 %v6157_v52, %v3770_v62  ;;  %v6160_v7 = vadd.f32 %v6159_v47, %v6158_v39  ;;  %v770_v34 = vld [vmem:[%s7476_s0 + $0x8] sm:$0xff] }
 0x93f   : > { %v3936_v39 = vrot.slane %v770_v34, %v7564_v56 }
 0x940   : > { %v3773_v4 = vadd.f32 %v6138_v51, %v3732_v61 }
 0x942   : > { %v3814_v11 = vadd.f32 %v6160_v7, %v3773_v4 }
 0x957   : > { %v6177_v53 = vpop.f32.mrf.mxu1  ;;  %v6199_v22 = vpop.f32.mrf.mxu0 }
 0x959   : > { %v6178_v63 = vpop.f32.mrf.mxu1  ;;  %v6200_v0 = vpop.f32.mrf.mxu0 }
 0x95a   : > { %v6179_v49 = vadd.f32 %v6178_v63, %v6177_v53  ;;  %v6201_v43 = vadd.f32 %v6200_v0, %v6199_v22 }
 0x95b   : > { %v6180_v42 = vpop.f32.mrf.mxu1  ;;  %v6202_v5 = vpop.f32.mrf.mxu0 }
 0x95c   : > { %v3852_v8 = vadd.f32 %v6179_v49, %v3811_v2 }
 0x95d   : > { %v6181_v9 = vpop.f32.mrf.mxu1  ;;  %v6203_v10 = vpop.f32.mrf.mxu0 }
 0x95e   : > { %v3893_v12 = vadd.f32 %v6201_v43, %v3852_v8  ;;  %v6182_v13 = vadd.f32 %v6181_v9, %v6180_v42  ;;  %v6204_v15 = vadd.f32 %v6203_v10, %v6202_v5 }
 0x960   : > { %v3855_v14 = vadd.f32 %v6182_v13, %v3814_v11  ;;  %v3899_v16 = vadd.f32 %v3893_v12, %v7673_v59 }
 0x962   : > { %v3896_v57 = vadd.f32 %v6204_v15, %v3855_v14  ;;  %3901 = vadd.xlane.f32.xlu0 %v3899_v16  ;;  %v3907_v18 = vmul.f32 %v3899_v16, %v3899_v16 }
 0x964   : > { %v3900_v17 = vadd.f32 %v3896_v57, %v7675_v60 }
 0x966   : > { %3903 = vadd.xlane.f32.xlu1 %v3900_v17  ;;  %3909 = vadd.xlane.f32.xlu0 %v3907_v18  ;;  %v3908_v20 = vmul.f32 %v3900_v17, %v3900_v17 }
 0x96a   : > { %3911 = vadd.xlane.f32.xlu1 %v3908_v20 }
 0x9eb   : > { %v3902_v23 = vpop.xlane.xlu0 %3901 }
 0x9ec   : > { %v3905_v24 = vmul.f32 0.03125, %v3902_v23 }
 0x9ee   : > { %v3915_v27 = vmul.f32 %v3905_v24, %v3905_v24  ;;  %v3919_v36 = vsub.f32 %v3899_v16, %v3905_v24 }
 0x9ef   : > { %v3904_v25 = vpop.xlane.xlu1 %3903  ;;  %v3910_v26 = vpop.xlane.xlu0 %3909 }
 0x9f0   : > { %v3906_v28 = vmul.f32 0.03125, %v3904_v25  ;;  %v3913_v29 = vmul.f32 0.03125, %v3910_v26 }
 0x9f2   : > { %v3917_v3 = vsub.f32 %v3913_v29, %v3915_v27  ;;  %v3916_v59 = vmul.f32 %v3906_v28, %v3906_v28  ;;  %v3920_v6 = vsub.f32 %v3900_v17, %v3906_v28 }
 0x9f3   : > { %v3912_v30 = vpop.xlane.xlu1 %3911 }
 0x9f4   : > { %v3921_v31 = vadd.f32 1e-05, %v3917_v3  ;;  %v3914_v32 = vmul.f32 0.03125, %v3912_v30 }
 0x9f6   : > { %6666 = vrsqrt.f32 %v3921_v31  ;;  %v3918_v60 = vsub.f32 %v3914_v32, %v3916_v59 }
 0x9f8   : > { %v3922_v33 = vadd.f32 1e-05, %v3918_v60 }
 0x9fa   : > { %6668 = vrsqrt.f32 %v3922_v33 }
 0xa03   : > { %v6667_v38 = vpop.eup %6666 }
 0xa04   : > { %v3925_v40 = vmul.f32 %v6667_v38, %v3919_v36 }
 0xa06   : > { %v3931_v44 = vmul.f32 %v3930_v35, %v3925_v40 }
 0xa07   : > { %v6669_v45 = vpop.eup %6668 }
 0xa08   : > { %v3937_v46 = vadd.f32 %v3936_v39, %v3931_v44  ;;  %v3926_v21 = vmul.f32 %v6669_v45, %v3920_v6 }
 0xa0a   : > { %3939 = vst [vmem:[#allocation2] sm:$0xff] %v3937_v46  ;;  %v3932_v47 = vmul.f32 %v3930_v35, %v3926_v21  ;;  %3944 = sbr.rel (%p5848_p7) target bundleno = 3085 (0xc0d), region = 116 }
 0xa0c   : > { %v3938_v48 = vadd.f32 %v3936_v39, %v3932_v47 }
 0xa0e   : > { %3940 = vst [vmem:[#allocation2 + $0x8] sm:$0xff] %v3938_v48 }
 0xa0f   : > { %v4014_v62 = vld [vmem:[#allocation11 + $0x1c0] sm:$0xff]  ;;  %v4015_v19 = vld [vmem:[#allocation11 + $0x1c8] sm:$0xff]  ;;  %v5849_v53 = vmul.f32 -1.442695, %v3937_v46  ;;  %v7125_v2 = vmov 0  }
 0xa10   : > { %v4018_v51 = vld [vmem:[#allocation11 + $0x1e0] sm:$0xff]  ;;  %v4019_v61 = vld [vmem:[#allocation11 + $0x1e8] sm:$0xff]  ;;  %4416 = vmatprep.mubr.bf16.mxu0 %v7125_v2  ;;  %4459 = vmatprep.mubr.bf16.mxu1 %v7125_v2  ;;  %v5850_v4 = vmul.f32 -1.442695, %v3938_v48 }
 0xa11   : > { %v5908_v22 = vcombine.high %v4014_v62, %v4018_v51  ;;  %v5907_v52 = vcombine.low %v4014_v62, %v4018_v51  ;;  %v4006_v63 = vld [vmem:[#allocation11 + $0x180] sm:$0xff]  ;;  %v5910_v49 = vcombine.high %v4015_v19, %v4019_v61  ;;  %v5909_v42 = vcombine.low %v4015_v19, %v4019_v61  ;;  %v4007_v7 = vld [vmem:[#allocation11 + $0x188] sm:$0xff] }
 0xa12   : > { %v4010_v0 = vld [vmem:[#allocation11 + $0x1a0] sm:$0xff]  ;;  %v4011_v8 = vld [vmem:[#allocation11 + $0x1a8] sm:$0xff]  ;;  %6735 = vpow2.f32 %v5849_v53 }
 0xa13   : > { %v5900_v5 = vcombine.high %v4006_v63, %v4010_v0  ;;  %v3998_v43 = vld [vmem:[#allocation11 + $0x140] sm:$0xff]  ;;  %4384 = vmatprep.subr.bf16.mxu0 %v5908_v22  ;;  %v5902_v9 = vcombine.high %v4007_v7, %v4011_v8  ;;  %v3999_v11 = vld [vmem:[#allocation11 + $0x148] sm:$0xff]  ;;  %4427 = vmatprep.subr.bf16.mxu1 %v5910_v49  ;;  %v5899_v13 = vcombine.low %v4006_v63, %v4010_v0  ;;  %6737 = vpow2.f32 %v5850_v4  ;;  %v4016_v49 = vld [vmem:[#allocation11 + $0x1d0] sm:$0xff] }
 0xa14   : > { %v4002_v10 = vld [vmem:[#allocation11 + $0x160] sm:$0xff]  ;;  %v4003_v12 = vld [vmem:[#allocation11 + $0x168] sm:$0xff]  ;;  %4385 = vmatpush1.bf16.msra.mxu0 %v5907_v52  ;;  %4428 = vmatpush1.bf16.msra.mxu1 %v5909_v42  ;;  %v5901_v14 = vcombine.low %v4007_v7, %v4011_v8  ;;  %v4020_v42 = vld [vmem:[#allocation11 + $0x1f0] sm:$0xff] }
 0xa15   : > { %4386 = vmatprep.subr.bf16.mxu0 %v5900_v5  ;;  %v5892_v15 = vcombine.high %v3998_v43, %v4002_v10  ;;  %4429 = vmatprep.subr.bf16.mxu1 %v5902_v9  ;;  %v5894_v16 = vcombine.high %v3999_v11, %v4003_v12  ;;  %v3990_v57 = vld [vmem:[#allocation11 + $0x100] sm:$0xff]  ;;  %v3991_v18 = vld [vmem:[#allocation11 + $0x108] sm:$0xff]  ;;  %v5891_v23 = vcombine.low %v3998_v43, %v4002_v10  ;;  %v4017_v8 = vld [vmem:[#allocation11 + $0x1d8] sm:$0xff] }
 0xa16   : > { %v3994_v17 = vld [vmem:[#allocation11 + $0x120] sm:$0xff]  ;;  %v3995_v20 = vld [vmem:[#allocation11 + $0x128] sm:$0xff]  ;;  %v5893_v24 = vcombine.low %v3999_v11, %v4003_v12  ;;  %v4021_v43 = vld [vmem:[#allocation11 + $0x1f8] sm:$0xff]  ;;  %v5912_v12 = vcombine.high %v4016_v49, %v4020_v42 }
 0xa17   : > { %v5884_v25 = vcombine.high %v3990_v57, %v3994_v17  ;;  %v5886_v26 = vcombine.high %v3991_v18, %v3995_v20  ;;  %v3982_v27 = vld [vmem:[#allocation11 + $0xc0] sm:$0xff]  ;;  %v3983_v29 = vld [vmem:[#allocation11 + $0xc8] sm:$0xff]  ;;  %v5883_v30 = vcombine.low %v3990_v57, %v3994_v17  ;;  %v5885_v59 = vcombine.low %v3991_v18, %v3995_v20 }
 0xa18   : > { %4387 = vmatpush1.bf16.msra.mxu0 %v5899_v13  ;;  %4430 = vmatpush1.bf16.msra.mxu1 %v5901_v14  ;;  %v3986_v28 = vld [vmem:[#allocation11 + $0xe0] sm:$0xff]  ;;  %v3987_v3 = vld [vmem:[#allocation11 + $0xe8] sm:$0xff]  ;;  %v4008_v13 = vld [vmem:[#allocation11 + $0x190] sm:$0xff]  ;;  %v5914_v57 = vcombine.high %v4017_v8, %v4021_v43  ;;  %v5911_v20 = vcombine.low %v4016_v49, %v4020_v42 }
 0xa19   : > { %4388 = vmatprep.subr.bf16.mxu0 %v5892_v15  ;;  %4431 = vmatprep.subr.bf16.mxu1 %v5894_v16  ;;  %v5876_v31 = vcombine.high %v3982_v27, %v3986_v28  ;;  %v5878_v32 = vcombine.high %v3983_v29, %v3987_v3  ;;  %v3974_v60 = vld [vmem:[#allocation11 + $0x80] sm:$0xff]  ;;  %v3975_v34 = vld [vmem:[#allocation11 + $0x88] sm:$0xff]  ;;  %v5875_v38 = vcombine.low %v3982_v27, %v3986_v28  ;;  %v4012_v14 = vld [vmem:[#allocation11 + $0x1b0] sm:$0xff] }
 0xa1a   : > { %v3978_v33 = vld [vmem:[#allocation11 + $0xa0] sm:$0xff]  ;;  %v3979_v35 = vld [vmem:[#allocation11 + $0xa8] sm:$0xff]  ;;  %v5877_v40 = vcombine.low %v3983_v29, %v3987_v3  ;;  %v4009_v15 = vld [vmem:[#allocation11 + $0x198] sm:$0xff]  ;;  %v5904_v29 = vcombine.high %v4008_v13, %v4012_v14 }
 0xa1b   : > { %v5868_v6 = vcombine.high %v3974_v60, %v3978_v33  ;;  %v5870_v45 = vcombine.high %v3975_v34, %v3979_v35  ;;  %v3966_v46 = vld [vmem:[#allocation11 + $0x40] sm:$0xff]  ;;  %v3967_v48 = vld [vmem:[#allocation11 + $0x48] sm:$0xff]  ;;  %v5867_v51 = vcombine.low %v3974_v60, %v3978_v33  ;;  %v5869_v22 = vcombine.low %v3975_v34, %v3979_v35  ;;  %v4013_v16 = vld [vmem:[#allocation11 + $0x1b8] sm:$0xff] }
 0xa1c   : > { %4389 = vmatpush1.bf16.msra.mxu0 %v5891_v23  ;;  %4432 = vmatpush1.bf16.msra.mxu1 %v5893_v24  ;;  %v3970_v21 = vld [vmem:[#allocation11 + $0x60] sm:$0xff]  ;;  %v3971_v62 = vld [vmem:[#allocation11 + $0x68] sm:$0xff]  ;;  %v5913_v23 = vcombine.low %v4017_v8, %v4021_v43  ;;  %v4000_v24 = vld [vmem:[#allocation11 + $0x150] sm:$0xff]  ;;  %v5906_v3 = vcombine.high %v4009_v15, %v4013_v16 }
 0xa1d   : > { %4390 = vmatprep.subr.bf16.mxu0 %v5884_v25  ;;  %4433 = vmatprep.subr.bf16.mxu1 %v5886_v26  ;;  %v3958_v19 = vld [vmem:[#allocation11] sm:$0xff]  ;;  %v5860_v61 = vcombine.high %v3966_v46, %v3970_v21  ;;  %v3959_v52 = vld [vmem:[#allocation11 + $0x8] sm:$0xff]  ;;  %v5862_v0 = vcombine.high %v3967_v48, %v3971_v62  ;;  %v5859_v4 = vcombine.low %v3966_v46, %v3970_v21  ;;  %v4004_v25 = vld [vmem:[#allocation11 + $0x170] sm:$0xff] }
 0xa1e   : > { %v3962_v53 = vld [vmem:[#allocation11 + $0x20] sm:$0xff]  ;;  %v3963_v63 = vld [vmem:[#allocation11 + $0x28] sm:$0xff]  ;;  %v5861_v5 = vcombine.low %v3967_v48, %v3971_v62  ;;  %v4001_v26 = vld [vmem:[#allocation11 + $0x158] sm:$0xff]  ;;  %v5896_v34 = vcombine.high %v4000_v24, %v4004_v25 }
 0xa1f   : > { %v6736_v36 = vpop.eup %6735  ;;  %v5852_v7 = vcombine.high %v3958_v19, %v3962_v53  ;;  %v5854_v9 = vcombine.high %v3959_v52, %v3963_v63  ;;  %v5851_v10 = vcombine.low %v3958_v19, %v3962_v53  ;;  %v5853_v11 = vcombine.low %v3959_v52, %v3963_v63  ;;  %v4005_v27 = vld [vmem:[#allocation11 + $0x178] sm:$0xff]  ;;  %v3976_v48 = vld [vmem:[#allocation11 + $0x90] sm:$0xff] }
 0xa20   : > { %4391 = vmatpush1.bf16.msra.mxu0 %v5883_v30  ;;  %v6738_v39 = vpop.eup %6737  ;;  %4434 = vmatpush1.bf16.msra.mxu1 %v5885_v59  ;;  %v3951_v44 = vadd.f32 1.0, %v6736_v36  ;;  %v5903_v30 = vcombine.low %v4008_v13, %v4012_v14  ;;  %v5905_v59 = vcombine.low %v4009_v15, %v4013_v16  ;;  %v3993_v60 = vld [vmem:[#allocation11 + $0x118] sm:$0xff]  ;;  %v5898_v35 = vcombine.high %v4001_v26, %v4005_v27  ;;  %v3980_v62 = vld [vmem:[#allocation11 + $0xb0] sm:$0xff] }
 0xa21   : > { %4392 = vmatprep.subr.bf16.mxu0 %v5876_v31  ;;  %4435 = vmatprep.subr.bf16.mxu1 %v5878_v32  ;;  %v3952_v47 = vadd.f32 1.0, %v6738_v39  ;;  %v3992_v31 = vld [vmem:[#allocation11 + $0x110] sm:$0xff]  ;;  %v3997_v33 = vld [vmem:[#allocation11 + $0x138] sm:$0xff]  ;;  %v5895_v36 = vcombine.low %v4000_v24, %v4004_v25  ;;  %v5872_v49 = vcombine.high %v3976_v48, %v3980_v62  ;;  %v6674_v24 = vld [vmem:[#allocation14 + $0xb8] sm:$0xff]  }
 0xa22   : > { %6739 = vrcp.f32 %v3951_v44  ;;  %v3996_v32 = vld [vmem:[#allocation11 + $0x130] sm:$0xff]  ;;  %v3989_v44 = vld [vmem:[#allocation11 + $0xf8] sm:$0xff]  ;;  %v5890_v46 = vcombine.high %v3993_v60, %v3997_v33 }
 0xa23   : > { %6741 = vrcp.f32 %v3952_v47  ;;  %v3984_v39 = vld [vmem:[#allocation11 + $0xd0] sm:$0xff]  ;;  %v5887_v21 = vcombine.low %v3992_v31, %v3996_v32  ;;  %v5889_v47 = vcombine.low %v3993_v60, %v3997_v33  ;;  %v6675_v25 = vld [vmem:[#allocation14 + $0x70] sm:$0xff]   ;;  %v6685_v60 = vld [vmem:[#allocation14 + $0x20] sm:$0xff]  }
 0xa24   : > { %4393 = vmatpush1.bf16.msra.mxu0 %v5875_v38  ;;  %4436 = vmatpush1.bf16.msra.mxu1 %v5877_v40  ;;  %v5897_v38 = vcombine.low %v4001_v26, %v4005_v27  ;;  %v3988_v40 = vld [vmem:[#allocation11 + $0xf0] sm:$0xff]  ;;  %v6676_v26 = vld [vmem:[#allocation14 + $0xf0] sm:$0xff]   ;;  %v6686_v33 = vld [vmem:[#allocation14 + $0xa0] sm:$0xff]  }
 0xa25   : > { %4394 = vmatprep.subr.bf16.mxu0 %v5868_v6  ;;  %4437 = vmatprep.subr.bf16.mxu1 %v5870_v45  ;;  %v3985_v6 = vld [vmem:[#allocation11 + $0xd8] sm:$0xff]  ;;  %v5888_v45 = vcombine.high %v3992_v31, %v3996_v32  ;;  %v5880_v19 = vcombine.high %v3984_v39, %v3988_v40  ;;  %v3968_v52 = vld [vmem:[#allocation11 + $0x50] sm:$0xff]  ;;  %v6683_v31 = vld [vmem:[#allocation14 + $0x60] sm:$0xff]  }
 0xa26   : > { %v5882_v53 = vcombine.high %v3985_v6, %v3989_v44  ;;  %v3972_v63 = vld [vmem:[#allocation11 + $0x70] sm:$0xff]  ;;  %v6677_v27 = vld [vmem:[#allocation14 + $0x30] sm:$0xff]   ;;  %v6684_v32 = vld [vmem:[#allocation14 + $0xe0] sm:$0xff]  }
 0xa27   : > { %v3960_v8 = vld [vmem:[#allocation11 + $0x10] sm:$0xff]  ;;  %v5863_v13 = vcombine.low %v3968_v52, %v3972_v63 }
 0xa28   : > { %4395 = vmatpush1.bf16.msra.mxu0 %v5867_v51  ;;  %4438 = vmatpush1.bf16.msra.mxu1 %v5869_v22  ;;  %v3977_v51 = vld [vmem:[#allocation11 + $0x98] sm:$0xff]  ;;  %v5879_v22 = vcombine.low %v3984_v39, %v3988_v40  ;;  %v3964_v43 = vld [vmem:[#allocation11 + $0x30] sm:$0xff] }
 0xa29   : > { %4396 = vmatprep.subr.bf16.mxu0 %v5860_v61  ;;  %4439 = vmatprep.subr.bf16.mxu1 %v5862_v0  ;;  %v5881_v61 = vcombine.low %v3985_v6, %v3989_v44  ;;  %v3969_v0 = vld [vmem:[#allocation11 + $0x58] sm:$0xff]  ;;  %v5856_v15 = vcombine.high %v3960_v8, %v3964_v43 }
 0xa2a   : > { %v6691_v39 = vld [vmem:[#allocation14 + $0x50] sm:$0xff]  }
 0xa2b   : > { %v6692_v40 = vld [vmem:[#allocation14 + $0xd0] sm:$0xff]  }
 0xa2c   : > { %4397 = vmatpush1.bf16.msra.mxu0 %v5859_v4  ;;  %4440 = vmatpush1.bf16.msra.mxu1 %v5861_v5  ;;  %v3973_v4 = vld [vmem:[#allocation11 + $0x78] sm:$0xff]  ;;  %v5871_v5 = vcombine.low %v3976_v48, %v3980_v62  ;;  %v6699_v48 = vld [vmem:[#allocation14 + $0x40] sm:$0xff]  }
 0xa2d   : > { %4398 = vmatprep.subr.bf16.mxu0 %v5852_v7  ;;  %4441 = vmatprep.subr.bf16.mxu1 %v5854_v9  ;;  %v3961_v9 = vld [vmem:[#allocation11 + $0x18] sm:$0xff]  ;;  %v5865_v14 = vcombine.low %v3969_v0, %v3973_v4  ;;  %v6700_v62 = vld [vmem:[#allocation14 + $0xc0] sm:$0xff]  }
 0xa2e   : > { %v6693_v6 = vld [vmem:[#allocation14 + $0x10] sm:$0xff]  }
 0xa2f   : > { %v6740_v17 = vpop.eup %6739  ;;  %v6694_v44 = vld [vmem:[#allocation14 + $0x90] sm:$0xff]  }
 0xa30   : > { %4399 = vmatpush1.bf16.msra.mxu0 %v5851_v10  ;;  %v6742_v18 = vpop.eup %6741  ;;  %4442 = vmatpush1.bf16.msra.mxu1 %v5853_v11  ;;  %v3965_v10 = vld [vmem:[#allocation11 + $0x38] sm:$0xff]  ;;  %v5864_v11 = vcombine.high %v3968_v52, %v3972_v63 }
 0xa31   : > { %4470 = vmatprep.subr.bf16.mxu0 %v5912_v12  ;;  %v7969_v28 = vpack.c.bf16 %v6742_v18, %v6740_v17  ;;  %4513 = vmatprep.subr.bf16.mxu1 %v5914_v57  ;;  %v5866_v12 = vcombine.high %v3969_v0, %v3973_v4  ;;  %v5858_v16 = vcombine.high %v3961_v9, %v3965_v10  ;;  %v6671_v18 = vld [vmem:[#allocation14 + $0x78] sm:$0xff]  }
 0xa32   : > { %v5855_v57 = vcombine.low %v3960_v8, %v3964_v43  ;;  %v5857_v17 = vcombine.low %v3961_v9, %v3965_v10 }
 0xa33   : > { %4417 = vmatmul.mubr.bf16.vlgmr.msra.gmra.mxu0 %v7969_v28  ;;  %4460 = vmatmul.mubr.bf16.vlgmr.msra.gmra.mxu1 %v7969_v28 }
 0xa34   : > { %4471 = vmatpush1.bf16.msra.mxu0 %v5911_v20  ;;  %4514 = vmatpush1.bf16.msra.mxu1 %v5913_v23  ;;  %v6672_v20 = vld [vmem:[#allocation14 + $0xf8] sm:$0xff]  }
 0xa35   : > { %4472 = vmatprep.subr.bf16.mxu0 %v5904_v29  ;;  %4515 = vmatprep.subr.bf16.mxu1 %v5906_v3  ;;  %v6673_v23 = vld [vmem:[#allocation14 + $0x38] sm:$0xff]   ;;  %v6678_v29 = vld [vmem:[#allocation14 + $0xb0] sm:$0xff]   ;;  %v6679_v3 = vld [vmem:[#allocation14 + $0x68] sm:$0xff]  }
 0xa36   : > { %4502 = vmatprep.mubr.bf16.mxu0 %v7125_v2  ;;  %4545 = vmatprep.mubr.bf16.mxu1 %v7125_v2  ;;  %v3981_v2 = vld [vmem:[#allocation11 + $0xb8] sm:$0xff] }
 0xa37   : > { %v5874_v42 = vcombine.high %v3977_v51, %v3981_v2  ;;  %v5873_v7 = vcombine.low %v3977_v51, %v3981_v2  ;;  %v6701_v51 = vld [vmem:[#allocation14] sm:$0xff]  }
 0xa38   : > { %4473 = vmatpush1.bf16.msra.mxu0 %v5903_v30  ;;  %4516 = vmatpush1.bf16.msra.mxu1 %v5905_v59  ;;  %v6680_v30 = vld [vmem:[#allocation14 + $0xe8] sm:$0xff]   ;;  %v6702_v2 = vld [vmem:[#allocation14 + $0x80] sm:$0xff]  }
 0xa39   : > { %4474 = vmatprep.subr.bf16.mxu0 %v5896_v34  ;;  %4517 = vmatprep.subr.bf16.mxu1 %v5898_v35  ;;  %v6681_v59 = vld [vmem:[#allocation14 + $0x28] sm:$0xff]   ;;  %v6687_v34 = vld [vmem:[#allocation14 + $0x58] sm:$0xff]  }
 0xa3a   : > { %v6688_v35 = vld [vmem:[#allocation14 + $0xd8] sm:$0xff]  }
 0xa3c   : > { %4475 = vmatpush1.bf16.msra.mxu0 %v5895_v36  ;;  %4518 = vmatpush1.bf16.msra.mxu1 %v5897_v38  ;;  %v6689_v36 = vld [vmem:[#allocation14 + $0x18] sm:$0xff]  }
 0xa3d   : > { %4476 = vmatprep.subr.bf16.mxu0 %v5888_v45  ;;  %4519 = vmatprep.subr.bf16.mxu1 %v5890_v46  ;;  %v6690_v38 = vld [vmem:[#allocation14 + $0x98] sm:$0xff]   ;;  %v6695_v45 = vld [vmem:[#allocation14 + $0x48] sm:$0xff]  }
 0xa3e   : > { %v6696_v46 = vld [vmem:[#allocation14 + $0xc8] sm:$0xff]  }
 0xa40   : > { %4477 = vmatpush1.bf16.msra.mxu0 %v5887_v21  ;;  %4520 = vmatpush1.bf16.msra.mxu1 %v5889_v47  ;;  %v6697_v21 = vld [vmem:[#allocation14 + $0x8] sm:$0xff]  }
 0xa41   : > { %4478 = vmatprep.subr.bf16.mxu0 %v5880_v19  ;;  %4521 = vmatprep.subr.bf16.mxu1 %v5882_v53  ;;  %v6698_v47 = vld [vmem:[#allocation14 + $0x88] sm:$0xff]   ;;  %v6703_v19 = vld [vmem:[#allocation14 + $0x178] sm:$0xff]  }
 0xa42   : > { %v6704_v53 = vld [vmem:[#allocation14 + $0x1f8] sm:$0xff]  }
 0xa44   : > { %4479 = vmatpush1.bf16.msra.mxu0 %v5879_v22  ;;  %4522 = vmatpush1.bf16.msra.mxu1 %v5881_v61  ;;  %v7977_v22 = vld [vmem:[#allocation13] sm:$0xff] }
 0xa45   : > { %4480 = vmatprep.subr.bf16.mxu0 %v5872_v49  ;;  %4523 = vmatprep.subr.bf16.mxu1 %v5874_v42  ;;  %v4027_v61 = vrot.slane %v7977_v22, %v7564_v56  ;;  %v4035_v52 = vrot.slane %v7977_v22, %v7572_v1  ;;  %v4031_v63 = vrot.slane %v7977_v22, %v7556_v50 }
 0xa46   : > { %v4039_v0 = vrot.slane %v7977_v22, %v7605_v58 }
 0xa48   : > { %4481 = vmatpush1.bf16.msra.mxu0 %v5871_v5  ;;  %4524 = vmatpush1.bf16.msra.mxu1 %v5873_v7 }
 0xa49   : > { %4482 = vmatprep.subr.bf16.mxu0 %v5864_v11  ;;  %4525 = vmatprep.subr.bf16.mxu1 %v5866_v12 }
 0xa4c   : > { %4483 = vmatpush1.bf16.msra.mxu0 %v5863_v13  ;;  %4526 = vmatpush1.bf16.msra.mxu1 %v5865_v14 }
 0xa4d   : > { %4484 = vmatprep.subr.bf16.mxu0 %v5856_v15  ;;  %4527 = vmatprep.subr.bf16.mxu1 %v5858_v16 }
 0xa50   : > { %4485 = vmatpush1.bf16.msra.mxu0 %v5855_v57  ;;  %4528 = vmatpush1.bf16.msra.mxu1 %v5857_v17 }
 0xa51   : > { %6205 = vmatprep.subr.bf16.mxu0 %v6671_v18  ;;  %6227 = vmatprep.subr.bf16.mxu1 %v6672_v20 }
 0xa53   : > { %4503 = vmatmul.mubr.bf16.vlgmr.msra.gmra.mxu0 %v7969_v28  ;;  %4546 = vmatmul.mubr.bf16.vlgmr.msra.gmra.mxu1 %v7969_v28  ;;  %v6682_v28 = vld [vmem:[#allocation14 + $0xa8] sm:$0xff]  }
 0xa54   : > { %6206 = vmatpush3.bf16.msra.mxu0 %v6673_v23  ;;  %6228 = vmatpush3.bf16.msra.mxu1 %v6674_v24 }
 0xa55   : > { %6207 = vmatprep.subr.bf16.mxu0 %v6675_v25  ;;  %6229 = vmatprep.subr.bf16.mxu1 %v6676_v26 }
 0xa58   : > { %6208 = vmatpush3.bf16.msra.mxu0 %v6677_v27  ;;  %6230 = vmatpush3.bf16.msra.mxu1 %v6678_v29 }
 0xa59   : > { %6209 = vmatprep.subr.bf16.mxu0 %v6679_v3  ;;  %6231 = vmatprep.subr.bf16.mxu1 %v6680_v30 }
 0xa5c   : > { %6210 = vmatpush3.bf16.msra.mxu0 %v6681_v59  ;;  %6232 = vmatpush3.bf16.msra.mxu1 %v6682_v28 }
 0xa5d   : > { %6211 = vmatprep.subr.bf16.mxu0 %v6683_v31  ;;  %6233 = vmatprep.subr.bf16.mxu1 %v6684_v32 }
 0xa60   : > { %6212 = vmatpush3.bf16.msra.mxu0 %v6685_v60  ;;  %6234 = vmatpush3.bf16.msra.mxu1 %v6686_v33 }
 0xa61   : > { %6213 = vmatprep.subr.bf16.mxu0 %v6687_v34  ;;  %6235 = vmatprep.subr.bf16.mxu1 %v6688_v35 }
 0xa64   : > { %6214 = vmatpush3.bf16.msra.mxu0 %v6689_v36  ;;  %6236 = vmatpush3.bf16.msra.mxu1 %v6690_v38  ;;  %v4043_v38 = vrot.slane %v7977_v22, %v7852_v55 }
 0xa65   : > { %6215 = vmatprep.subr.bf16.mxu0 %v6691_v39  ;;  %6237 = vmatprep.subr.bf16.mxu1 %v6692_v40  ;;  %v4051_v39 = vrot.slane %v7977_v22, %v7664_v41  ;;  %v4047_v40 = vrot.slane %v7977_v22, %v7658_v37 }
 0xa68   : > { %6216 = vmatpush3.bf16.msra.mxu0 %v6693_v6  ;;  %6238 = vmatpush3.bf16.msra.mxu1 %v6694_v44  ;;  %v4055_v6 = vrot.slane %v7977_v22, %v7849_v54 }
 0xa69   : > { %6217 = vmatprep.subr.bf16.mxu0 %v6695_v45  ;;  %6239 = vmatprep.subr.bf16.mxu1 %v6696_v46 }
 0xa6c   : > { %6218 = vmatpush3.bf16.msra.mxu0 %v6697_v21  ;;  %6240 = vmatpush3.bf16.msra.mxu1 %v6698_v47 }
 0xa6d   : > { %6219 = vmatprep.subr.bf16.mxu0 %v6699_v48  ;;  %6241 = vmatprep.subr.bf16.mxu1 %v6700_v62 }
 0xa70   : > { %6220 = vmatpush3.bf16.msra.mxu0 %v6701_v51  ;;  %6242 = vmatpush3.bf16.msra.mxu1 %v6702_v2 }
 0xa71   : > { %6249 = vmatprep.subr.bf16.mxu0 %v6703_v19  ;;  %6271 = vmatprep.subr.bf16.mxu1 %v6704_v53 }
 0xaf3   : > { %v4418_v4 = vpop.f32.mrf.mxu0  ;;  %v4461_v49 = vpop.f32.mrf.mxu1 }
 0xaf4   : > { %v4419_v42 = vadd.f32 %v4418_v4, %v4027_v61  ;;  %v4462_v5 = vadd.f32 %v4461_v49, %v4035_v52 }
 0xaf5   : > { %v4420_v7 = vpop.f32.mrf.mxu0  ;;  %v4463_v8 = vpop.f32.mrf.mxu1 }
 0xaf6   : > { %v5915_v43 = vmul.f32 -1.442695, %v4419_v42  ;;  %v5917_v9 = vmul.f32 -1.442695, %v4462_v5  ;;  %v4421_v10 = vadd.f32 %v4420_v7, %v4031_v63  ;;  %v4464_v11 = vadd.f32 %v4463_v8, %v4039_v0 }
 0xaf7   : > { %v4422_v56 = vpop.f32.mrf.mxu0  ;;  %v4465_v12 = vpop.f32.mrf.mxu1 }
 0xaf8   : > { %6743 = vpow2.f32 %v5915_v43  ;;  %v5916_v1 = vmul.f32 -1.442695, %v4421_v10  ;;  %v5918_v13 = vmul.f32 -1.442695, %v4464_v11  ;;  %v4423_v14 = vadd.f32 %v4422_v56, %v4027_v61 }
 0xaf9   : > { %6745 = vpow2.f32 %v5917_v9  ;;  %v4466_v50 = vadd.f32 %v4465_v12, %v4035_v52  ;;  %v4424_v15 = vpop.f32.mrf.mxu0  ;;  %v4467_v58 = vpop.f32.mrf.mxu1 }
 0xafa   : > { %6747 = vpow2.f32 %v5916_v1  ;;  %v5923_v16 = vmul.f32 -1.442695, %v4423_v14  ;;  %v4425_v57 = vadd.f32 %v4424_v15, %v4031_v63  ;;  %v4468_v17 = vadd.f32 %v4467_v58, %v4039_v0  ;;  %v6706_v15 = vld [vmem:[#allocation14 + $0x1b8] sm:$0xff]   ;;  %v6707_v58 = vld [vmem:[#allocation14 + $0x170] sm:$0xff]  }
 0xafb   : > { %6749 = vpow2.f32 %v5918_v13  ;;  %v5925_v18 = vmul.f32 -1.442695, %v4466_v50  ;;  %v6705_v13 = vld [vmem:[#allocation14 + $0x138] sm:$0xff]  }
 0xafc   : > { %6751 = vpow2.f32 %v5923_v16  ;;  %v5924_v20 = vmul.f32 -1.442695, %v4425_v57  ;;  %v5926_v23 = vmul.f32 -1.442695, %v4468_v17  ;;  %v6708_v57 = vld [vmem:[#allocation14 + $0x1f0] sm:$0xff]  }
 0xafd   : > { %6753 = vpow2.f32 %v5925_v18  ;;  %v6709_v17 = vld [vmem:[#allocation14 + $0x130] sm:$0xff]  }
 0xafe   : > { %6755 = vpow2.f32 %v5924_v20  ;;  %v6710_v18 = vld [vmem:[#allocation14 + $0x1b0] sm:$0xff]   ;;  %v6711_v20 = vld [vmem:[#allocation14 + $0x168] sm:$0xff]  }
 0xaff   : > { %6757 = vpow2.f32 %v5926_v23  ;;  %v6712_v23 = vld [vmem:[#allocation14 + $0x1e8] sm:$0xff]  }
 0xb05   : > { %v6744_v24 = vpop.eup %6743 }
 0xb06   : > { %v6746_v25 = vpop.eup %6745  ;;  %v4604_v26 = vadd.f32 1.0, %v6744_v24  ;;  %v6713_v24 = vld [vmem:[#allocation14 + $0x128] sm:$0xff]  }
 0xb07   : > { %v6748_v27 = vpop.eup %6747  ;;  %v4606_v29 = vadd.f32 1.0, %v6746_v25 }
 0xb08   : > { %v6750_v3 = vpop.eup %6749  ;;  %6759 = vrcp.f32 %v4604_v26  ;;  %v4605_v30 = vadd.f32 1.0, %v6748_v27  ;;  %v6714_v26 = vld [vmem:[#allocation14 + $0x1a8] sm:$0xff]   ;;  %v6715_v27 = vld [vmem:[#allocation14 + $0x160] sm:$0xff]  }
 0xb09   : > { %v6752_v59 = vpop.eup %6751  ;;  %6761 = vrcp.f32 %v4606_v29  ;;  %v4607_v28 = vadd.f32 1.0, %v6750_v3 }
 0xb0a   : > { %v6754_v31 = vpop.eup %6753  ;;  %6763 = vrcp.f32 %v4605_v30  ;;  %v4612_v32 = vadd.f32 1.0, %v6752_v59  ;;  %v6716_v30 = vld [vmem:[#allocation14 + $0x1e0] sm:$0xff]  }
 0xb0b   : > { %v6756_v60 = vpop.eup %6755  ;;  %6765 = vrcp.f32 %v4607_v28  ;;  %v4614_v33 = vadd.f32 1.0, %v6754_v31 }
 0xb0c   : > { %v6758_v34 = vpop.eup %6757  ;;  %6767 = vrcp.f32 %v4612_v32  ;;  %v4613_v35 = vadd.f32 1.0, %v6756_v60  ;;  %v6717_v32 = vld [vmem:[#allocation14 + $0x120] sm:$0xff]  }
 0xb0d   : > { %6769 = vrcp.f32 %v4614_v33  ;;  %v4615_v36 = vadd.f32 1.0, %v6758_v34  ;;  %v6718_v34 = vld [vmem:[#allocation14 + $0x1a0] sm:$0xff]  }
 0xb0e   : > { %6771 = vrcp.f32 %v4613_v35  ;;  %v6719_v35 = vld [vmem:[#allocation14 + $0x158] sm:$0xff]  }
 0xb0f   : > { %6773 = vrcp.f32 %v4615_v36 }
 0xb13   : > { %v4504_v44 = vpop.f32.mrf.mxu0  ;;  %v4547_v45 = vpop.f32.mrf.mxu1 }
 0xb14   : > { %v4505_v46 = vadd.f32 %v4504_v44, %v4043_v38  ;;  %v4548_v21 = vadd.f32 %v4547_v45, %v4051_v39 }
 0xb15   : > { %v6760_v47 = vpop.eup %6759  ;;  %v4506_v48 = vpop.f32.mrf.mxu0 }
 0xb16   : > { %v4549_v62 = vpop.f32.mrf.mxu1  ;;  %v6762_v51 = vpop.eup %6761  ;;  %v5919_v2 = vmul.f32 -1.442695, %v4505_v46  ;;  %v5921_v19 = vmul.f32 -1.442695, %v4548_v21  ;;  %v4507_v55 = vadd.f32 %v4506_v48, %v4047_v40  ;;  %v6721_v21 = vld [vmem:[#allocation14 + $0x118] sm:$0xff]  }
 0xb17   : > { %v4550_v53 = vadd.f32 %v4549_v62, %v4055_v6  ;;  %v6764_v61 = vpop.eup %6763  ;;  %v4508_v41 = vpop.f32.mrf.mxu0  ;;  %v6722_v48 = vld [vmem:[#allocation14 + $0x198] sm:$0xff]   ;;  %v6723_v62 = vld [vmem:[#allocation14 + $0x150] sm:$0xff]  }
 0xb18   : > { %v4551_v52 = vpop.f32.mrf.mxu1  ;;  %v6766_v63 = vpop.eup %6765  ;;  %6775 = vpow2.f32 %v5919_v2  ;;  %v5920_v37 = vmul.f32 -1.442695, %v4507_v55  ;;  %v4509_v54 = vadd.f32 %v4508_v41, %v4043_v38  ;;  %v6725_v2 = vld [vmem:[#allocation14 + $0x110] sm:$0xff]   ;;  %v6727_v55 = vld [vmem:[#allocation14 + $0x148] sm:$0xff]  }
 0xb19   : > { %v5922_v0 = vmul.f32 -1.442695, %v4550_v53  ;;  %v6768_v22 = vpop.eup %6767  ;;  %6777 = vpow2.f32 %v5921_v19  ;;  %v4552_v4 = vadd.f32 %v4551_v52, %v4051_v39  ;;  %v4510_v49 = vpop.f32.mrf.mxu0  ;;  %v6720_v39 = vld [vmem:[#allocation14 + $0x1d8] sm:$0xff]   ;;  %v6726_v19 = vld [vmem:[#allocation14 + $0x190] sm:$0xff]   ;;  %v6728_v53 = vld [vmem:[#allocation14 + $0x1c8] sm:$0xff]  }
 0xb1a   : > { %v4553_v42 = vpop.f32.mrf.mxu1  ;;  %v6770_v5 = vpop.eup %6769  ;;  %6779 = vpow2.f32 %v5920_v37  ;;  %v5927_v7 = vmul.f32 -1.442695, %v4509_v54  ;;  %v4511_v8 = vadd.f32 %v4510_v49, %v4047_v40  ;;  %v4652_v50 = vpack.c.bf16 %v6768_v22, %v6760_v47  ;;  %v6730_v41 = vld [vmem:[#allocation14 + $0x188] sm:$0xff]   ;;  %v6731_v52 = vld [vmem:[#allocation14 + $0x140] sm:$0xff]  }
 0xb1b   : > { %v4554_v43 = vadd.f32 %v4553_v42, %v4055_v6  ;;  %v6772_v9 = vpop.eup %6771  ;;  %6781 = vpow2.f32 %v5922_v0  ;;  %v5929_v10 = vmul.f32 -1.442695, %v4552_v4  ;;  %v4654_v16 = vpack.c.bf16 %v6770_v5, %v6762_v51  ;;  %v6724_v51 = vld [vmem:[#allocation14 + $0x1d0] sm:$0xff]   ;;  %v6732_v37 = vld [vmem:[#allocation14 + $0x1c0] sm:$0xff]  }
 0xb1c   : > { %v6774_v11 = vpop.eup %6773  ;;  %6783 = vpow2.f32 %v5927_v7  ;;  %v5928_v56 = vmul.f32 -1.442695, %v4511_v8  ;;  %v4653_v1 = vpack.c.bf16 %v6772_v9, %v6764_v61  ;;  %v6729_v61 = vld [vmem:[#allocation14 + $0x108] sm:$0xff]   ;;  %v6733_v22 = vld [vmem:[#allocation14 + $0x100] sm:$0xff]  }
 0xb1d   : > { %v5930_v12 = vmul.f32 -1.442695, %v4554_v43  ;;  %6785 = vpow2.f32 %v5929_v10  ;;  %v4655_v14 = vpack.c.bf16 %v6774_v11, %v6766_v63  ;;  %v6734_v49 = vld [vmem:[#allocation14 + $0x180] sm:$0xff]  }
 0xb1e   : > { %6787 = vpow2.f32 %v5928_v56  ;;  %5211 = vmatprep.mubr.bf16.mxu0 %v4653_v1 }
 0xb1f   : > { %6789 = vpow2.f32 %v5930_v12  ;;  %5252 = vmatprep.mubr.bf16.mxu1 %v4655_v14  ;;  %5212 = vmatmul.mubr.bf16.vlgmr.msra.gmra.mxu0 %v4652_v50 }
 0xb20   : > { %5253 = vmatmul.mubr.bf16.vlgmr.msra.gmra.mxu1 %v4654_v16  ;;  %6250 = vmatpush3.bf16.msra.mxu0 %v6705_v13 }
 0xb21   : > { %6272 = vmatpush3.bf16.msra.mxu1 %v6706_v15  ;;  %6251 = vmatprep.subr.bf16.mxu0 %v6707_v58  ;;  %v5931_v58 = vld [vmem:[#allocation16] ss:$0 sm:$0xff] }
 0xb22   : > { %6273 = vmatprep.subr.bf16.mxu1 %v6708_v57 }
 0xb24   : > { %6252 = vmatpush3.bf16.msra.mxu0 %v6709_v17 }
 0xb25   : > { %v6776_v25 = vpop.eup %6775  ;;  %6274 = vmatpush3.bf16.msra.mxu1 %v6710_v18  ;;  %6253 = vmatprep.subr.bf16.mxu0 %v6711_v20 }
 0xb26   : > { %v6778_v29 = vpop.eup %6777  ;;  %v4608_v3 = vadd.f32 1.0, %v6776_v25  ;;  %6275 = vmatprep.subr.bf16.mxu1 %v6712_v23 }
 0xb27   : > { %v6780_v59 = vpop.eup %6779  ;;  %v4610_v45 = vadd.f32 1.0, %v6778_v29 }
 0xb28   : > { %v6782_v28 = vpop.eup %6781  ;;  %v4609_v31 = vadd.f32 1.0, %v6780_v59  ;;  %6254 = vmatpush3.bf16.msra.mxu0 %v6713_v24  ;;  %6791 = vrcp.f32 %v4608_v3 }
 0xb29   : > { %v6784_v60 = vpop.eup %6783  ;;  %v4611_v33 = vadd.f32 1.0, %v6782_v28  ;;  %6276 = vmatpush3.bf16.msra.mxu1 %v6714_v26  ;;  %6255 = vmatprep.subr.bf16.mxu0 %v6715_v27 }
 0xb2a   : > { %v6786_v36 = vpop.eup %6785  ;;  %6793 = vrcp.f32 %v4609_v31  ;;  %v4616_v38 = vadd.f32 1.0, %v6784_v60  ;;  %6277 = vmatprep.subr.bf16.mxu1 %v6716_v30 }
 0xb2b   : > { %v6788_v40 = vpop.eup %6787  ;;  %6795 = vrcp.f32 %v4611_v33  ;;  %v4618_v6 = vadd.f32 1.0, %v6786_v36 }
 0xb2c   : > { %v6790_v44 = vpop.eup %6789  ;;  %6797 = vrcp.f32 %v4616_v38  ;;  %v4617_v46 = vadd.f32 1.0, %v6788_v40  ;;  %6256 = vmatpush3.bf16.msra.mxu0 %v6717_v32 }
 0xb2d   : > { %6799 = vrcp.f32 %v4618_v6  ;;  %v4619_v47 = vadd.f32 1.0, %v6790_v44  ;;  %6278 = vmatpush3.bf16.msra.mxu1 %v6718_v34  ;;  %6257 = vmatprep.subr.bf16.mxu0 %v6719_v35 }
 0xb2e   : > { %6801 = vrcp.f32 %v4617_v46  ;;  %6279 = vmatprep.subr.bf16.mxu1 %v6720_v39 }
 0xb2f   : > { %6803 = vrcp.f32 %v4619_v47 }
 0xb30   : > { %6805 = vrcp.f32 %v4610_v45  ;;  %6258 = vmatpush3.bf16.msra.mxu0 %v6721_v21 }
 0xb31   : > { %6280 = vmatpush3.bf16.msra.mxu1 %v6722_v48  ;;  %6259 = vmatprep.subr.bf16.mxu0 %v6723_v62 }
 0xb32   : > { %6281 = vmatprep.subr.bf16.mxu1 %v6724_v51 }
 0xb34   : > { %6260 = vmatpush3.bf16.msra.mxu0 %v6725_v2 }
 0xb35   : > { %6282 = vmatpush3.bf16.msra.mxu1 %v6726_v19  ;;  %6261 = vmatprep.subr.bf16.mxu0 %v6727_v55  ;;  %v6792_v63 = vpop.eup %6791 }
 0xb36   : > { %6283 = vmatprep.subr.bf16.mxu1 %v6728_v53 }
 0xb37   : > { %v6794_v0 = vpop.eup %6793 }
 0xb38   : > { %v6796_v54 = vpop.eup %6795  ;;  %6262 = vmatpush3.bf16.msra.mxu0 %v6729_v61 }
 0xb39   : > { %v6798_v4 = vpop.eup %6797  ;;  %6284 = vmatpush3.bf16.msra.mxu1 %v6730_v41  ;;  %6263 = vmatprep.subr.bf16.mxu0 %v6731_v52 }
 0xb3a   : > { %v6800_v42 = vpop.eup %6799  ;;  %6285 = vmatprep.subr.bf16.mxu1 %v6732_v37  ;;  %v4656_v10 = vpack.c.bf16 %v6798_v4, %v6792_v63 }
 0xb3b   : > { %v6802_v5 = vpop.eup %6801 }
 0xb3c   : > { %v6804_v7 = vpop.eup %6803  ;;  %6264 = vmatpush3.bf16.msra.mxu0 %v6733_v22  ;;  %v4657_v8 = vpack.c.bf16 %v6802_v5, %v6794_v0 }
 0xb3d   : > { %v6806_v43 = vpop.eup %6805  ;;  %6286 = vmatpush3.bf16.msra.mxu1 %v6734_v49  ;;  %v4659_v9 = vpack.c.bf16 %v6804_v7, %v6796_v54 }
 0xb3e   : > { %5293 = vmatprep.mubr.bf16.mxu0 %v4657_v8  ;;  %v4658_v11 = vpack.c.bf16 %v6800_v42, %v6806_v43 }
 0xb3f   : > { %5334 = vmatprep.mubr.bf16.mxu1 %v4659_v9  ;;  %5294 = vmatmul.mubr.bf16.vlgmr.msra.gmra.mxu0 %v4656_v10 }
 0xb40   : > { %5335 = vmatmul.mubr.bf16.vlgmr.msra.gmra.mxu1 %v4658_v11 }
 0xbdf   : > { %v6221_v56 = vpop.f32.mrf.mxu0 }
 0xbe0   : > { %v6243_v12 = vpop.f32.mrf.mxu1 }
 0xbe1   : > { %v6222_v1 = vpop.f32.mrf.mxu0 }
 0xbe2   : > { %v6244_v13 = vpop.f32.mrf.mxu1  ;;  %v6223_v50 = vadd.f32 %v6222_v1, %v6221_v56 }
 0xbe3   : > { %v6224_v14 = vpop.f32.mrf.mxu0  ;;  %v6245_v23 = vadd.f32 %v6244_v13, %v6243_v12 }
 0xbe4   : > { %v6246_v15 = vpop.f32.mrf.mxu1  ;;  %v5214_v57 = vadd.f32 %v6223_v50, %v5931_v58 }
 0xbe5   : > { %v6225_v16 = vpop.f32.mrf.mxu0 }
 0xbe6   : > { %v6226_v17 = vadd.f32 %v6225_v16, %v6224_v14  ;;  %v6247_v18 = vpop.f32.mrf.mxu1  ;;  %v5255_v26 = vadd.f32 %v6245_v23, %v5214_v57 }
 0xbe7   : > { %v6248_v59 = vadd.f32 %v6247_v18, %v6246_v15 }
 0xbe8   : > { %v5217_v27 = vadd.f32 %v6226_v17, %v5931_v58 }
 0xbea   : > { %v5258_v33 = vadd.f32 %v6248_v59, %v5217_v27 }
 0xbff   : > { %v6265_v20 = vpop.f32.mrf.mxu0 }
 0xc00   : > { %v6287_v24 = vpop.f32.mrf.mxu1 }
 0xc01   : > { %v6266_v25 = vpop.f32.mrf.mxu0 }
 0xc02   : > { %v6267_v29 = vadd.f32 %v6266_v25, %v6265_v20  ;;  %v6288_v3 = vpop.f32.mrf.mxu1 }
 0xc03   : > { %v6268_v30 = vpop.f32.mrf.mxu0  ;;  %v6289_v31 = vadd.f32 %v6288_v3, %v6287_v24 }
 0xc04   : > { %v5296_v28 = vadd.f32 %v6267_v29, %v5255_v26  ;;  %v6290_v32 = vpop.f32.mrf.mxu1 }
 0xc05   : > { %v6269_v60 = vpop.f32.mrf.mxu0 }
 0xc06   : > { %v5337_v34 = vadd.f32 %v6289_v31, %v5296_v28  ;;  %v6270_v35 = vadd.f32 %v6269_v60, %v6268_v30  ;;  %v6291_v36 = vpop.f32.mrf.mxu1 }
 0xc07   : > { %v6292_v39 = vadd.f32 %v6291_v36, %v6290_v32 }
 0xc08   : > { %5343 = vst [vmem:[%s8094_s30] sm:$0xff] %v5337_v34  ;;  %v5299_v38 = vadd.f32 %v6270_v35, %v5258_v33 }
 0xc0a   : > { %v5340_v40 = vadd.f32 %v6292_v39, %v5299_v38 }
 0xc0c   : > { %5344 = vst [vmem:[%s8094_s30 + $0x8] sm:$0xff] %v5340_v40 }
 0xc0d PF: > { %s8095_s28 = sld [smem:[#allocation23_spill]]  ;;  %s8098_s25 = smov %s7091_s26 }
 0xc0e   : > { %s8096_s20 = sld [smem:[#allocation22_spill]] }
 0xc0f   : > { %s8097_s27 = sld [smem:[#allocation24_spill]] }
 0xc13   : > { %p29_p6 = scmp.ge.s32.totalorder %s8095_s28, 4  }
 0xc14   : > { %s8099_s26 = smov %s8096_s20 }
 0xc15   :  { %31 = sbr.rel (!%p29_p6) target bundleno = 17 (0x11), region = 178 }
 0xc1a   :  { %5356 = vsyncpa [#allocation4], 1 }
 0xc1b   :  { %5358 = vsyncpa [#allocation4 + $0x1], 1 }
 0xc1c   :  { %5359 = vsyncpa [#allocation6], 1 }
 0xc1d   :  { %5361 = vsyncpa [#allocation6 + $0x1], 1 }
 0xc1e   :  { %5362 = vsyncpa [#allocation9], 1 }
 0xc1f   :  { %5364 = vsyncpa [#allocation9 + $0x1], 1 }
 0xc20   :  { %5365 = vsyncpa [#allocation12], 1 }
 0xc21   :  { %5366 = vsyncpa [#allocation15], 1 }

</bundles_post_ra>
